<compile_context>
chip_gen: v7x
topology: tpu7x:2x2x1
jax: 0.10.0
libtpu: 0.0.40
codegen_flags: <defaults>
</compile_context>

<pallas_src>
import functools

import numpy as np
import jax
import jax.numpy as jnp
from jax.experimental import pallas as pl
from jax.experimental.pallas import tpu as pltpu

# ----------------------- scaled-down config ---------------------------------
IMAGE_DIM_OUT = 128           # image_dim_out        (1024 in the real model)
HIDDEN_SIZE   = 128           # projection hidden    (n_embd / hidden_size)
NUM_CHANNELS  = 3
PATCH_SIZE    = 4             # CLIP patch size      (14 in the real model)
CROP_SIZE     = 32            # per-crop H=W         (336 in the real model)
H_PATCH       = CROP_SIZE // PATCH_SIZE      # 8 patches per side (24 real)
L_PATCH       = H_PATCH * H_PATCH            # 64 tokens per crop (576 real)
HD_DIM        = IMAGE_DIM_OUT * 4            # 512 (4096 real)

K_RAW  = NUM_CHANNELS * PATCH_SIZE * PATCH_SIZE          # 48 (588 real)
K_PAD  = ((K_RAW + 127) // 128) * 128                    # lane-aligned 128 (640 real)

TM_PE   = 512                 # patch-embed M tile
TM_PROJ = 256                 # projection  M tile
TK_PROJ = 512                 # projection  K tile (streams w1; 8 steps at real scale)

_INV_SQRT2 = 0.7071067811865476
_ERF_A1, _ERF_A2, _ERF_A3 = 0.254829592, -0.284496736, 1.421413741
_ERF_A4, _ERF_A5, _ERF_P = -1.453152027, 1.061405429, 0.3275911


# ----------------------- in-kernel math helpers ------------------------------
def _erf_approx(x, recip):
    # Abramowitz & Stegun 7.1.26 rational approximation (max abs err ~1.5e-7).
    ax = jnp.abs(x)
    t = recip(1.0 + _ERF_P * ax)
    poly = ((((_ERF_A5 * t + _ERF_A4) * t + _ERF_A3) * t + _ERF_A2) * t + _ERF_A1) * t
    e = poly * jnp.exp(-ax * ax)                 # = 1 - erf(|x|)
    return jnp.where(x >= 0.0, 1.0 - e, e - 1.0)


def _gelu_exact(x, *, approx_recip=False):
    # matches torch.nn.GELU() (erf-based, approximate='none')
    if approx_recip:
        recip = lambda d: pl.reciprocal(d, approx=True)   # EUP slot, not VALU
    else:
        recip = lambda d: 1.0 / d
    return 0.5 * x * (1.0 + _erf_approx(x * _INV_SQRT2, recip))


# ----------------------- VMEM budgeting --------------------------------------
def _device_vmem_capacity():
    try:
        cap = getattr(pltpu.get_tpu_info(), "vmem_capacity_bytes", None)
    except Exception:
        cap = None
    return int(cap) if cap else 64 * 1024 * 1024     # conservative v7x-safe default


def _vmem_limit_bytes(streamed, resident, headroom=1.25):
    """streamed/resident: iterables of (shape, dtype).

    Streamed blocks are double-buffered by the pipeline (x2); resident blocks
    (constant index_map) and scratch are counted once. Clamped to the physical
    VMEM capacity minus a margin so the request is always satisfiable.
    """
    def nbytes(items):
        return sum(int(np.prod(s)) * jnp.dtype(d).itemsize for s, d in items)
    want = int((2 * nbytes(streamed) + nbytes(resident)) * headroom) + (2 << 20)
    want = max(want, 16 * 1024 * 1024)
    return min(want, _device_vmem_capacity() - (4 << 20))


# ----------------------- Pallas kernels --------------------------------------
def _patch_embed_kernel(x_ref, w_ref, o_ref):
    # x: [tm, Kpad] bf16 (streamed), w: [Kpad, D] bf16 (resident) -> o: [tm, D] bf16
    o_ref[...] = jnp.dot(
        x_ref[...], w_ref[...], preferred_element_type=jnp.float32
    ).astype(o_ref.dtype)


def patch_embed(x_patches, w, *, tm=TM_PE):
    """x_patches: [Np, K_PAD] bf16, w: [K_PAD, D] bf16 -> [Np, D] bf16."""
    npatch, k = x_patches.shape
    d = w.shape[1]
    n_pad = pl.cdiv(npatch, tm) * tm
    if n_pad != npatch:
        x_patches = jnp.pad(x_patches, ((0, n_pad - npatch), (0, 0)))
    grid = (n_pad // tm,)
    cost = pl.CostEstimate(
        flops=2 * n_pad * k * d,
        transcendentals=0,
        bytes_accessed=2 * (n_pad * k + k * d + n_pad * d),
    )
    # TODO(synk): on v7x, pltpu.CORE_PARALLEL on this axis would shard grid
    # steps across the 2 TensorCores; kept "parallel" for portability.
    out = pl.pallas_call(
        _patch_embed_kernel,
        out_shape=jax.ShapeDtypeStruct((n_pad, d), jnp.bfloat16),
        grid=grid,
        in_specs=[
            pl.BlockSpec((tm, k), lambda i: (i, 0)),        # streamed over M
            pl.BlockSpec((k, d), lambda i: (0, 0)),         # resident weight
        ],
        out_specs=pl.BlockSpec((tm, d), lambda i: (i, 0)),
        compiler_params=pltpu.CompilerParams(
            dimension_semantics=("parallel",),
            vmem_limit_bytes=_vmem_limit_bytes(
                streamed=[((tm, k), jnp.bfloat16), ((tm, d), jnp.bfloat16)],
                resident=[((k, d), jnp.bfloat16)],
            ),
        ),
        cost_estimate=cost,
    )(x_patches, w)
    return out[:npatch]


def _img_projection_kernel(x_ref, w1_ref, b1_ref, w2_ref, b2_ref, o_ref, acc_ref):
    # fused Linear(4C -> P) -> GELU(exact) -> Linear(P -> P)
    # w1 is streamed over the K grid axis into an f32 accumulator; on the last
    # K step the bias/GELU/second matmul run and the bf16 output is stored.
    k = pl.program_id(1)

    @pl.when(k == 0)
    def _init():
        acc_ref[...] = jnp.zeros_like(acc_ref)

    acc_ref[...] += jnp.dot(x_ref[...], w1_ref[...], preferred_element_type=jnp.float32)

    @pl.when(k == pl.num_programs(1) - 1)
    def _finalize():
        h = _gelu_exact(acc_ref[...] + b1_ref[...], approx_recip=True)
        o_ref[...] = (
            jnp.dot(h.astype(w2_ref.dtype), w2_ref[...], preferred_element_type=jnp.float32)
            + b2_ref[...]
        ).astype(o_ref.dtype)


def img_projection(x, w1, b1, w2, b2, *, tm=TM_PROJ, tk=TK_PROJ):
    """x: [T, 4C] bf16 (all images batched) -> [T, P] bf16."""
    t, cin = x.shape
    p = w1.shape[1]
    tk = min(tk, cin)
    assert cin % tk == 0, (cin, tk)
    t_pad = pl.cdiv(t, tm) * tm
    if t_pad != t:
        x = jnp.pad(x, ((0, t_pad - t), (0, 0)))
    grid = (t_pad // tm, cin // tk)
    cost = pl.CostEstimate(
        flops=2 * t_pad * cin * p + 2 * t_pad * p * p,
        transcendentals=2 * t_pad * p,                      # exp + recip in erf-GELU
        bytes_accessed=2 * (t_pad * cin + cin * p + p * p + t_pad * p) + 4 * 2 * p,
    )
    out = pl.pallas_call(
        _img_projection_kernel,
        out_shape=jax.ShapeDtypeStruct((t_pad, p), jnp.bfloat16),
        grid=grid,
        in_specs=[
            pl.BlockSpec((tm, tk), lambda i, k: (i, k)),     # streamed tokens x K
            pl.BlockSpec((tk, p), lambda i, k: (k, 0)),      # streamed w1 (K axis)
            pl.BlockSpec((1, p), lambda i, k: (0, 0)),       # resident b1
            pl.BlockSpec((p, p), lambda i, k: (0, 0)),       # resident w2
            pl.BlockSpec((1, p), lambda i, k: (0, 0)),       # resident b2
        ],
        out_specs=pl.BlockSpec((tm, p), lambda i, k: (i, 0)),
        scratch_shapes=[pltpu.VMEM((tm, p), jnp.float32)],
        compiler_params=pltpu.CompilerParams(
            dimension_semantics=("parallel", "arbitrary"),
            vmem_limit_bytes=_vmem_limit_bytes(
                streamed=[((tm, tk), jnp.bfloat16), ((tk, p), jnp.bfloat16),
                          ((tm, p), jnp.bfloat16)],
                resident=[((p, p), jnp.bfloat16), ((1, p), jnp.float32),
                          ((1, p), jnp.float32), ((tm, p), jnp.float32)],
            ),
        ),
        cost_estimate=cost,
    )(x, w1, b1, w2, b2)
    return out[:t]


# ----------------------- plain-JAX reference paths (same quantization) -------
def _patch_embed_ref(x_patches, w):
    return jnp.dot(x_patches, w, preferred_element_type=jnp.float32).astype(jnp.bfloat16)


def _img_projection_ref(x, w1, b1, w2, b2):
    h = jnp.dot(x, w1, preferred_element_type=jnp.float32) + b1
    h = _gelu_exact(h)
    out = jnp.dot(h.astype(jnp.bfloat16), w2, preferred_element_type=jnp.float32) + b2
    return out.astype(jnp.bfloat16)


# ----------------------- HD-transform glue (traced under jit) ----------------
def _reshape_hd_patches_2x2merge(image_features, h_crop, w_crop):
    n, l, c = image_features.shape
    assert n % (h_crop * w_crop) == 0
    num_images = n // (h_crop * w_crop)
    hh = int(round(l ** 0.5))
    x = image_features.reshape(n, hh, hh, c)
    x = x.reshape(n, hh // 2, 2, hh // 2, 2, c)
    x = x.transpose(0, 1, 3, 2, 4, 5)
    x = x.reshape(n, -1, 4 * c)
    x = x.reshape(num_images, h_crop, w_crop, hh // 2, hh // 2, 4 * c)
    x = x.transpose(0, 1, 3, 2, 4, 5)
    x = x.reshape(num_images, h_crop * hh // 2, w_crop * hh // 2, 4 * c)
    return x


def _add_image_newline(image_features_hd, sub_GN):
    num_images, h, w, hid = image_features_hd.shape
    newline = jnp.broadcast_to(sub_GN, (num_images, h, 1, hid))
    return jnp.concatenate([image_features_hd, newline], axis=2).reshape(num_images, -1, hid)


def _get_img_features(params, pixel_values, use_pallas):
    # TODO(synk): the real module runs a 23-layer CLIPVisionModel here and drops the
    # CLS token (type_feature='patch'); only its patch-embedding conv (as a Pallas
    # matmul) is reproduced in this synthetic kernel.
    b, c, h, w = pixel_values.shape
    hp, wp = h // PATCH_SIZE, w // PATCH_SIZE
    x = pixel_values.reshape(b, c, hp, PATCH_SIZE, wp, PATCH_SIZE)
    x = x.transpose(0, 2, 4, 1, 3, 5)                      # (B, Hp, Wp, c, p, p)
    x = x.reshape(b * hp * wp, K_RAW)
    # K-pad + bf16 cast live inside the jitted program, so they fuse with the
    # patch-extraction transpose instead of being standalone HBM copies.
    x = jnp.pad(x, ((0, 0), (0, K_PAD - K_RAW))).astype(jnp.bfloat16)
    if use_pallas:
        feats = patch_embed(x, params["patch_w"])
    else:
        feats = _patch_embed_ref(x, params["patch_w"])
    return feats.reshape(b, hp * wp, IMAGE_DIM_OUT)        # (B, L, image_dim_out) bf16


def _hd_feature_transform(params, image_features, image_sizes, use_pallas):
    # TODO(synk): the 2x2-merge / newline gather could be fused into the projection
    # kernel via a PrefetchScalarGridSpec row-index table (skips one HBM round-trip of
    # the 4C slab); kept as XLA glue inside the single jitted program here.
    global_image_features = image_features[:, 0]            # (num_images, L, C)
    global_hd = _reshape_hd_patches_2x2merge(global_image_features, 1, 1)
    global_hd_newline = _add_image_newline(global_hd, params["sub_GN"])

    # Build every image's HD token stream, then project ALL of them with one
    # batched pallas_call (weights DMA'd once, no per-T recompiles).
    per_image_tokens = []
    lengths = []
    for i, (h, w) in enumerate(image_sizes):
        h_crop = h // CROP_SIZE
        w_crop = w // CROP_SIZE
        num_crops = h_crop * w_crop
        sub = image_features[i, 1:1 + num_crops]            # (num_crops, L, C)
        sub_hd = _reshape_hd_patches_2x2merge(sub, h_crop, w_crop)
        sub_hd_newline = _add_image_newline(sub_hd, params["sub_GN"])
        image_embeddings = jnp.concatenate(
            [
                jnp.squeeze(sub_hd_newline, 0),
                jnp.squeeze(params["glb_GN"], 0),
                global_hd_newline[i],
            ],
            axis=0,
        )                                                   # (T_i, 4C) bf16
        per_image_tokens.append(image_embeddings)
        lengths.append(image_embeddings.shape[0])

    slab = jnp.concatenate(per_image_tokens, axis=0)        # (sum T_i, 4C)
    if use_pallas:
        proj = img_projection(slab, params["w1"], params["b1"], params["w2"], params["b2"])
    else:
        proj = _img_projection_ref(slab, params["w1"], params["b1"], params["w2"], params["b2"])

    outs, off = [], 0
    for t in lengths:
        outs.append(proj[off:off + t])
        off += t
    return tuple(outs)


@functools.partial(jax.jit, static_argnames=("image_sizes", "use_pallas"))
def _phi3_hd_forward(params, pixel_values, *, image_sizes, use_pallas):
    num_images, num_crops, c, h, w = pixel_values.shape
    pv = pixel_values.reshape(num_images * num_crops, c, h, w)
    feats = _get_img_features(params, pv, use_pallas)
    feats = feats.reshape(num_images, num_crops, -1, IMAGE_DIM_OUT)
    return _hd_feature_transform(params, feats, image_sizes, use_pallas)


# ----------------------- the module -------------------------------------------
class Phi3HDImageEmbeddingPallas:
    """JAX/Pallas re-implementation of Phi3HDImageEmbedding (HD transform)."""

    def __init__(self, key, image_dim_out=IMAGE_DIM_OUT, hidden_size=HIDDEN_SIZE):
        self.image_dim_out = image_dim_out
        self.hd_transform_order = "sub_glb"
        self.type_feature = "patch"
        self.use_pallas = True
        hd = image_dim_out * 4
        scale = 0.02
        ks = jax.random.split(key, 6)
        # stub vision-backbone patch-embedding conv (Conv2d stride=patch, bias=False),
        # stored pre-flattened + K-padded in bf16 (MXU-native dtype).
        pw = scale * jax.random.normal(ks[0], (K_RAW, image_dim_out))
        pw = jnp.pad(pw, ((0, K_PAD - K_RAW), (0, 0)))
        self.params = dict(
            patch_w=pw.astype(jnp.bfloat16),
            glb_GN=(scale * jax.random.normal(ks[1], (1, 1, hd))).astype(jnp.bfloat16),
            sub_GN=(scale * jax.random.normal(ks[2], (1, 1, 1, hd))).astype(jnp.bfloat16),
            # img_projection = Linear(4C, P) -> GELU -> Linear(P, P)
            w1=(scale * jax.random.normal(ks[3], (hd, hidden_size))).astype(jnp.bfloat16),
            b1=jnp.zeros((1, hidden_size), jnp.float32),
            w2=(scale * jax.random.normal(ks[4], (hidden_size, hidden_size))).astype(jnp.bfloat16),
            b2=(scale * jax.random.normal(ks[5], (1, hidden_size))).astype(jnp.float32),
        )

    def forward(self, pixel_values, image_sizes):
        # image_sizes passed as a static tuple so crop layouts give static shapes and
        # a single jitted program per layout (no per-call retracing).
        sizes = tuple((int(h), int(w)) for h, w in np.asarray(image_sizes))
        return list(_phi3_hd_forward(self.params, pixel_values,
                                     image_sizes=sizes, use_pallas=self.use_pallas))


# ----------------------------- main -------------------------------------------
if __name__ == "__main__":
    key = jax.random.PRNGKey(0)
    k_param, k_pix = jax.random.split(key)

    module = Phi3HDImageEmbeddingPallas(k_param)

    # image 0: 32x32  -> 1x1 sub-crops ; image 1: 32x64 -> 1x2 sub-crops
    image_sizes = np.array([[CROP_SIZE, CROP_SIZE], [CROP_SIZE, 2 * CROP_SIZE]], dtype=np.int32)
    num_images, num_crops = 2, 3   # crop 0 = global, up to 2 sub-crops (padded)
    pixel_values = jax.random.normal(
        k_pix, (num_images, num_crops, NUM_CHANNELS, CROP_SIZE, CROP_SIZE), dtype=jnp.float32)

    outs = module.forward(pixel_values, image_sizes)
    outs = jax.block_until_ready(outs)

    # sanity check against a pure-JAX reference of the same (bf16-quantized) pipeline
    module.use_pallas = False
    ref_outs = jax.block_until_ready(module.forward(pixel_values, image_sizes))
    module.use_pallas = True

    expected_tokens = [4 * (4 + 1) + 1 + 4 * (4 + 1),      # 41
                       4 * (8 + 1) + 1 + 4 * (4 + 1)]      # 57
    for o, r, t in zip(outs, ref_outs, expected_tokens):
        assert o.shape == (t, HIDDEN_SIZE), o.shape
        assert o.dtype == jnp.bfloat16, o.dtype
        of, rf = o.astype(jnp.float32), r.astype(jnp.float32)
        assert bool(jnp.all(jnp.isfinite(of)))
        assert bool(jnp.allclose(of, rf, atol=1e-2, rtol=5e-2))

    print("KERNEL_OK")
</pallas_src>

<mosaic_0001>
module attributes {stable_mosaic.version = 11 : i64} {
  func.func @_patch_embed_kernel(%arg0: i32, %arg1: memref<512x128xbf16, #tpu.memory_space<vmem>>, %arg2: memref<128x128xbf16, #tpu.memory_space<vmem>>, %arg3: memref<512x128xbf16, #tpu.memory_space<vmem>>) attributes {dimension_semantics = [#tpu.dimension_semantics<parallel>], iteration_bounds = array<i64: 1>, scalar_prefetch = 0 : i64, scratch_operands = 0 : i64, tpu.core_type = #tpu.core_type<tc>, window_params = [{transform_indices = @transform_0, window_bounds = array<i64: 512, 128>}, {pipeline_mode = #tpu.pipeline_mode<synchronous>, transform_indices = @transform_1, window_bounds = array<i64: 128, 128>}, {transform_indices = @transform_2, window_bounds = array<i64: 512, 128>}]} {
    %c0 = arith.constant 0 : index
    %c0_0 = arith.constant 0 : index
    %0 = vector.load %arg1[%c0, %c0_0] : memref<512x128xbf16, #tpu.memory_space<vmem>>, vector<512x128xbf16>
    %c0_1 = arith.constant 0 : index
    %c0_2 = arith.constant 0 : index
    %1 = vector.load %arg2[%c0_1, %c0_2] : memref<128x128xbf16, #tpu.memory_space<vmem>>, vector<128x128xbf16>
    %cst = arith.constant dense<0.000000e+00> : vector<512x128xf32>
    %2 = tpu.matmul %0, %1, %cst {dimension_numbers = #tpu.dot_dimension_numbers<[1], [0], [0], [1], [0, 0, 1, 1], [], []>} : vector<512x128xbf16>, vector<128x128xbf16>, vector<512x128xf32> -> vector<512x128xf32>
    %3 = arith.truncf %2 : vector<512x128xf32> to vector<512x128xbf16>
    %c0_3 = arith.constant 0 : index
    %c0_4 = arith.constant 0 : index
    %4 = vector.load %arg3[%c0_3, %c0_4] : memref<512x128xbf16, #tpu.memory_space<vmem>>, vector<512x128xbf16>
    tpu.vector_store %arg3[%c0_3, %c0_4], %3 {strides = array<i32>} : memref<512x128xbf16, #tpu.memory_space<vmem>>, vector<512x128xbf16>,
    return
  }
  func.func @transform_0(%arg0: i32) -> (i32, i32) {
    %c0_i32 = arith.constant 0 : i32
    %c0_i32_0 = arith.constant 0 : i32
    return %arg0, %c0_i32 : i32, i32
  }
  func.func @transform_1(%arg0: i32) -> (i32, i32) {
    %c0_i32 = arith.constant 0 : i32
    %c0_i32_0 = arith.constant 0 : i32
    %c0_i32_1 = arith.constant 0 : i32
    return %c0_i32, %c0_i32_0 : i32, i32
  }
  func.func @transform_2(%arg0: i32) -> (i32, i32) {
    %c0_i32 = arith.constant 0 : i32
    %c0_i32_0 = arith.constant 0 : i32
    return %arg0, %c0_i32 : i32, i32
  }
}

module attributes {stable_mosaic.version = 11 : i64} {
  func.func @_img_projection_kernel(%arg0: i32, %arg1: i32, %arg2: memref<256x512xbf16, #tpu.memory_space<vmem>>, %arg3: memref<512x128xbf16, #tpu.memory_space<vmem>>, %arg4: memref<1x128xf32, #tpu.memory_space<vmem>>, %arg5: memref<128x128xbf16, #tpu.memory_space<vmem>>, %arg6: memref<1x128xf32, #tpu.memory_space<vmem>>, %arg7: memref<256x128xbf16, #tpu.memory_space<vmem>>, %arg8: memref<256x128xf32, #tpu.memory_space<vmem>>) attributes {dimension_semantics = [#tpu.dimension_semantics<parallel>, #tpu.dimension_semantics<arbitrary>], iteration_bounds = array<i64: 1, 1>, scalar_prefetch = 0 : i64, scratch_operands = 1 : i64, tpu.core_type = #tpu.core_type<tc>, window_params = [{transform_indices = @transform_0, window_bounds = array<i64: 256, 512>}, {transform_indices = @transform_1, window_bounds = array<i64: 512, 128>}, {pipeline_mode = #tpu.pipeline_mode<synchronous>, transform_indices = @transform_2, window_bounds = array<i64: 1, 128>}, {pipeline_mode = #tpu.pipeline_mode<synchronous>, transform_indices = @transform_3, window_bounds = array<i64: 128, 128>}, {pipeline_mode = #tpu.pipeline_mode<synchronous>, transform_indices = @transform_4, window_bounds = array<i64: 1, 128>}, {transform_indices = @transform_5, window_bounds = array<i64: 256, 128>}]} {
    %c0_i32 = arith.constant 0 : i32
    %0 = arith.cmpi eq, %arg1, %c0_i32 : i32
    %1 = arith.extui %0 : i1 to i32
    %c0_i32_0 = arith.constant 0 : i32
    %2 = arith.cmpi ne, %1, %c0_i32_0 : i32
    scf.if %2 {
      %cst_10 = arith.constant 0.000000e+00 : f32
      %12 = vector.broadcast %cst_10 : f32 to vector<256x128xf32>
      %c0_11 = arith.constant 0 : index
      %c0_12 = arith.constant 0 : index
      %13 = vector.load %arg8[%c0_11, %c0_12] : memref<256x128xf32, #tpu.memory_space<vmem>>, vector<256x128xf32>
      tpu.vector_store %arg8[%c0_11, %c0_12], %12 {strides = array<i32>} : memref<256x128xf32, #tpu.memory_space<vmem>>, vector<256x128xf32>,
    } else {
    }
    %c0 = arith.constant 0 : index
    %c0_1 = arith.constant 0 : index
    %3 = vector.load %arg8[%c0, %c0_1] : memref<256x128xf32, #tpu.memory_space<vmem>>, vector<256x128xf32>
    %c0_2 = arith.constant 0 : index
    %c0_3 = arith.constant 0 : index
    %4 = vector.load %arg2[%c0_2, %c0_3] : memref<256x512xbf16, #tpu.memory_space<vmem>>, vector<256x512xbf16>
    %c0_4 = arith.constant 0 : index
    %c0_5 = arith.constant 0 : index
    %5 = vector.load %arg3[%c0_4, %c0_5] : memref<512x128xbf16, #tpu.memory_space<vmem>>, vector<512x128xbf16>
    %cst = arith.constant dense<0.000000e+00> : vector<256x128xf32>
    %6 = tpu.matmul %4, %5, %cst {dimension_numbers = #tpu.dot_dimension_numbers<[1], [0], [0], [1], [0, 0, 1, 1], [], []>} : vector<256x512xbf16>, vector<512x128xbf16>, vector<256x128xf32> -> vector<256x128xf32>
    %7 = arith.addf %3, %6 : vector<256x128xf32>
    %c0_6 = arith.constant 0 : index
    %c0_7 = arith.constant 0 : index
    %8 = vector.load %arg8[%c0_6, %c0_7] : memref<256x128xf32, #tpu.memory_space<vmem>>, vector<256x128xf32>
    tpu.vector_store %arg8[%c0_6, %c0_7], %7 {strides = array<i32>} : memref<256x128xf32, #tpu.memory_space<vmem>>, vector<256x128xf32>,
    %c0_i32_8 = arith.constant 0 : i32
    %9 = arith.cmpi eq, %arg1, %c0_i32_8 : i32
    %10 = arith.extui %9 : i1 to i32
    %c0_i32_9 = arith.constant 0 : i32
    %11 = arith.cmpi ne, %10, %c0_i32_9 : i32
    scf.if %11 {
      %c0_10 = arith.constant 0 : index
      %c0_11 = arith.constant 0 : index
      %12 = vector.load %arg8[%c0_10, %c0_11] : memref<256x128xf32, #tpu.memory_space<vmem>>, vector<256x128xf32>
      %c0_12 = arith.constant 0 : index
      %c0_13 = arith.constant 0 : index
      %13 = vector.load %arg4[%c0_12, %c0_13] : memref<1x128xf32, #tpu.memory_space<vmem>>, vector<1x128xf32>
      %14 = vector.broadcast %13 : vector<1x128xf32> to vector<256x128xf32>
      %15 = arith.addf %12, %14 : vector<256x128xf32>
      %cst_14 = arith.constant 5.000000e-01 : f32
      %16 = vector.broadcast %cst_14 : f32 to vector<256x128xf32>
      %17 = arith.mulf %16, %15 : vector<256x128xf32>
      %cst_15 = arith.constant 0.707106769 : f32
      %18 = vector.broadcast %cst_15 : f32 to vector<256x128xf32>
      %19 = arith.mulf %15, %18 : vector<256x128xf32>
      %20 = math.absf %19 : vector<256x128xf32>
      %cst_16 = arith.constant 0.327591091 : f32
      %21 = vector.broadcast %cst_16 : f32 to vector<256x128xf32>
      %22 = arith.mulf %21, %20 : vector<256x128xf32>
      %cst_17 = arith.constant 1.000000e+00 : f32
      %23 = vector.broadcast %cst_17 : f32 to vector<256x128xf32>
      %24 = arith.addf %23, %22 : vector<256x128xf32>
      %25 = tpu.reciprocal %24 {approx = true} : vector<256x128xf32> -> vector<256x128xf32>
      %cst_18 = arith.constant 1.06140542 : f32
      %26 = vector.broadcast %cst_18 : f32 to vector<256x128xf32>
      %27 = arith.mulf %26, %25 : vector<256x128xf32>
      %cst_19 = arith.constant -1.45315206 : f32
      %28 = vector.broadcast %cst_19 : f32 to vector<256x128xf32>
      %29 = arith.addf %27, %28 : vector<256x128xf32>
      %30 = arith.mulf %29, %25 : vector<256x128xf32>
      %cst_20 = arith.constant 1.42141378 : f32
      %31 = vector.broadcast %cst_20 : f32 to vector<256x128xf32>
      %32 = arith.addf %30, %31 : vector<256x128xf32>
      %33 = arith.mulf %32, %25 : vector<256x128xf32>
      %cst_21 = arith.constant -0.284496725 : f32
      %34 = vector.broadcast %cst_21 : f32 to vector<256x128xf32>
      %35 = arith.addf %33, %34 : vector<256x128xf32>
      %36 = arith.mulf %35, %25 : vector<256x128xf32>
      %cst_22 = arith.constant 0.254829586 : f32
      %37 = vector.broadcast %cst_22 : f32 to vector<256x128xf32>
      %38 = arith.addf %36, %37 : vector<256x128xf32>
      %39 = arith.mulf %38, %25 : vector<256x128xf32>
      %cst_23 = arith.constant 0.000000e+00 : f32
      %40 = vector.broadcast %cst_23 : f32 to vector<256x128xf32>
      %41 = arith.subf %40, %20 : vector<256x128xf32>
      %42 = arith.mulf %41, %20 : vector<256x128xf32>
      %43 = math.exp %42 : vector<256x128xf32>
      %44 = arith.mulf %39, %43 : vector<256x128xf32>
      %cst_24 = arith.constant 0.000000e+00 : f32
      %45 = vector.broadcast %cst_24 : f32 to vector<256x128xf32>
      %46 = arith.cmpf oge, %19, %45 : vector<256x128xf32>
      %cst_25 = arith.constant 1.000000e+00 : f32
      %47 = vector.broadcast %cst_25 : f32 to vector<256x128xf32>
      %48 = arith.subf %47, %44 : vector<256x128xf32>
      %cst_26 = arith.constant 1.000000e+00 : f32
      %49 = vector.broadcast %cst_26 : f32 to vector<256x128xf32>
      %50 = arith.subf %44, %49 : vector<256x128xf32>
      %51 = arith.select %46, %48, %50 : vector<256x128xi1>, vector<256x128xf32>
      %cst_27 = arith.constant 1.000000e+00 : f32
      %52 = vector.broadcast %cst_27 : f32 to vector<256x128xf32>
      %53 = arith.addf %52, %51 : vector<256x128xf32>
      %54 = arith.mulf %17, %53 : vector<256x128xf32>
      %55 = arith.truncf %54 : vector<256x128xf32> to vector<256x128xbf16>
      %c0_28 = arith.constant 0 : index
      %c0_29 = arith.constant 0 : index
      %56 = vector.load %arg5[%c0_28, %c0_29] : memref<128x128xbf16, #tpu.memory_space<vmem>>, vector<128x128xbf16>
      %cst_30 = arith.constant dense<0.000000e+00> : vector<256x128xf32>
      %57 = tpu.matmul %55, %56, %cst_30 {dimension_numbers = #tpu.dot_dimension_numbers<[1], [0], [0], [1], [0, 0, 1, 1], [], []>} : vector<256x128xbf16>, vector<128x128xbf16>, vector<256x128xf32> -> vector<256x128xf32>
      %c0_31 = arith.constant 0 : index
      %c0_32 = arith.constant 0 : index
      %58 = vector.load %arg6[%c0_31, %c0_32] : memref<1x128xf32, #tpu.memory_space<vmem>>, vector<1x128xf32>
      %59 = vector.broadcast %58 : vector<1x128xf32> to vector<256x128xf32>
      %60 = arith.addf %57, %59 : vector<256x128xf32>
      %61 = arith.truncf %60 : vector<256x128xf32> to vector<256x128xbf16>
      %c0_33 = arith.constant 0 : index
      %c0_34 = arith.constant 0 : index
      %62 = vector.load %arg7[%c0_33, %c0_34] : memref<256x128xbf16, #tpu.memory_space<vmem>>, vector<256x128xbf16>
      tpu.vector_store %arg7[%c0_33, %c0_34], %61 {strides = array<i32>} : memref<256x128xbf16, #tpu.memory_space<vmem>>, vector<256x128xbf16>,
    } else {
    }
    return
  }
  func.func @transform_0(%arg0: i32, %arg1: i32) -> (i32, i32) {
    %c0_i32 = arith.constant 0 : i32
    return %arg0, %arg1 : i32, i32
  }
  func.func @transform_1(%arg0: i32, %arg1: i32) -> (i32, i32) {
    %c0_i32 = arith.constant 0 : i32
    %c0_i32_0 = arith.constant 0 : i32
    return %arg1, %c0_i32 : i32, i32
  }
  func.func @transform_2(%arg0: i32, %arg1: i32) -> (i32, i32) {
    %c0_i32 = arith.constant 0 : i32
    %c0_i32_0 = arith.constant 0 : i32
    %c0_i32_1 = arith.constant 0 : i32
    return %c0_i32, %c0_i32_0 : i32, i32
  }
  func.func @transform_3(%arg0: i32, %arg1: i32) -> (i32, i32) {
    %c0_i32 = arith.constant 0 : i32
    %c0_i32_0 = arith.constant 0 : i32
    %c0_i32_1 = arith.constant 0 : i32
    return %c0_i32, %c0_i32_0 : i32, i32
  }
  func.func @transform_4(%arg0: i32, %arg1: i32) -> (i32, i32) {
    %c0_i32 = arith.constant 0 : i32
    %c0_i32_0 = arith.constant 0 : i32
    %c0_i32_1 = arith.constant 0 : i32
    return %c0_i32, %c0_i32_0 : i32, i32
  }
  func.func @transform_5(%arg0: i32, %arg1: i32) -> (i32, i32) {
    %c0_i32 = arith.constant 0 : i32
    %c0_i32_0 = arith.constant 0 : i32
    return %arg0, %c0_i32 : i32, i32
  }
}

</mosaic_0001>

<bundles_post_ra>
// kernel: _phi3_hd_forward.2
= control target key start
LH: loop header
LB: loop body
LE: loop exit
PB: predicated region body
PF: predicated region fallthrough
CT: control target
= control target key end

     0   :  { %s1711_s1 = inlined_call_operand.vmem [shape: bf16[128,128], index: 1, kind: input, shape index: {}]   ;;  %s1712_s0 = inlined_call_operand.vmem [shape: bf16[512,128], index: 0, kind: input, shape index: {}]   ;;  %s1713_s2 = inlined_call_operand.vmem [shape: bf16[512,128], index: 2, kind: output, shape index: {}]  }
   0x1   :  { %v1440_v0 = vld [vmem:[%s1711_s1] sm:$0xff]   ;;  %v1441_v1 = vld [vmem:[%s1711_s1 + $0x8] sm:$0xff]   ;;  %v1442_v2 = vld [vmem:[%s1711_s1 + $0x10] sm:$0xff]  }
   0x2   :  { %1344 = vmatprep.subr.bf16.mxu0 %v1440_v0  ;;  %1424 = vmatprep.subr.bf16.mxu1 %v1440_v0  ;;  %v1443_v3 = vld [vmem:[%s1711_s1 + $0x18] sm:$0xff]   ;;  %v1448_v4 = vld [vmem:[%s1712_s0] sm:$0xff]   ;;  %v1445_v7 = vld [vmem:[%s1711_s1 + $0x28] sm:$0xff]  }
   0x3   :  { %1345 = vmatpush3.bf16.msra.mxu0 %v1440_v0  ;;  %1432 = vmatpush3.bf16.msra.mxu1 %v1440_v0  ;;  %v1449_v5 = vld [vmem:[%s1712_s0 + $0x80] sm:$0xff]   ;;  %v1446_v8 = vld [vmem:[%s1711_s1 + $0x30] sm:$0xff]   ;;  %v1447_v9 = vld [vmem:[%s1711_s1 + $0x38] sm:$0xff]  }
   0x4   :  { %1346 = vmatprep.subr.bf16.mxu0 %v1441_v1  ;;  %1425 = vmatprep.subr.bf16.mxu1 %v1441_v1  ;;  %v1444_v6 = vld [vmem:[%s1711_s1 + $0x20] sm:$0xff]   ;;  %v1450_v10 = vld [vmem:[%s1712_s0 + $0x8] sm:$0xff]   ;;  %v1452_v12 = vld [vmem:[%s1712_s0 + $0x10] sm:$0xff]  }
   0x5   :  { %1360 = vmatprep.mubr.bf16.mxu0 %v1448_v4  ;;  %1392 = vmatprep.mubr.bf16.mxu1 %v1449_v5  ;;  %v1451_v11 = vld [vmem:[%s1712_s0 + $0x88] sm:$0xff]   ;;  %v1453_v13 = vld [vmem:[%s1712_s0 + $0x90] sm:$0xff]   ;;  %v1454_v14 = vld [vmem:[%s1712_s0 + $0x18] sm:$0xff]  }
   0x6   :  { %v1455_v15 = vld [vmem:[%s1712_s0 + $0x98] sm:$0xff]   ;;  %v1456_v16 = vld [vmem:[%s1712_s0 + $0x20] sm:$0xff]   ;;  %v1458_v18 = vld [vmem:[%s1712_s0 + $0x28] sm:$0xff]  }
   0x7   :  { %1347 = vmatpush3.bf16.msra.mxu0 %v1441_v1  ;;  %1433 = vmatpush3.bf16.msra.mxu1 %v1441_v1  ;;  %v1457_v17 = vld [vmem:[%s1712_s0 + $0xa0] sm:$0xff]   ;;  %v1459_v19 = vld [vmem:[%s1712_s0 + $0xa8] sm:$0xff]   ;;  %v1460_v20 = vld [vmem:[%s1712_s0 + $0x30] sm:$0xff]  }
   0x8   :  { %1348 = vmatprep.subr.bf16.mxu0 %v1442_v2  ;;  %1426 = vmatprep.subr.bf16.mxu1 %v1442_v2  ;;  %v1461_v21 = vld [vmem:[%s1712_s0 + $0xb0] sm:$0xff]   ;;  %v1462_v22 = vld [vmem:[%s1712_s0 + $0x38] sm:$0xff]   ;;  %v1464_v24 = vld [vmem:[%s1712_s0 + $0x40] sm:$0xff]  }
   0x9   :  { %v1463_v23 = vld [vmem:[%s1712_s0 + $0xb8] sm:$0xff]   ;;  %v1465_v25 = vld [vmem:[%s1712_s0 + $0xc0] sm:$0xff]   ;;  %v1466_v26 = vld [vmem:[%s1712_s0 + $0x48] sm:$0xff]  }
   0xa   :  { %v1467_v27 = vld [vmem:[%s1712_s0 + $0xc8] sm:$0xff]   ;;  %v1468_v28 = vld [vmem:[%s1712_s0 + $0x50] sm:$0xff]   ;;  %v1470_v30 = vld [vmem:[%s1712_s0 + $0x58] sm:$0xff]  }
   0xb   :  { %1349 = vmatpush3.bf16.msra.mxu0 %v1442_v2  ;;  %1434 = vmatpush3.bf16.msra.mxu1 %v1442_v2  ;;  %v1469_v29 = vld [vmem:[%s1712_s0 + $0xd0] sm:$0xff]   ;;  %v1471_v31 = vld [vmem:[%s1712_s0 + $0xd8] sm:$0xff]   ;;  %v1472_v32 = vld [vmem:[%s1712_s0 + $0x60] sm:$0xff]  }
   0xc   :  { %1350 = vmatprep.subr.bf16.mxu0 %v1443_v3  ;;  %1427 = vmatprep.subr.bf16.mxu1 %v1443_v3  ;;  %v1473_v33 = vld [vmem:[%s1712_s0 + $0xe0] sm:$0xff]   ;;  %v1474_v34 = vld [vmem:[%s1712_s0 + $0x68] sm:$0xff]   ;;  %v1476_v36 = vld [vmem:[%s1712_s0 + $0x70] sm:$0xff]  }
   0xd   :  { %v1475_v35 = vld [vmem:[%s1712_s0 + $0xe8] sm:$0xff]   ;;  %v1477_v37 = vld [vmem:[%s1712_s0 + $0xf0] sm:$0xff]   ;;  %v1478_v38 = vld [vmem:[%s1712_s0 + $0x78] sm:$0xff]  }
   0xe   :  { %v1479_v39 = vld [vmem:[%s1712_s0 + $0xf8] sm:$0xff]  }
   0xf   :  { %1351 = vmatpush3.bf16.msra.mxu0 %v1443_v3  ;;  %1435 = vmatpush3.bf16.msra.mxu1 %v1443_v3 }
  0x10   :  { %1352 = vmatprep.subr.bf16.mxu0 %v1444_v6  ;;  %1428 = vmatprep.subr.bf16.mxu1 %v1444_v6 }
  0x13   :  { %1353 = vmatpush3.bf16.msra.mxu0 %v1444_v6  ;;  %1436 = vmatpush3.bf16.msra.mxu1 %v1444_v6 }
  0x14   :  { %1354 = vmatprep.subr.bf16.mxu0 %v1445_v7  ;;  %1429 = vmatprep.subr.bf16.mxu1 %v1445_v7 }
  0x17   :  { %1355 = vmatpush3.bf16.msra.mxu0 %v1445_v7  ;;  %1437 = vmatpush3.bf16.msra.mxu1 %v1445_v7 }
  0x18   :  { %1356 = vmatprep.subr.bf16.mxu0 %v1446_v8  ;;  %1430 = vmatprep.subr.bf16.mxu1 %v1446_v8 }
  0x1b   :  { %1357 = vmatpush3.bf16.msra.mxu0 %v1446_v8  ;;  %1438 = vmatpush3.bf16.msra.mxu1 %v1446_v8 }
  0x1c   :  { %1358 = vmatprep.subr.bf16.mxu0 %v1447_v9  ;;  %1431 = vmatprep.subr.bf16.mxu1 %v1447_v9 }
  0x1f   :  { %1359 = vmatpush3.bf16.msra.mxu0 %v1447_v9  ;;  %1439 = vmatpush3.bf16.msra.mxu1 %v1447_v9 }
  0x22   :  { %1361 = vmatmul.mubr.bf16.vlgmr.msra.gmra.mrb[0].mxu0 %v1450_v10  ;;  %1393 = vmatmul.mubr.bf16.vlgmr.msra.gmra.mrb[0].mxu1 %v1451_v11 }
  0x23   :  { %1364 = vmatprep.mubr.bf16.mxu0 %v1452_v12  ;;  %1396 = vmatprep.mubr.bf16.mxu1 %v1453_v13 }
  0x2a   :  { %1365 = vmatmul.mubr.bf16.gmra.mrb[4].mxu0 %v1454_v14  ;;  %1397 = vmatmul.mubr.bf16.gmra.mrb[4].mxu1 %v1455_v15 }
  0x2b   :  { %1368 = vmatprep.mubr.bf16.mxu0 %v1456_v16  ;;  %1400 = vmatprep.mubr.bf16.mxu1 %v1457_v17 }
  0x32   :  { %1369 = vmatmul.mubr.bf16.gmra.mrb[8].mxu0 %v1458_v18  ;;  %1401 = vmatmul.mubr.bf16.gmra.mrb[8].mxu1 %v1459_v19 }
  0x33   :  { %1372 = vmatprep.mubr.bf16.mxu0 %v1460_v20  ;;  %1404 = vmatprep.mubr.bf16.mxu1 %v1461_v21 }
  0x3a   :  { %1373 = vmatmul.mubr.bf16.gmra.mrb[12].mxu0 %v1462_v22  ;;  %1405 = vmatmul.mubr.bf16.gmra.mrb[12].mxu1 %v1463_v23 }
  0x3b   :  { %1376 = vmatprep.mubr.bf16.mxu0 %v1464_v24  ;;  %1408 = vmatprep.mubr.bf16.mxu1 %v1465_v25 }
  0x42   :  { %1377 = vmatmul.mubr.bf16.gmra.mrb[16].mxu0 %v1466_v26  ;;  %1409 = vmatmul.mubr.bf16.gmra.mrb[16].mxu1 %v1467_v27 }
  0x43   :  { %1380 = vmatprep.mubr.bf16.mxu0 %v1468_v28  ;;  %1412 = vmatprep.mubr.bf16.mxu1 %v1469_v29 }
  0x4a   :  { %1381 = vmatmul.mubr.bf16.gmra.mrb[20].mxu0 %v1470_v30  ;;  %1413 = vmatmul.mubr.bf16.gmra.mrb[20].mxu1 %v1471_v31 }
  0x4b   :  { %1384 = vmatprep.mubr.bf16.mxu0 %v1472_v32  ;;  %1416 = vmatprep.mubr.bf16.mxu1 %v1473_v33 }
  0x52   :  { %1385 = vmatmul.mubr.bf16.gmra.mrb[24].mxu0 %v1474_v34  ;;  %1417 = vmatmul.mubr.bf16.gmra.mrb[24].mxu1 %v1475_v35 }
  0x53   :  { %1388 = vmatprep.mubr.bf16.mxu0 %v1476_v36  ;;  %1420 = vmatprep.mubr.bf16.mxu1 %v1477_v37 }
  0x5a   :  { %1389 = vmatmul.mubr.bf16.gmra.mrb[28].mxu0 %v1478_v38  ;;  %1421 = vmatmul.mubr.bf16.gmra.mrb[28].mxu1 %v1479_v39 }
  0xf5   :  { %v1362_v40 = vpop.f32.mrb[0].mxu0  ;;  %v1394_v41 = vpop.f32.mrb[0].mxu1 }
  0xf6   :  { %v366_v42 = vpop.f32.mrb[1].mxu0  ;;  %v494_v43 = vpop.f32.mrb[1].mxu1 }
  0xf7   :  { %v1363_v44 = vpop.f32.mrb[2].mxu0  ;;  %v1395_v45 = vpop.f32.mrb[2].mxu1 }
  0xf8   :  { %v1121_v46 = vpack.c.bf16 %v1363_v44, %v1362_v40  ;;  %v1201_v47 = vpack.c.bf16 %v1395_v45, %v1394_v41  ;;  %v369_v48 = vpop.f32.mrb[3].mxu0  ;;  %v497_v49 = vpop.f32.mrb[3].mxu1 }
  0xf9   :  { %v1116_v50 = vpack.c.bf16 %v369_v48, %v366_v42  ;;  %v1196_v51 = vpack.c.bf16 %v497_v49, %v494_v43 }
  0xfa   :  { %1273 = vst [vmem:[%s1713_s2 + $0x8] sm:$0xff] %v1121_v46   ;;  %1289 = vst [vmem:[%s1713_s2 + $0x88] sm:$0xff] %v1201_v47  }
  0xfb   :  { %1117 = vst [vmem:[%s1713_s2] sm:$0xff] %v1116_v50   ;;  %1288 = vst [vmem:[%s1713_s2 + $0x80] sm:$0xff] %v1196_v51  }
  0xfd   :  { %v1366_v52 = vpop.f32.mrb[4].mxu0  ;;  %v1398_v53 = vpop.f32.mrb[4].mxu1 }
  0xfe   :  { %v382_v54 = vpop.f32.mrb[5].mxu0  ;;  %v510_v55 = vpop.f32.mrb[5].mxu1 }
  0xff   :  { %v1367_v56 = vpop.f32.mrb[6].mxu0  ;;  %v1399_v57 = vpop.f32.mrb[6].mxu1 }
 0x100   :  { %v1131_v58 = vpack.c.bf16 %v1367_v56, %v1366_v52  ;;  %v1211_v59 = vpack.c.bf16 %v1399_v57, %v1398_v53  ;;  %v385_v60 = vpop.f32.mrb[7].mxu0  ;;  %v513_v61 = vpop.f32.mrb[7].mxu1 }
 0x101   :  { %v1126_v62 = vpack.c.bf16 %v385_v60, %v382_v54  ;;  %v1206_v63 = vpack.c.bf16 %v513_v61, %v510_v55 }
 0x102   :  { %1275 = vst [vmem:[%s1713_s2 + $0x18] sm:$0xff] %v1131_v58   ;;  %1291 = vst [vmem:[%s1713_s2 + $0x98] sm:$0xff] %v1211_v59  }
 0x103   :  { %1274 = vst [vmem:[%s1713_s2 + $0x10] sm:$0xff] %v1126_v62   ;;  %1290 = vst [vmem:[%s1713_s2 + $0x90] sm:$0xff] %v1206_v63  }
 0x105   :  { %v1370_v0 = vpop.f32.mrb[8].mxu0  ;;  %v1402_v1 = vpop.f32.mrb[8].mxu1 }
 0x106   :  { %v398_v2 = vpop.f32.mrb[9].mxu0  ;;  %v526_v3 = vpop.f32.mrb[9].mxu1 }
 0x107   :  { %v1371_v4 = vpop.f32.mrb[10].mxu0  ;;  %v1403_v5 = vpop.f32.mrb[10].mxu1 }
 0x108   :  { %v1141_v6 = vpack.c.bf16 %v1371_v4, %v1370_v0  ;;  %v1221_v7 = vpack.c.bf16 %v1403_v5, %v1402_v1  ;;  %v401_v8 = vpop.f32.mrb[11].mxu0  ;;  %v529_v9 = vpop.f32.mrb[11].mxu1 }
 0x109   :  { %v1136_v10 = vpack.c.bf16 %v401_v8, %v398_v2  ;;  %v1216_v11 = vpack.c.bf16 %v529_v9, %v526_v3 }
 0x10a   :  { %1277 = vst [vmem:[%s1713_s2 + $0x28] sm:$0xff] %v1141_v6   ;;  %1293 = vst [vmem:[%s1713_s2 + $0xa8] sm:$0xff] %v1221_v7  }
 0x10b   :  { %1276 = vst [vmem:[%s1713_s2 + $0x20] sm:$0xff] %v1136_v10   ;;  %1292 = vst [vmem:[%s1713_s2 + $0xa0] sm:$0xff] %v1216_v11  }
 0x10d   :  { %v1374_v12 = vpop.f32.mrb[12].mxu0  ;;  %v1406_v13 = vpop.f32.mrb[12].mxu1 }
 0x10e   :  { %v414_v14 = vpop.f32.mrb[13].mxu0  ;;  %v542_v15 = vpop.f32.mrb[13].mxu1 }
 0x10f   :  { %v1375_v16 = vpop.f32.mrb[14].mxu0  ;;  %v1407_v17 = vpop.f32.mrb[14].mxu1 }
 0x110   :  { %v1151_v18 = vpack.c.bf16 %v1375_v16, %v1374_v12  ;;  %v1231_v19 = vpack.c.bf16 %v1407_v17, %v1406_v13  ;;  %v417_v20 = vpop.f32.mrb[15].mxu0  ;;  %v545_v21 = vpop.f32.mrb[15].mxu1 }
 0x111   :  { %v1146_v22 = vpack.c.bf16 %v417_v20, %v414_v14  ;;  %v1226_v23 = vpack.c.bf16 %v545_v21, %v542_v15 }
 0x112   :  { %1279 = vst [vmem:[%s1713_s2 + $0x38] sm:$0xff] %v1151_v18   ;;  %1295 = vst [vmem:[%s1713_s2 + $0xb8] sm:$0xff] %v1231_v19  }
 0x113   :  { %1278 = vst [vmem:[%s1713_s2 + $0x30] sm:$0xff] %v1146_v22   ;;  %1294 = vst [vmem:[%s1713_s2 + $0xb0] sm:$0xff] %v1226_v23  }
 0x115   :  { %v1378_v24 = vpop.f32.mrb[16].mxu0  ;;  %v1410_v25 = vpop.f32.mrb[16].mxu1 }
 0x116   :  { %v430_v26 = vpop.f32.mrb[17].mxu0  ;;  %v558_v27 = vpop.f32.mrb[17].mxu1 }
 0x117   :  { %v1379_v28 = vpop.f32.mrb[18].mxu0  ;;  %v1411_v29 = vpop.f32.mrb[18].mxu1 }
 0x118   :  { %v1161_v30 = vpack.c.bf16 %v1379_v28, %v1378_v24  ;;  %v1241_v31 = vpack.c.bf16 %v1411_v29, %v1410_v25  ;;  %v433_v32 = vpop.f32.mrb[19].mxu0  ;;  %v561_v33 = vpop.f32.mrb[19].mxu1 }
 0x119   :  { %v1156_v34 = vpack.c.bf16 %v433_v32, %v430_v26  ;;  %v1236_v35 = vpack.c.bf16 %v561_v33, %v558_v27 }
 0x11a   :  { %1281 = vst [vmem:[%s1713_s2 + $0x48] sm:$0xff] %v1161_v30   ;;  %1297 = vst [vmem:[%s1713_s2 + $0xc8] sm:$0xff] %v1241_v31  }
 0x11b   :  { %1280 = vst [vmem:[%s1713_s2 + $0x40] sm:$0xff] %v1156_v34   ;;  %1296 = vst [vmem:[%s1713_s2 + $0xc0] sm:$0xff] %v1236_v35  }
 0x11d   :  { %v1382_v36 = vpop.f32.mrb[20].mxu0  ;;  %v1414_v37 = vpop.f32.mrb[20].mxu1 }
 0x11e   :  { %v446_v38 = vpop.f32.mrb[21].mxu0  ;;  %v574_v39 = vpop.f32.mrb[21].mxu1 }
 0x11f   :  { %v1383_v40 = vpop.f32.mrb[22].mxu0  ;;  %v1415_v41 = vpop.f32.mrb[22].mxu1 }
 0x120   :  { %v1171_v42 = vpack.c.bf16 %v1383_v40, %v1382_v36  ;;  %v1251_v43 = vpack.c.bf16 %v1415_v41, %v1414_v37  ;;  %v449_v44 = vpop.f32.mrb[23].mxu0  ;;  %v577_v45 = vpop.f32.mrb[23].mxu1 }
 0x121   :  { %v1166_v46 = vpack.c.bf16 %v449_v44, %v446_v38  ;;  %v1246_v47 = vpack.c.bf16 %v577_v45, %v574_v39 }
 0x122   :  { %1283 = vst [vmem:[%s1713_s2 + $0x58] sm:$0xff] %v1171_v42   ;;  %1299 = vst [vmem:[%s1713_s2 + $0xd8] sm:$0xff] %v1251_v43  }
 0x123   :  { %1282 = vst [vmem:[%s1713_s2 + $0x50] sm:$0xff] %v1166_v46   ;;  %1298 = vst [vmem:[%s1713_s2 + $0xd0] sm:$0xff] %v1246_v47  }
 0x125   :  { %v1386_v48 = vpop.f32.mrb[24].mxu0  ;;  %v1418_v49 = vpop.f32.mrb[24].mxu1 }
 0x126   :  { %v462_v50 = vpop.f32.mrb[25].mxu0  ;;  %v590_v51 = vpop.f32.mrb[25].mxu1 }
 0x127   :  { %v1387_v52 = vpop.f32.mrb[26].mxu0  ;;  %v1419_v53 = vpop.f32.mrb[26].mxu1 }
 0x128   :  { %v1181_v54 = vpack.c.bf16 %v1387_v52, %v1386_v48  ;;  %v1261_v55 = vpack.c.bf16 %v1419_v53, %v1418_v49  ;;  %v465_v56 = vpop.f32.mrb[27].mxu0  ;;  %v593_v57 = vpop.f32.mrb[27].mxu1 }
 0x129   :  { %v1176_v58 = vpack.c.bf16 %v465_v56, %v462_v50  ;;  %v1256_v59 = vpack.c.bf16 %v593_v57, %v590_v51 }
 0x12a   :  { %1285 = vst [vmem:[%s1713_s2 + $0x68] sm:$0xff] %v1181_v54   ;;  %1301 = vst [vmem:[%s1713_s2 + $0xe8] sm:$0xff] %v1261_v55  }
 0x12b   :  { %1284 = vst [vmem:[%s1713_s2 + $0x60] sm:$0xff] %v1176_v58   ;;  %1300 = vst [vmem:[%s1713_s2 + $0xe0] sm:$0xff] %v1256_v59  }
 0x12d   :  { %v1390_v60 = vpop.f32.mrb[28].mxu0  ;;  %v1422_v61 = vpop.f32.mrb[28].mxu1 }
 0x12e   :  { %v478_v62 = vpop.f32.mrb[29].mxu0  ;;  %v606_v63 = vpop.f32.mrb[29].mxu1 }
 0x12f   :  { %v1391_v0 = vpop.f32.mrb[30].mxu0  ;;  %v1423_v1 = vpop.f32.mrb[30].mxu1 }
 0x130   :  { %v1191_v2 = vpack.c.bf16 %v1391_v0, %v1390_v60  ;;  %v1271_v3 = vpack.c.bf16 %v1423_v1, %v1422_v61  ;;  %v481_v4 = vpop.f32.mrb[31].mxu0  ;;  %v609_v5 = vpop.f32.mrb[31].mxu1 }
 0x131   :  { %v1186_v6 = vpack.c.bf16 %v481_v4, %v478_v62  ;;  %v1266_v7 = vpack.c.bf16 %v609_v5, %v606_v63 }
 0x132   :  { %1287 = vst [vmem:[%s1713_s2 + $0x78] sm:$0xff] %v1191_v2   ;;  %1303 = vst [vmem:[%s1713_s2 + $0xf8] sm:$0xff] %v1271_v3  }
 0x133   :  { %1286 = vst [vmem:[%s1713_s2 + $0x70] sm:$0xff] %v1186_v6   ;;  %1302 = vst [vmem:[%s1713_s2 + $0xf0] sm:$0xff] %v1266_v7  }

// kernel: squeeze.10
= control target key start
LH: loop header
LB: loop body
LE: loop exit
PB: predicated region body
PF: predicated region fallthrough
CT: control target
= control target key end

     0   :  { %s595_s0 = inlined_call_operand.vmem [shape: bf16[4,5,512], index: 0, kind: input, shape index: {}]   ;;  %s596_s1 = inlined_call_operand.vmem [shape: bf16[20,512], index: 1, kind: output, shape index: {}]  }
   0x1   :  { %v531_v0 = vld [vmem:[%s595_s0 + $0x38] sm:$0xff]   ;;  %v532_v1 = vld [vmem:[%s595_s0 + $0x30] sm:$0xff]   ;;  %v533_v2 = vld [vmem:[%s595_s0 + $0x28] sm:$0xff]  }
   0x2   :  { %v471_v3 = vunpack.c.l.bf16 %v531_v0  ;;  %v472_v4 = vunpack.c.h.bf16 %v531_v0  ;;  %v475_v5 = vunpack.c.l.bf16 %v532_v1  ;;  %v476_v6 = vunpack.c.h.bf16 %v532_v1  ;;  %v534_v7 = vld [vmem:[%s595_s0 + $0x20] sm:$0xff]   ;;  %v535_v8 = vld [vmem:[%s595_s0 + $0x18] sm:$0xff]   ;;  %v536_v9 = vld [vmem:[%s595_s0 + $0x10] sm:$0xff]  }
   0x3   :  { %v479_v10 = vunpack.c.l.bf16 %v533_v2  ;;  %v480_v11 = vunpack.c.h.bf16 %v533_v2  ;;  %v483_v12 = vunpack.c.l.bf16 %v534_v7  ;;  %v484_v13 = vunpack.c.h.bf16 %v534_v7  ;;  %v537_v14 = vld [vmem:[%s595_s0 + $0x8] sm:$0xff]   ;;  %v498_v15 = vld [vmem:[%s595_s0] sm:$0xff]  }
   0x4   :  { %20 = vst [vmem:[#allocation1 + $0x78] sm:$0xff] %v472_v4  ;;  %36 = vst [vmem:[#allocation1 + $0x70] sm:$0xff] %v471_v3  ;;  %v487_v16 = vunpack.c.l.bf16 %v535_v8  ;;  %v488_v17 = vunpack.c.h.bf16 %v535_v8  ;;  %v491_v18 = vunpack.c.l.bf16 %v536_v9  ;;  %v492_v19 = vunpack.c.h.bf16 %v536_v9 }
   0x5   :  { %52 = vst [vmem:[#allocation1 + $0x68] sm:$0xff] %v476_v6  ;;  %68 = vst [vmem:[#allocation1 + $0x60] sm:$0xff] %v475_v5  ;;  %v495_v20 = vunpack.c.l.bf16 %v537_v14  ;;  %v496_v21 = vunpack.c.h.bf16 %v537_v14  ;;  %v499_v22 = vunpack.c.l.bf16 %v498_v15  ;;  %v500_v23 = vunpack.c.h.bf16 %v498_v15 }
   0x6   :  { %84 = vst [vmem:[#allocation1 + $0x58] sm:$0xff] %v480_v11  ;;  %100 = vst [vmem:[#allocation1 + $0x50] sm:$0xff] %v479_v10 }
   0x7   :  { %116 = vst [vmem:[#allocation1 + $0x48] sm:$0xff] %v484_v13  ;;  %132 = vst [vmem:[#allocation1 + $0x40] sm:$0xff] %v483_v12 }
   0x8   :  { %148 = vst [vmem:[#allocation1 + $0x38] sm:$0xff] %v488_v17  ;;  %164 = vst [vmem:[#allocation1 + $0x30] sm:$0xff] %v487_v16 }
   0x9   :  { %180 = vst [vmem:[#allocation1 + $0x28] sm:$0xff] %v492_v19  ;;  %196 = vst [vmem:[#allocation1 + $0x20] sm:$0xff] %v491_v18 }
   0xa   :  { %212 = vst [vmem:[#allocation1 + $0x18] sm:$0xff] %v496_v21  ;;  %228 = vst [vmem:[#allocation1 + $0x10] sm:$0xff] %v495_v20 }
   0xb   :  { %243 = vst [vmem:[#allocation1 + $0x8] sm:$0xff] %v500_v23  ;;  %256 = vst [vmem:[#allocation1] sm:$0xff] %v499_v22  ;;  %v324_v26 = vld [vmem:[#allocation1 + $0x70] sm:$0x1f]   ;;  %v330_v39 = vld [vmem:[#allocation1 + $0x78] sm:$0x1f]  }
   0xc   :  { %v312_v24 = vld [vmem:[#allocation1 + $0x60] sm:$0x1f]   ;;  %v318_v25 = vld [vmem:[#allocation1 + $0x68] sm:$0x1f]   ;;  %328 = vst [vmem:[#allocation0 + $0x4f] sm:$0x1c] %v324_v26  }
   0xd   :  { %v304_v29 = vld [vmem:[#allocation1 + $0x50] sm:$0x1f]   ;;  %314 = vst [vmem:[#allocation0 + $0x27] ss:$25 sm:$0x3] %v312_v24  }
   0xe   :  { %v296_v27 = vld [vmem:[#allocation1 + $0x40] sm:$0x1f]   ;;  %v300_v28 = vld [vmem:[#allocation1 + $0x48] sm:$0x1f]   ;;  %316 = vst [vmem:[#allocation0 + $0x3f] sm:$0x1c] %v312_v24  }
   0xf   :  { %320 = vst [vmem:[#allocation0 + $0x2f] ss:$25 sm:$0x3] %v318_v25   ;;  %322 = vst [vmem:[#allocation0 + $0x47] sm:$0x1c] %v318_v25  }
  0x10   :  { %326 = vst [vmem:[#allocation0 + $0x37] ss:$25 sm:$0x3] %v324_v26   ;;  %v272_v30 = vld [vmem:[#allocation1 + $0x20] sm:$0x1f]  }
  0x11   :  { %v278_v31 = vld [vmem:[#allocation1 + $0x28] sm:$0x1f]   ;;  %v284_v32 = vld [vmem:[#allocation1 + $0x30] sm:$0x1f]   ;;  %298 = vst [vmem:[#allocation0 + $0x22] sm:$0x1f] %v296_v27  }
  0x12   :  { %302 = vst [vmem:[#allocation0 + $0x2a] sm:$0x1f] %v300_v28   ;;  %306 = vst [vmem:[#allocation0 + $0x32] sm:$0x1f] %v304_v29   ;;  %v257_v33 = vld [vmem:[#allocation1] sm:$0x1f]  }
  0x13   :  { %v260_v34 = vld [vmem:[#allocation1 + $0x8] sm:$0x1f]   ;;  %v264_v35 = vld [vmem:[#allocation1 + $0x10] sm:$0x1f]   ;;  %274 = vst [vmem:[#allocation0 + $0x5] sm:$0x7] %v272_v30  }
  0x14   :  { %276 = vst [vmem:[#allocation0 + $0x1d] sm:$0x18] %v272_v30   ;;  %280 = vst [vmem:[#allocation0 + $0xd] sm:$0x7] %v278_v31   ;;  %v268_v36 = vld [vmem:[#allocation1 + $0x18] sm:$0x1f]  }
  0x15   :  { %282 = vst [vmem:[#allocation0 + $0x25] sm:$0x18] %v278_v31   ;;  %286 = vst [vmem:[#allocation0 + $0x15] sm:$0x7] %v284_v32   ;;  %v290_v37 = vld [vmem:[#allocation1 + $0x38] sm:$0x1f]  }
  0x16   :  { %288 = vst [vmem:[#allocation0 + $0x2d] sm:$0x18] %v284_v32   ;;  %258 = vst [vmem:[#allocation0] sm:$0x1f] %v257_v33   ;;  %v308_v38 = vld [vmem:[#allocation1 + $0x58] sm:$0x1f]  }
  0x17   :  { %262 = vst [vmem:[#allocation0 + $0x8] sm:$0x1f] %v260_v34   ;;  %266 = vst [vmem:[#allocation0 + $0x10] sm:$0x1f] %v264_v35   ;;  %v392_v40 = vld [vmem:[#allocation0 + $0x40] sm:$0xff]  ;;  %v399_v41 = vld [vmem:[#allocation0 + $0x48] sm:$0xff] }
  0x18   :  { %270 = vst [vmem:[#allocation0 + $0x18] sm:$0x1f] %v268_v36   ;;  %292 = vst [vmem:[#allocation0 + $0x1d] sm:$0x7] %v290_v37   ;;  %v524_v42 = vpack.c.bf16 %v399_v41, %v392_v40  ;;  %v406_v43 = vld [vmem:[#allocation0 + $0x50] sm:$0xff] }
  0x19   :  { %294 = vst [vmem:[#allocation0 + $0x35] sm:$0x18] %v290_v37   ;;  %310 = vst [vmem:[#allocation0 + $0x3a] sm:$0x1f] %v308_v38  }
  0x1a   :  { %332 = vst [vmem:[#allocation0 + $0x3f] ss:$25 sm:$0x3] %v330_v39   ;;  %334 = vst [vmem:[#allocation0 + $0x57] sm:$0x1c] %v330_v39  }
  0x1b   :  { %v364_v44 = vld [vmem:[#allocation0 + $0x20] sm:$0xff]  ;;  %541 = vst [vmem:[%s596_s1 + $0x20] sm:$0xff] %v524_v42  }
  0x1c   :  { %v371_v45 = vld [vmem:[#allocation0 + $0x28] sm:$0xff] }
  0x1d   :  { %v378_v46 = vld [vmem:[#allocation0 + $0x30] sm:$0xff]  ;;  %v339_v47 = vld [vmem:[#allocation0] sm:$0xff]  ;;  %v514_v50 = vpack.c.bf16 %v371_v45, %v364_v44 }
  0x1e   :  { %v344_v48 = vld [vmem:[#allocation0 + $0x8] sm:$0xff]  ;;  %v350_v49 = vld [vmem:[#allocation0 + $0x10] sm:$0xff] }
  0x1f   :  { %v504_v51 = vpack.c.bf16 %v344_v48, %v339_v47  ;;  %v357_v52 = vld [vmem:[#allocation0 + $0x18] sm:$0xff]  ;;  %539 = vst [vmem:[%s596_s1 + $0x10] sm:$0xff] %v514_v50  }
  0x20   :  { %v509_v53 = vpack.c.bf16 %v357_v52, %v350_v49 }
  0x21   :  { %v385_v54 = vld [vmem:[#allocation0 + $0x38] sm:$0xff]  ;;  %505 = vst [vmem:[%s596_s1] sm:$0xff] %v504_v51  }
  0x22   :  { %v413_v55 = vld [vmem:[#allocation0 + $0x58] sm:$0xff]  ;;  %v519_v56 = vpack.c.bf16 %v385_v54, %v378_v46  ;;  %538 = vst [vmem:[%s596_s1 + $0x8] sm:$0xff] %v509_v53  }
  0x23   :  { %v529_v57 = vpack.c.bf16 %v413_v55, %v406_v43 }
  0x24   :  { %540 = vst [vmem:[%s596_s1 + $0x18] sm:$0xff] %v519_v56  }
  0x25   :  { %542 = vst [vmem:[%s596_s1 + $0x28] sm:$0xff] %v529_v57  }

// kernel: _phi3_hd_forward.3
= control target key start
LH: loop header
LB: loop body
LE: loop exit
PB: predicated region body
PF: predicated region fallthrough
CT: control target
= control target key end

     0   :  { %s4670_s1 = inlined_call_operand.vmem [shape: bf16[512,128], index: 1, kind: input, shape index: {}]   ;;  %s4671_s0 = inlined_call_operand.vmem [shape: bf16[256,512], index: 0, kind: input, shape index: {}]   ;;  %s4672_s3 = inlined_call_operand.vmem [shape: bf16[128,128], index: 3, kind: input, shape index: {}]   ;;  %s4673_s2 = inlined_call_operand.vmem [shape: f32[1,128], index: 2, kind: input, shape index: {}]   ;;  %s4674_s4 = inlined_call_operand.vmem [shape: f32[1,128], index: 4, kind: input, shape index: {}]   ;;  %s4675_s5 = inlined_call_operand.vmem [shape: bf16[256,128], index: 5, kind: output, shape index: {}]  }
   0x1   :  { %v3042_v0 = vld [vmem:[%s4670_s1 + $0x40] sm:$0xff]   ;;  %v3044_v2 = vld [vmem:[%s4670_s1 + $0x48] sm:$0xff]   ;;  %v3046_v4 = vld [vmem:[%s4670_s1 + $0x50] sm:$0xff]  }
   0x2   :  { %v3043_v1 = vld [vmem:[%s4670_s1] sm:$0xff]   ;;  %3026 = vmatprep.subr.bf16.mxu1 %v3042_v0  ;;  %2730 = vmatprep.subr.bf16.mxu0 %v3042_v0  ;;  %v3045_v3 = vld [vmem:[%s4670_s1 + $0x8] sm:$0xff]   ;;  %v3047_v5 = vld [vmem:[%s4670_s1 + $0x10] sm:$0xff]  }
   0x3   :  { %3034 = vmatpush3.bf16.msra.mxu1 %v3043_v1  ;;  %2731 = vmatpush3.bf16.msra.mxu0 %v3043_v1  ;;  %v3048_v6 = vld [vmem:[%s4670_s1 + $0x58] sm:$0xff]   ;;  %v3050_v8 = vld [vmem:[%s4670_s1 + $0x60] sm:$0xff]   ;;  %v3052_v10 = vld [vmem:[%s4670_s1 + $0x68] sm:$0xff]  }
   0x4   :  { %3027 = vmatprep.subr.bf16.mxu1 %v3044_v2  ;;  %2732 = vmatprep.subr.bf16.mxu0 %v3044_v2  ;;  %v3049_v7 = vld [vmem:[%s4670_s1 + $0x18] sm:$0xff]   ;;  %v3051_v9 = vld [vmem:[%s4670_s1 + $0x20] sm:$0xff]   ;;  %v3053_v12 = vld [vmem:[%s4670_s1 + $0x28] sm:$0xff]  }
   0x5   :  { %v3060_v11 = vld [vmem:[%s4671_s0 + $0x184] ss:$16 sps:$4 sm:$0xff]   ;;  %v3056_v15 = vld [vmem:[%s4670_s1 + $0x78] sm:$0xff]   ;;  %v3058_v18 = vld [vmem:[%s4671_s0 + $0x180] ss:$16 sps:$4 sm:$0xff]  }
   0x6   :  { %857 = vmatprep.mubr.bf16.mxu1 %v3060_v11  ;;  %v3054_v13 = vld [vmem:[%s4670_s1 + $0x70] sm:$0xff]   ;;  %v3057_v16 = vld [vmem:[%s4670_s1 + $0x38] sm:$0xff]   ;;  %v3061_v17 = vld [vmem:[%s4670_s1 + $0xc0] sm:$0xff]  }
   0x7   :  { %3035 = vmatpush3.bf16.msra.mxu1 %v3045_v3  ;;  %2733 = vmatpush3.bf16.msra.mxu0 %v3045_v3  ;;  %v3055_v14 = vld [vmem:[%s4670_s1 + $0x30] sm:$0xff]   ;;  %v3062_v19 = vld [vmem:[%s4670_s1 + $0x80] sm:$0xff]   ;;  %v3063_v21 = vld [vmem:[%s4670_s1 + $0xc8] sm:$0xff]  }
   0x8   :  { %3028 = vmatprep.subr.bf16.mxu1 %v3046_v4  ;;  %2734 = vmatprep.subr.bf16.mxu0 %v3046_v4  ;;  %v3065_v20 = vld [vmem:[%s4671_s0 + $0x1a4] ss:$16 sps:$4 sm:$0xff]   ;;  %v3064_v22 = vld [vmem:[%s4670_s1 + $0x88] sm:$0xff]   ;;  %v3067_v23 = vld [vmem:[%s4671_s0 + $0x1a0] ss:$16 sps:$4 sm:$0xff]  }
   0x9   :  { %v3068_v24 = vld [vmem:[%s4670_s1 + $0xd0] sm:$0xff]   ;;  %v3070_v28 = vld [vmem:[%s4670_s1 + $0xd8] sm:$0xff]   ;;  %v3075_v33 = vld [vmem:[%s4670_s1 + $0xe0] sm:$0xff]  }
   0xa   :  { %v3069_v25 = vld [vmem:[%s4670_s1 + $0x90] sm:$0xff]   ;;  %v3071_v31 = vld [vmem:[%s4670_s1 + $0x98] sm:$0xff]   ;;  %v3076_v36 = vld [vmem:[%s4670_s1 + $0xa0] sm:$0xff]  }
   0xb   :  { %3036 = vmatpush3.bf16.msra.mxu1 %v3047_v5  ;;  %2735 = vmatpush3.bf16.msra.mxu0 %v3047_v5  ;;  %v3086_v26 = vld [vmem:[%s4671_s0] ss:$16 sps:$4 sm:$0xff]   ;;  %v3088_v27 = vld [vmem:[%s4671_s0 + $0x4] ss:$16 sps:$4 sm:$0xff]   ;;  %v3077_v38 = vld [vmem:[%s4670_s1 + $0xe8] sm:$0xff]  }
   0xc   :  { %3029 = vmatprep.subr.bf16.mxu1 %v3048_v6  ;;  %2736 = vmatprep.subr.bf16.mxu0 %v3048_v6  ;;  %v3072_v29 = vld [vmem:[%s4671_s0 + $0x1c4] ss:$16 sps:$4 sm:$0xff]   ;;  %v3074_v32 = vld [vmem:[%s4671_s0 + $0x1c0] ss:$16 sps:$4 sm:$0xff]   ;;  %v3078_v39 = vld [vmem:[%s4670_s1 + $0xa8] sm:$0xff]  }
   0xd   :  { %761 = vmatprep.mubr.bf16.mxu0 %v3088_v27  ;;  %v3092_v30 = vld [vmem:[%s4671_s0 + $0x24] ss:$16 sps:$4 sm:$0xff]   ;;  %v3096_v34 = vld [vmem:[%s4671_s0 + $0x20] ss:$16 sps:$4 sm:$0xff]   ;;  %v3091_v45 = vld [vmem:[%s4671_s0 + $0xc] ss:$16 sps:$4 sm:$0xff]  }
   0xe   :  { %v3098_v35 = vld [vmem:[%s4671_s0 + $0x44] ss:$16 sps:$4 sm:$0xff]   ;;  %v3081_v40 = vld [vmem:[%s4671_s0 + $0x1e0] ss:$16 sps:$4 sm:$0xff]   ;;  %v3084_v46 = vld [vmem:[%s4670_s1 + $0xf8] sm:$0xff]  }
   0xf   :  { %3037 = vmatpush3.bf16.msra.mxu1 %v3049_v7  ;;  %2737 = vmatpush3.bf16.msra.mxu0 %v3049_v7  ;;  %v3079_v37 = vld [vmem:[%s4671_s0 + $0x1e4] ss:$16 sps:$4 sm:$0xff]   ;;  %v3102_v42 = vld [vmem:[%s4671_s0 + $0x40] ss:$16 sps:$4 sm:$0xff]   ;;  %v3085_v47 = vld [vmem:[%s4670_s1 + $0xb8] sm:$0xff]  }
  0x10   :  { %3030 = vmatprep.subr.bf16.mxu1 %v3050_v8  ;;  %2738 = vmatprep.subr.bf16.mxu0 %v3050_v8  ;;  %v3082_v41 = vld [vmem:[%s4670_s1 + $0xf0] sm:$0xff]   ;;  %v3089_v48 = vld [vmem:[%s4671_s0 + $0x8] ss:$16 sps:$4 sm:$0xff]   ;;  %v3094_v51 = vld [vmem:[%s4671_s0 + $0x2c] ss:$16 sps:$4 sm:$0xff]  }
  0x11   :  { %v3104_v43 = vld [vmem:[%s4671_s0 + $0x64] ss:$16 sps:$4 sm:$0xff]   ;;  %v3108_v49 = vld [vmem:[%s4671_s0 + $0x60] ss:$16 sps:$4 sm:$0xff]   ;;  %v3097_v53 = vld [vmem:[%s4671_s0 + $0x28] ss:$16 sps:$4 sm:$0xff]  }
  0x12   :  { %v3083_v44 = vld [vmem:[%s4670_s1 + $0xb0] sm:$0xff]   ;;  %v3100_v55 = vld [vmem:[%s4671_s0 + $0x4c] ss:$16 sps:$4 sm:$0xff]   ;;  %v3103_v57 = vld [vmem:[%s4671_s0 + $0x48] ss:$16 sps:$4 sm:$0xff]  }
  0x13   :  { %3038 = vmatpush3.bf16.msra.mxu1 %v3051_v9  ;;  %2739 = vmatpush3.bf16.msra.mxu0 %v3051_v9  ;;  %v3110_v50 = vld [vmem:[%s4671_s0 + $0x84] ss:$16 sps:$4 sm:$0xff]   ;;  %v3114_v52 = vld [vmem:[%s4671_s0 + $0x80] ss:$16 sps:$4 sm:$0xff]   ;;  %v3106_v59 = vld [vmem:[%s4671_s0 + $0x6c] ss:$16 sps:$4 sm:$0xff]  }
  0x14   :  { %3031 = vmatprep.subr.bf16.mxu1 %v3052_v10  ;;  %2740 = vmatprep.subr.bf16.mxu0 %v3052_v10  ;;  %v3116_v54 = vld [vmem:[%s4671_s0 + $0xa4] ss:$16 sps:$4 sm:$0xff]   ;;  %v3120_v56 = vld [vmem:[%s4671_s0 + $0xa0] ss:$16 sps:$4 sm:$0xff]   ;;  %v3109_v61 = vld [vmem:[%s4671_s0 + $0x68] ss:$16 sps:$4 sm:$0xff]  }
  0x15   :  { %v3122_v58 = vld [vmem:[%s4671_s0 + $0xc4] ss:$16 sps:$4 sm:$0xff]   ;;  %v3126_v60 = vld [vmem:[%s4671_s0 + $0xc0] ss:$16 sps:$4 sm:$0xff]   ;;  %v3112_v63 = vld [vmem:[%s4671_s0 + $0x8c] ss:$16 sps:$4 sm:$0xff]  }
  0x16   :  { %v3128_v62 = vld [vmem:[%s4671_s0 + $0xe4] ss:$16 sps:$4 sm:$0xff]   ;;  %v3132_v0 = vld [vmem:[%s4671_s0 + $0xe0] ss:$16 sps:$4 sm:$0xff]   ;;  %v3115_v1 = vld [vmem:[%s4671_s0 + $0x88] ss:$16 sps:$4 sm:$0xff]  }
  0x17   :  { %3039 = vmatpush3.bf16.msra.mxu1 %v3053_v12  ;;  %2741 = vmatpush3.bf16.msra.mxu0 %v3053_v12  ;;  %v3134_v2 = vld [vmem:[%s4671_s0 + $0x104] ss:$16 sps:$4 sm:$0xff]   ;;  %v3118_v3 = vld [vmem:[%s4671_s0 + $0xac] ss:$16 sps:$4 sm:$0xff]   ;;  %v3138_v4 = vld [vmem:[%s4671_s0 + $0x100] ss:$16 sps:$4 sm:$0xff]  }
  0x18   :  { %3032 = vmatprep.subr.bf16.mxu1 %v3054_v13  ;;  %2742 = vmatprep.subr.bf16.mxu0 %v3054_v13  ;;  %v3121_v5 = vld [vmem:[%s4671_s0 + $0xa8] ss:$16 sps:$4 sm:$0xff]   ;;  %v3140_v6 = vld [vmem:[%s4671_s0 + $0x124] ss:$16 sps:$4 sm:$0xff]   ;;  %v3124_v7 = vld [vmem:[%s4671_s0 + $0xcc] ss:$16 sps:$4 sm:$0xff]  }
  0x19   :  { %v3144_v8 = vld [vmem:[%s4671_s0 + $0x120] ss:$16 sps:$4 sm:$0xff]   ;;  %v3127_v9 = vld [vmem:[%s4671_s0 + $0xc8] ss:$16 sps:$4 sm:$0xff]   ;;  %v3146_v10 = vld [vmem:[%s4671_s0 + $0x144] ss:$16 sps:$4 sm:$0xff]  }
  0x1a   :  { %v3130_v11 = vld [vmem:[%s4671_s0 + $0xec] ss:$16 sps:$4 sm:$0xff]   ;;  %v3150_v12 = vld [vmem:[%s4671_s0 + $0x140] ss:$16 sps:$4 sm:$0xff]   ;;  %v3133_v13 = vld [vmem:[%s4671_s0 + $0xe8] ss:$16 sps:$4 sm:$0xff]  }
  0x1b   :  { %3040 = vmatpush3.bf16.msra.mxu1 %v3055_v14  ;;  %2743 = vmatpush3.bf16.msra.mxu0 %v3055_v14  ;;  %v3152_v14 = vld [vmem:[%s4671_s0 + $0x164] ss:$16 sps:$4 sm:$0xff]   ;;  %v3163_v27 = vld [vmem:[%s4671_s0 + $0x1a8] ss:$16 sps:$4 sm:$0xff]  }
  0x1c   :  { %3033 = vmatprep.subr.bf16.mxu1 %v3056_v15  ;;  %2744 = vmatprep.subr.bf16.mxu0 %v3056_v15  ;;  %v3136_v15 = vld [vmem:[%s4671_s0 + $0x10c] ss:$16 sps:$4 sm:$0xff]  }
  0x1f   :  { %3041 = vmatpush3.bf16.msra.mxu1 %v3057_v16  ;;  %2745 = vmatpush3.bf16.msra.mxu0 %v3057_v16  ;;  %v3156_v16 = vld [vmem:[%s4671_s0 + $0x160] ss:$16 sps:$4 sm:$0xff]  }
  0x20   :  { %2842 = vmatprep.subr.bf16.mxu1 %v3061_v17  ;;  %v3139_v17 = vld [vmem:[%s4671_s0 + $0x108] ss:$16 sps:$4 sm:$0xff]  }
  0x22   :  { %858 = vmatmul.mubr.bf16.vlgmr.msra.gmra.mrb[0].mxu1 %v3058_v18  ;;  %762 = vmatmul.mubr.bf16.vlgmr.msra.gmra.mrb[0].mxu0 %v3086_v26  ;;  %v3142_v18 = vld [vmem:[%s4671_s0 + $0x12c] ss:$16 sps:$4 sm:$0xff]  }
  0x23   :  { %2843 = vmatpush3.bf16.msra.mxu1 %v3062_v19  ;;  %865 = vmatprep.mubr.bf16.mxu1 %v3065_v20  ;;  %v3145_v19 = vld [vmem:[%s4671_s0 + $0x128] ss:$16 sps:$4 sm:$0xff]   ;;  %v3148_v20 = vld [vmem:[%s4671_s0 + $0x14c] ss:$16 sps:$4 sm:$0xff]  }
  0x24   :  { %2844 = vmatprep.subr.bf16.mxu1 %v3063_v21  ;;  %769 = vmatprep.mubr.bf16.mxu0 %v3092_v30  ;;  %v3151_v21 = vld [vmem:[%s4671_s0 + $0x148] ss:$16 sps:$4 sm:$0xff]   ;;  %v3161_v26 = vld [vmem:[%s4671_s0 + $0x1ac] ss:$16 sps:$4 sm:$0xff]  }
  0x25   :  { %v3167_v30 = vld [vmem:[%s4671_s0 + $0x1ec] ss:$16 sps:$4 sm:$0xff]  }
  0x27   :  { %2845 = vmatpush3.bf16.msra.mxu1 %v3064_v22  ;;  %v3154_v22 = vld [vmem:[%s4671_s0 + $0x16c] ss:$16 sps:$4 sm:$0xff]  }
  0x28   :  { %2846 = vmatprep.subr.bf16.mxu1 %v3068_v24  ;;  %v3158_v24 = vld [vmem:[%s4671_s0 + $0x18c] ss:$16 sps:$4 sm:$0xff]  }
  0x2a   :  { %866 = vmatmul.mubr.bf16.gmra.mrb[4].mxu1 %v3067_v23  ;;  %770 = vmatmul.mubr.bf16.gmra.mrb[4].mxu0 %v3096_v34  ;;  %v3157_v23 = vld [vmem:[%s4671_s0 + $0x168] ss:$16 sps:$4 sm:$0xff]   ;;  %v3172_v34 = vld [vmem:[%s4672_s3 + $0x10] sm:$0xff]  }
  0x2b   :  { %2847 = vmatpush3.bf16.msra.mxu1 %v3069_v25  ;;  %873 = vmatprep.mubr.bf16.mxu1 %v3072_v29  ;;  %v3160_v25 = vld [vmem:[%s4671_s0 + $0x188] ss:$16 sps:$4 sm:$0xff]  }
  0x2c   :  { %2848 = vmatprep.subr.bf16.mxu1 %v3070_v28  ;;  %777 = vmatprep.mubr.bf16.mxu0 %v3098_v35  ;;  %v3164_v28 = vld [vmem:[%s4671_s0 + $0x1cc] ss:$16 sps:$4 sm:$0xff]   ;;  %v3166_v29 = vld [vmem:[%s4671_s0 + $0x1c8] ss:$16 sps:$4 sm:$0xff]  }
  0x2d   :  { %v3173_v35 = vld [vmem:[%s4672_s3 + $0x18] sm:$0xff]  }
  0x2f   :  { %2849 = vmatpush3.bf16.msra.mxu1 %v3071_v31  ;;  %v3169_v31 = vld [vmem:[%s4671_s0 + $0x1e8] ss:$16 sps:$4 sm:$0xff]  }
  0x30   :  { %2850 = vmatprep.subr.bf16.mxu1 %v3075_v33  ;;  %v3171_v33 = vld [vmem:[%s4672_s3 + $0x8] sm:$0xff]  }
  0x32   :  { %874 = vmatmul.mubr.bf16.gmra.mrb[8].mxu1 %v3074_v32  ;;  %778 = vmatmul.mubr.bf16.gmra.mrb[8].mxu0 %v3102_v42  ;;  %v3170_v32 = vld [vmem:[%s4672_s3] sm:$0xff]  }
  0x33   :  { %2851 = vmatpush3.bf16.msra.mxu1 %v3076_v36  ;;  %881 = vmatprep.mubr.bf16.mxu1 %v3079_v37  ;;  %v3174_v36 = vld [vmem:[%s4672_s3 + $0x20] sm:$0xff]   ;;  %v3175_v37 = vld [vmem:[%s4672_s3 + $0x28] sm:$0xff]  }
  0x34   :  { %2852 = vmatprep.subr.bf16.mxu1 %v3077_v38  ;;  %785 = vmatprep.mubr.bf16.mxu0 %v3104_v43  ;;  %v3176_v38 = vld [vmem:[%s4672_s3 + $0x30] sm:$0xff]  }
  0x35   :  { %2978 = vmatprep.subr.bf16.mxu0 %v3170_v32 }
  0x36   :  { %2979 = vmatpush3.bf16.msra.mxu0 %v3170_v32 }
  0x37   :  { %2853 = vmatpush3.bf16.msra.mxu1 %v3078_v39  ;;  %2980 = vmatprep.subr.bf16.mxu0 %v3171_v33  ;;  %v3177_v39 = vld [vmem:[%s4672_s3 + $0x38] sm:$0xff]  }
  0x38   :  { %2854 = vmatprep.subr.bf16.mxu1 %v3082_v41 }
  0x3a   :  { %882 = vmatmul.mubr.bf16.gmra.mrb[12].mxu1 %v3081_v40  ;;  %786 = vmatmul.mubr.bf16.gmra.mrb[12].mxu0 %v3108_v49 }
  0x3b   :  { %2855 = vmatpush3.bf16.msra.mxu1 %v3083_v44  ;;  %922 = vmatprep.mubr.bf16.mxu1 %v3091_v45 }
  0x3c   :  { %2856 = vmatprep.subr.bf16.mxu1 %v3084_v46  ;;  %793 = vmatprep.mubr.bf16.mxu0 %v3110_v50 }
  0x3d   :  { %2981 = vmatpush3.bf16.msra.mxu0 %v3171_v33 }
  0x3e   :  { %2982 = vmatprep.subr.bf16.mxu0 %v3172_v34 }
  0x3f   :  { %2857 = vmatpush3.bf16.msra.mxu1 %v3085_v47 }
  0x41   :  { %2983 = vmatpush3.bf16.msra.mxu0 %v3172_v34 }
  0x42   :  { %923 = vmatmul.mubr.bf16.vlgmr.msra.gmra.mrb[16].mxu1 %v3089_v48  ;;  %794 = vmatmul.mubr.bf16.gmra.mrb[16].mxu0 %v3114_v52 }
  0x43   :  { %930 = vmatprep.mubr.bf16.mxu1 %v3094_v51  ;;  %801 = vmatprep.mubr.bf16.mxu0 %v3116_v54 }
  0x44   :  { %2984 = vmatprep.subr.bf16.mxu0 %v3173_v35 }
  0x45   :  { %2985 = vmatpush3.bf16.msra.mxu0 %v3173_v35 }
  0x46   :  { %2986 = vmatprep.subr.bf16.mxu0 %v3174_v36 }
  0x49   :  { %2987 = vmatpush3.bf16.msra.mxu0 %v3174_v36 }
  0x4a   :  { %931 = vmatmul.mubr.bf16.gmra.mrb[20].mxu1 %v3097_v53  ;;  %802 = vmatmul.mubr.bf16.gmra.mrb[20].mxu0 %v3120_v56 }
  0x4b   :  { %938 = vmatprep.mubr.bf16.mxu1 %v3100_v55  ;;  %809 = vmatprep.mubr.bf16.mxu0 %v3122_v58 }
  0x4c   :  { %2988 = vmatprep.subr.bf16.mxu0 %v3175_v37 }
  0x4d   :  { %2989 = vmatpush3.bf16.msra.mxu0 %v3175_v37 }
  0x4e   :  { %2990 = vmatprep.subr.bf16.mxu0 %v3176_v38 }
  0x51   :  { %2991 = vmatpush3.bf16.msra.mxu0 %v3176_v38 }
  0x52   :  { %939 = vmatmul.mubr.bf16.gmra.mrb[24].mxu1 %v3103_v57  ;;  %810 = vmatmul.mubr.bf16.gmra.mrb[24].mxu0 %v3126_v60 }
  0x53   :  { %946 = vmatprep.mubr.bf16.mxu1 %v3106_v59  ;;  %817 = vmatprep.mubr.bf16.mxu0 %v3128_v62 }
  0x54   :  { %2992 = vmatprep.subr.bf16.mxu0 %v3177_v39 }
  0x55   :  { %2993 = vmatpush3.bf16.msra.mxu0 %v3177_v39 }
  0x5a   :  { %947 = vmatmul.mubr.bf16.gmra.mrb[28].mxu1 %v3109_v61  ;;  %818 = vmatmul.mubr.bf16.gmra.mrb[28].mxu0 %v3132_v0 }
  0x5b   :  { %954 = vmatprep.mubr.bf16.mxu1 %v3112_v63  ;;  %825 = vmatprep.mubr.bf16.mxu0 %v3134_v2 }
  0x62   :  { %955 = vmatmul.mubr.bf16.gmra.mrb[32].mxu1 %v3115_v1  ;;  %826 = vmatmul.mubr.bf16.gmra.mrb[32].mxu0 %v3138_v4 }
  0x63   :  { %962 = vmatprep.mubr.bf16.mxu1 %v3118_v3  ;;  %833 = vmatprep.mubr.bf16.mxu0 %v3140_v6 }
  0x6a   :  { %963 = vmatmul.mubr.bf16.gmra.mrb[36].mxu1 %v3121_v5  ;;  %834 = vmatmul.mubr.bf16.gmra.mrb[36].mxu0 %v3144_v8 }
  0x6b   :  { %970 = vmatprep.mubr.bf16.mxu1 %v3124_v7  ;;  %841 = vmatprep.mubr.bf16.mxu0 %v3146_v10 }
  0x72   :  { %971 = vmatmul.mubr.bf16.gmra.mrb[40].mxu1 %v3127_v9  ;;  %842 = vmatmul.mubr.bf16.gmra.mrb[40].mxu0 %v3150_v12 }
  0x73   :  { %978 = vmatprep.mubr.bf16.mxu1 %v3130_v11  ;;  %849 = vmatprep.mubr.bf16.mxu0 %v3152_v14 }
  0x7a   :  { %979 = vmatmul.mubr.bf16.gmra.mrb[44].mxu1 %v3133_v13  ;;  %850 = vmatmul.mubr.bf16.gmra.mrb[44].mxu0 %v3156_v16 }
  0x7b   :  { %986 = vmatprep.mubr.bf16.mxu1 %v3136_v15 }
  0x82   :  { %987 = vmatmul.mubr.bf16.gmra.mrb[48].mxu1 %v3139_v17 }
  0x83   :  { %994 = vmatprep.mubr.bf16.mxu1 %v3142_v18 }
  0x8a   :  { %995 = vmatmul.mubr.bf16.gmra.mrb[52].mxu1 %v3145_v19 }
  0x8b   :  { %1002 = vmatprep.mubr.bf16.mxu1 %v3148_v20 }
  0x92   :  { %1003 = vmatmul.mubr.bf16.gmra.mrb[56].mxu1 %v3151_v21 }
  0x93   :  { %1010 = vmatprep.mubr.bf16.mxu1 %v3154_v22 }
  0x9a   :  { %1011 = vmatmul.mubr.bf16.gmra.mrb[60].mxu1 %v3157_v23 }
  0x9b   :  { %1018 = vmatprep.mubr.bf16.mxu1 %v3158_v24 }
  0xa2   :  { %1019 = vmatmul.mubr.bf16.gmra.mrb[64].mxu1 %v3160_v25 }
  0xa3   :  { %1026 = vmatprep.mubr.bf16.mxu1 %v3161_v26 }
  0xaa   :  { %1027 = vmatmul.mubr.bf16.gmra.mrb[68].mxu1 %v3163_v27 }
  0xab   :  { %1034 = vmatprep.mubr.bf16.mxu1 %v3164_v28 }
  0xb2   :  { %1035 = vmatmul.mubr.bf16.gmra.mrb[72].mxu1 %v3166_v29 }
  0xb3   :  { %1042 = vmatprep.mubr.bf16.mxu1 %v3167_v30 }
  0xba   :  { %1043 = vmatmul.mubr.bf16.gmra.mrb[76].mxu1 %v3169_v31 }
  0xf5   :  { %v2818_v40 = vpop.f32.mrb[0].mxu1  ;;  %v2746_v46 = vpop.f32.mrb[0].mxu0 }
  0xf6   :  { %v2819_v41 = vpop.f32.mrb[1].mxu1  ;;  %v2747_v48 = vpop.f32.mrb[1].mxu0 }
  0xf7   :  { %v3649_v42 = vadd.f32 %v2819_v41, %v2818_v40  ;;  %v2821_v43 = vpop.f32.mrb[2].mxu1  ;;  %v2748_v50 = vadd.f32 %v2747_v48, %v2746_v46  ;;  %v2749_v51 = vpop.f32.mrb[2].mxu0  ;;  %v3674_v41 = vld [vmem:[%s4673_s2] ss:$0 sm:$0xff] }
  0xf8   :  { %v2822_v44 = vpop.f32.mrb[3].mxu1  ;;  %v2750_v54 = vpop.f32.mrb[3].mxu0 }
  0xf9   :  { %4719 = vst [vmem:[#allocation3_spill] sm:$0xff] %v3649_v42  ;;  %v3651_v45 = vadd.f32 %v2822_v44, %v2821_v43  ;;  %v2751_v56 = vadd.f32 %v2750_v54, %v2749_v51 }
  0xfb   :  { %4720 = vst [vmem:[#allocation4_spill] sm:$0xff] %v3651_v45 }
  0xfd   :  { %v2824_v47 = vpop.f32.mrb[4].mxu1  ;;  %v2752_v58 = vpop.f32.mrb[4].mxu0 }
  0xfe   :  { %v2825_v49 = vpop.f32.mrb[5].mxu1  ;;  %v2753_v60 = vpop.f32.mrb[5].mxu0 }
  0xff   :  { %v3653_v52 = vadd.f32 %v2825_v49, %v2824_v47  ;;  %v2827_v53 = vpop.f32.mrb[6].mxu1  ;;  %v2754_v62 = vadd.f32 %v2753_v60, %v2752_v58  ;;  %v2755_v63 = vpop.f32.mrb[6].mxu0 }
 0x100   :  { %v2828_v55 = vpop.f32.mrb[7].mxu1  ;;  %v2756_v2 = vpop.f32.mrb[7].mxu0 }
 0x101   :  { %4721 = vst [vmem:[#allocation5_spill] sm:$0xff] %v3653_v52  ;;  %v3655_v57 = vadd.f32 %v2828_v55, %v2827_v53  ;;  %v2757_v4 = vadd.f32 %v2756_v2, %v2755_v63 }
 0x103   :  { %4722 = vst [vmem:[#allocation6_spill] sm:$0xff] %v3655_v57 }
 0x105   :  { %v2830_v59 = vpop.f32.mrb[8].mxu1  ;;  %v2758_v6 = vpop.f32.mrb[8].mxu0 }
 0x106   :  { %v2831_v61 = vpop.f32.mrb[9].mxu1  ;;  %v2759_v8 = vpop.f32.mrb[9].mxu0 }
 0x107   :  { %v3657_v0 = vadd.f32 %v2831_v61, %v2830_v59  ;;  %v2833_v1 = vpop.f32.mrb[10].mxu1  ;;  %v2760_v10 = vadd.f32 %v2759_v8, %v2758_v6  ;;  %v2761_v11 = vpop.f32.mrb[10].mxu0 }
 0x108   :  { %v2834_v3 = vpop.f32.mrb[11].mxu1  ;;  %v2762_v14 = vpop.f32.mrb[11].mxu0 }
 0x109   :  { %4723 = vst [vmem:[#allocation7_spill] sm:$0xff] %v3657_v0  ;;  %v3659_v5 = vadd.f32 %v2834_v3, %v2833_v1  ;;  %v2763_v16 = vadd.f32 %v2762_v14, %v2761_v11 }
 0x10b   :  { %4724 = vst [vmem:[#allocation8_spill] sm:$0xff] %v3659_v5 }
 0x10d   :  { %v2836_v7 = vpop.f32.mrb[12].mxu1  ;;  %v2764_v18 = vpop.f32.mrb[12].mxu0 }
 0x10e   :  { %v2837_v9 = vpop.f32.mrb[13].mxu1  ;;  %v2765_v20 = vpop.f32.mrb[13].mxu0 }
 0x10f   :  { %v3661_v12 = vadd.f32 %v2837_v9, %v2836_v7  ;;  %v2839_v13 = vpop.f32.mrb[14].mxu1  ;;  %v3665_v22 = vadd.f32 %v2765_v20, %v2764_v18  ;;  %v2767_v23 = vpop.f32.mrb[14].mxu0 }
 0x110   :  { %v2840_v15 = vpop.f32.mrb[15].mxu1  ;;  %v2768_v26 = vpop.f32.mrb[15].mxu0 }
 0x111   :  { %4725 = vst [vmem:[#allocation9_spill] sm:$0xff] %v3661_v12  ;;  %v3663_v17 = vadd.f32 %v2840_v15, %v2839_v13  ;;  %v3667_v28 = vadd.f32 %v2768_v26, %v2767_v23 }
 0x113   :  { %4726 = vst [vmem:[#allocation10_spill] sm:$0xff] %v3663_v17 }
 0x115   :  { %v2858_v19 = vpop.f32.mrb[16].mxu1  ;;  %v2770_v32 = vpop.f32.mrb[16].mxu0 }
 0x116   :  { %v2859_v21 = vpop.f32.mrb[17].mxu1  ;;  %v2771_v34 = vpop.f32.mrb[17].mxu0 }
 0x117   :  { %v2860_v24 = vadd.f32 %v2859_v21, %v2858_v19  ;;  %v2861_v25 = vpop.f32.mrb[18].mxu1  ;;  %v3669_v36 = vadd.f32 %v2771_v34, %v2770_v32  ;;  %v2773_v37 = vpop.f32.mrb[18].mxu0 }
 0x118   :  { %v2862_v27 = vpop.f32.mrb[19].mxu1  ;;  %v2774_v40 = vpop.f32.mrb[19].mxu0 }
 0x119   :  { %v925_v29 = vadd.f32 %v2860_v24, %v2748_v50  ;;  %v2863_v30 = vadd.f32 %v2862_v27, %v2861_v25  ;;  %v3676_v46 = vadd.f32 %v2774_v40, %v2773_v37 }
 0x11b   :  { %v928_v31 = vadd.f32 %v2863_v30, %v2751_v56  ;;  %v1157_v50 = vadd.f32 %v3674_v41, %v925_v29 }
 0x11d   :  { %v2864_v33 = vpop.f32.mrb[20].mxu1  ;;  %v2776_v49 = vpop.f32.mrb[20].mxu0  ;;  %v3683_v54 = vadd.f32 %v3674_v41, %v928_v31  ;;  %v3694_v6 = vmul.f32 0.70710677, %v1157_v50 }
 0x11e   :  { %v2865_v35 = vpop.f32.mrb[21].mxu1  ;;  %v2777_v53 = vpop.f32.mrb[21].mxu0 }
 0x11f   :  { %v2866_v38 = vadd.f32 %v2865_v35, %v2864_v33  ;;  %v2867_v39 = vpop.f32.mrb[22].mxu1  ;;  %v3688_v59 = vadd.f32 %v2777_v53, %v2776_v49  ;;  %v2779_v60 = vpop.f32.mrb[22].mxu0  ;;  %v1253_v20 = vand.u32 2147483647, %v3694_v6  ;;  %vm1829_vm2 = vcmp.ge.f32.partialorder %v3694_v6, 0.0 }
 0x120   :  { %v2868_v44 = vpop.f32.mrb[23].mxu1  ;;  %v2780_v63 = vpop.f32.mrb[23].mxu0 }
 0x121   :  { %v933_v43 = vadd.f32 %v2866_v38, %v2754_v62  ;;  %v2869_v48 = vadd.f32 %v2868_v44, %v2867_v39  ;;  %v3696_v9 = vadd.f32 %v2780_v63, %v2779_v60  ;;  %v1669_v31 = vsub.f32 0.0, %v1253_v20 }
 0x122   :  { %v1285_v38 = vmul.f32 0.3275911, %v1253_v20 }
 0x123   :  { %v3679_v47 = vadd.f32 %v3674_v41, %v933_v43  ;;  %v936_v56 = vadd.f32 %v2869_v48, %v2757_v4  ;;  %v3699_v4 = vmul.f32 0.70710677, %v3683_v54 }
 0x125   :  { %v2870_v51 = vpop.f32.mrb[24].mxu1  ;;  %v3686_v55 = vmul.f32 0.70710677, %v3679_v47  ;;  %v3692_v2 = vadd.f32 %v3674_v41, %v936_v56  ;;  %v2782_v19 = vpop.f32.mrb[24].mxu0  ;;  %vm1830_vm3 = vcmp.ge.f32.partialorder %v3699_v4, 0.0 }
 0x126   :  { %v2871_v58 = vpop.f32.mrb[25].mxu1  ;;  %v2783_v23 = vpop.f32.mrb[25].mxu0 }
 0x127   :  { %v2872_v61 = vadd.f32 %v2871_v58, %v2870_v51  ;;  %v2873_v62 = vpop.f32.mrb[26].mxu1  ;;  %v1255_v1 = vand.u32 2147483647, %v3686_v55  ;;  %v3702_v13 = vmul.f32 0.70710677, %v3692_v2  ;;  %v3711_v35 = vadd.f32 %v2783_v23, %v2782_v19 }
 0x128   :  { %v2874_v3 = vpop.f32.mrb[27].mxu1  ;;  %v1701_v51 = vmul.f32 %v1669_v31, %v1253_v20  ;;  %v1317_v20 = vadd.f32 1.0, %v1285_v38  ;;  %v3749_v38 = vmul.f32 0.5, %v3679_v47  ;;  %vm1831_vm0 = vcmp.ge.f32.partialorder %v3686_v55, 0.0 }
 0x129   :  { %v941_v7 = vadd.f32 %v2872_v61, %v2760_v10  ;;  %v2875_v8 = vadd.f32 %v2874_v3, %v2873_v62  ;;  %v1287_v11 = vmul.f32 0.3275911, %v1255_v1  ;;  %v1256_v18 = vand.u32 2147483647, %v3702_v13 }
 0x12a   :  { %v1254_v10 = vand.u32 2147483647, %v3699_v4  ;;  %v1671_v40 = vsub.f32 0.0, %v1255_v1  ;;  %v3726_v3 = vmul.f32 0.5, %v1157_v50  ;;  %v1733_v50 = vmul.f32 1.442695, %v1701_v51 }
 0x12b   :  { %v944_v14 = vadd.f32 %v2875_v8, %v2763_v16  ;;  %v1319_v15 = vadd.f32 1.0, %v1287_v11  ;;  %v1288_v24 = vmul.f32 0.3275911, %v1256_v18  ;;  %v3708_v26 = vadd.f32 %v3674_v41, %v941_v7  ;;  %v2785_v16 = vpop.f32.mrb[26].mxu0 }
 0x12c   :  { %v1670_v32 = vsub.f32 0.0, %v1254_v10  ;;  %v2786_v37 = vpop.f32.mrb[27].mxu0  ;;  %v1672_v7 = vsub.f32 0.0, %v1256_v18  ;;  %vm1832_vm1 = vcmp.ge.f32.partialorder %v3702_v13, 0.0 }
 0x12d   :  { %v2876_v21 = vpop.f32.mrb[28].mxu1  ;;  %3178 = vrcp.f32 %v1319_v15  ;;  %v1320_v27 = vadd.f32 1.0, %v1288_v24  ;;  %v3714_v39 = vmul.f32 0.70710677, %v3708_v26  ;;  %v3717_v43 = vadd.f32 %v3674_v41, %v944_v14  ;;  %v2788_v49 = vpop.f32.mrb[28].mxu0 }
 0x12e   :  { %v2877_v25 = vpop.f32.mrb[29].mxu1  ;;  %v3719_v48 = vadd.f32 %v2786_v37, %v2785_v16  ;;  %v2789_v56 = vpop.f32.mrb[29].mxu0  ;;  %v1702_v58 = vmul.f32 %v1670_v32, %v1254_v10  ;;  %v1704_v32 = vmul.f32 %v1672_v7, %v1256_v18  ;;  %v3765_v7 = vmul.f32 0.5, %v3708_v26 }
 0x12f   :  { %v2878_v29 = vadd.f32 %v2877_v25, %v2876_v21  ;;  %v2879_v30 = vpop.f32.mrb[30].mxu1  ;;  %3180 = vrcp.f32 %v1320_v27  ;;  %v3722_v62 = vadd.f32 %v2789_v56, %v2788_v49  ;;  %v3724_v63 = vpop.f32.mrb[30].mxu0  ;;  %v1257_v8 = vand.u32 2147483647, %v3714_v39 }
 0x130   :  { %v2880_v34 = vpop.f32.mrb[31].mxu1  ;;  %v3729_v15 = vpop.f32.mrb[31].mxu0  ;;  %v3734_v21 = vmul.f32 0.5, %v3683_v54  ;;  %v3737_v23 = vmul.f32 0.70710677, %v3717_v43  ;;  %3182 = vrcp.f32 %v1317_v20  ;;  %4729 = vst [vmem:[#allocation13_spill] sm:$0xff] %v3765_v7 }
 0x131   :  { %v949_v33 = vadd.f32 %v2878_v29, %v3665_v22  ;;  %v2881_v44 = vadd.f32 %v2880_v34, %v2879_v30  ;;  %v1286_v22 = vmul.f32 0.3275911, %v1254_v10  ;;  %v1735_v30 = vmul.f32 1.442695, %v1702_v58 }
 0x132   :  { %3184 = vpow2.f32 %v1733_v50  ;;  %v1289_v18 = vmul.f32 0.3275911, %v1257_v8  ;;  %v3775_v50 = vmul.f32 0.5, %v3717_v43  ;;  %vm1833_vm4 = vcmp.ge.f32.partialorder %v3714_v39, 0.0 }
 0x133   :  { %v952_v60 = vadd.f32 %v2881_v44, %v3667_v28  ;;  %v1703_v28 = vmul.f32 %v1671_v40, %v1255_v1  ;;  %v1318_v29 = vadd.f32 1.0, %v1286_v22  ;;  %v1163_v16 = vadd.f32 %v3674_v41, %v949_v33 }
 0x134   :  { %v1673_v1 = vsub.f32 0.0, %v1257_v8  ;;  %v1258_v40 = vand.u32 2147483647, %v3737_v23  ;;  %4730 = vst [vmem:[#allocation14_spill] sm:$0xff] %v3775_v50  ;;  %v1321_v26 = vadd.f32 1.0, %v1289_v18  ;;  %vm1834_vm5 = vcmp.ge.f32.partialorder %v3737_v23, 0.0 }
 0x135   :  { %v2882_v53 = vpop.f32.mrb[32].mxu1  ;;  %v3743_v31 = vadd.f32 %v3674_v41, %v952_v60  ;;  %v3752_v44 = vpop.f32.mrb[32].mxu0  ;;  %3186 = vrcp.f32 %v1318_v29  ;;  %v1739_v60 = vmul.f32 1.442695, %v1704_v32  ;;  %v3793_v12 = vmul.f32 0.5, %v1163_v16 }
 0x136   :  { %v2883_v61 = vpop.f32.mrb[33].mxu1  ;;  %v3770_v20 = vpop.f32.mrb[33].mxu0 }
 0x137   :  { %v2884_v11 = vadd.f32 %v2883_v61, %v2882_v53  ;;  %v2885_v14 = vpop.f32.mrb[34].mxu1  ;;  %v3731_v19 = vpop.eup %3178  ;;  %v3759_v53 = vmul.f32 0.70710677, %v1163_v16  ;;  %v3762_v47 = vmul.f32 0.70710677, %v3743_v31  ;;  %v1705_v61 = vmul.f32 %v1673_v1, %v1257_v8  ;;  %4732 = vst [vmem:[#allocation16_spill] sm:$0xff] %v3793_v12 }
 0x138   :  { %v2886_v10 = vpop.f32.mrb[35].mxu1  ;;  %v1383_v24 = vmul.f32 1.0614054, %v3731_v19 }
 0x139   :  { %v957_v25 = vadd.f32 %v2884_v11, %v3669_v36  ;;  %v2887_v27 = vadd.f32 %v2886_v10, %v2885_v14  ;;  %v3746_v37 = vpop.eup %3180  ;;  %v1737_v36 = vmul.f32 1.442695, %v1703_v28  ;;  %4727 = vst [vmem:[#allocation11_spill] sm:$0xff] %v3759_v53  ;;  %4728 = vst [vmem:[#allocation12_spill] sm:$0xff] %v3762_v47  ;;  %v1290_v11 = vmul.f32 0.3275911, %v1258_v40 }
 0x13a   :  { %v1415_v54 = vadd.f32 -1.4531521, %v1383_v24  ;;  %v1384_v49 = vmul.f32 1.0614054, %v3746_v37  ;;  %v1674_v24 = vsub.f32 0.0, %v1258_v40 }
 0x13b   :  { %v960_v34 = vadd.f32 %v2887_v27, %v3676_v46  ;;  %v3757_v46 = vmul.f32 0.5, %v3692_v2  ;;  %3188 = vpow2.f32 %v1737_v36  ;;  %v3768_v14 = vadd.f32 %v3674_v41, %v957_v25  ;;  %v3777_v27 = vpop.f32.mrb[34].mxu0 }
 0x13c   :  { %v1447_v33 = vmul.f32 %v3731_v19, %v1415_v54  ;;  %v1416_v58 = vadd.f32 -1.4531521, %v1384_v49  ;;  %3190 = vpow2.f32 %v1735_v30  ;;  %v1259_v29 = vand.u32 2147483647, %v3759_v53  ;;  %v3781_v54 = vpop.f32.mrb[35].mxu0 }
 0x13d   :  { %v2888_v51 = vpop.f32.mrb[36].mxu1  ;;  %v1260_v25 = vand.u32 2147483647, %v3762_v47  ;;  %3192 = vpow2.f32 %v1739_v60  ;;  %v1741_v36 = vmul.f32 1.442695, %v1705_v61  ;;  %v3787_v49 = vadd.f32 %v3674_v41, %v960_v34  ;;  %v3789_v30 = vpop.f32.mrb[36].mxu0 }
 0x13e   :  { %v2889_v56 = vpop.f32.mrb[37].mxu1  ;;  %v1479_v22 = vadd.f32 1.4214138, %v1447_v33  ;;  %v1448_v10 = vmul.f32 %v3746_v37, %v1416_v58  ;;  %v1322_v33 = vadd.f32 1.0, %v1290_v11  ;;  %v3784_v43 = vmul.f32 0.70710677, %v3768_v14  ;;  %v3797_v61 = vpop.eup %3182 }
 0x13f   :  { %v2891_v2 = vpop.f32.mrb[38].mxu1  ;;  %v1706_v17 = vmul.f32 %v1674_v24, %v1258_v40  ;;  %v3795_v60 = vpop.f32.mrb[37].mxu0  ;;  %v1675_v11 = vsub.f32 0.0, %v1259_v29  ;;  %v1676_v34 = vsub.f32 0.0, %v1260_v25  ;;  %3194 = vrcp.f32 %v1321_v26 }
 0x140   :  { %v1511_v28 = vmul.f32 %v3731_v19, %v1479_v22  ;;  %v2892_v8 = vpop.f32.mrb[39].mxu1  ;;  %v1480_v1 = vadd.f32 1.4214138, %v1448_v10  ;;  %4731 = vst [vmem:[#allocation15_spill] sm:$0xff] %v3784_v43  ;;  %v2890_v22 = vadd.f32 %v2889_v56, %v2888_v51  ;;  %v3801_v5 = vpop.f32.mrb[38].mxu0  ;;  %3196 = vpow2.f32 %v1741_v36  ;;  %v4772_v23 = vld [vmem:[#allocation12_spill] sm:$0xff] }
 0x141   :  { %v2893_v56 = vadd.f32 %v2892_v8, %v2891_v2  ;;  %v3805_v0 = vpop.f32.mrb[39].mxu0  ;;  %v1261_v52 = vand.u32 2147483647, %v3784_v43  ;;  %v3811_v45 = vmul.f32 0.70710677, %v3787_v49  ;;  %v1707_v42 = vmul.f32 %v1675_v11, %v1259_v29 }
 0x142   :  { %v1543_v32 = vadd.f32 -0.28449672, %v1511_v28  ;;  %v1512_v58 = vmul.f32 %v3746_v37, %v1480_v1  ;;  %v965_v51 = vadd.f32 %v2890_v22, %v3688_v59  ;;  %v1291_v43 = vmul.f32 0.3275911, %v1259_v29 }
 0x143   :  { %4733 = vst [vmem:[#allocation17_spill] sm:$0xff] %v3811_v45  ;;  %v968_v2 = vadd.f32 %v2893_v56, %v3696_v9  ;;  %v1292_v50 = vmul.f32 0.3275911, %v1260_v25  ;;  %v3822_v9 = vmul.f32 1.0614054, %v3797_v61  ;;  %3198 = vrcp.f32 %v1322_v33 }
 0x144   :  { %v1575_v18 = vmul.f32 %v3731_v19, %v1543_v32  ;;  %v3803_v32 = vpop.eup %3184  ;;  %v1544_v16 = vadd.f32 -0.28449672, %v1512_v58  ;;  %v3814_v59 = vadd.f32 %v3674_v41, %v965_v51  ;;  %v1293_v7 = vmul.f32 0.3275911, %v1261_v52 }
 0x145   :  { %v2894_v28 = vpop.f32.mrb[40].mxu1  ;;  %v3807_v57 = vpop.eup %3186  ;;  %v3845_v33 = vadd.f32 %v3674_v41, %v968_v2  ;;  %v2805_v4 = vadd.f32 %v3805_v0, %v3801_v5  ;;  %vm1836_vm7 = vcmp.ge.f32.partialorder %v4772_v23, 0.0 }
 0x146   :  { %v2895_v10 = vpop.f32.mrb[41].mxu1  ;;  %v1607_v40 = vadd.f32 0.2548296, %v1575_v18  ;;  %v1576_v26 = vmul.f32 %v3746_v37, %v1544_v16 }
 0x147   :  { %v2896_v24 = vadd.f32 %v2895_v10, %v2894_v28  ;;  %v2897_v1 = vpop.f32.mrb[42].mxu1  ;;  %v3189_v28 = vpop.eup %3188  ;;  %v1743_v10 = vmul.f32 1.442695, %v1706_v17 }
 0x148   :  { %v2898_v8 = vpop.f32.mrb[43].mxu1  ;;  %v1639_v22 = vmul.f32 %v3731_v19, %v1607_v40  ;;  %v1608_v51 = vadd.f32 0.2548296, %v1576_v26  ;;  %v3824_v56 = vpop.eup %3190  ;;  %v1708_v19 = vmul.f32 %v1676_v34, %v1260_v25  ;;  %v1677_v40 = vsub.f32 0.0, %v1261_v52 }
 0x149   :  { %v973_v18 = vadd.f32 %v2896_v24, %v3711_v35  ;;  %v2899_v58 = vadd.f32 %v2898_v8, %v2897_v1  ;;  %v3827_v35 = vmul.f32 0.70710677, %v3814_v59  ;;  %v3830_v24 = vpop.f32.mrb[40].mxu0  ;;  %v3193_v17 = vpop.eup %3192  ;;  %v1262_v1 = vand.u32 2147483647, %v3811_v45 }
 0x14a   :  { %v1799_v12 = vmul.f32 %v3189_v28, %v1639_v22  ;;  %v1640_v11 = vmul.f32 %v3746_v37, %v1608_v51  ;;  %v3834_v22 = vpop.f32.mrb[41].mxu0  ;;  %v1323_v25 = vadd.f32 1.0, %v1291_v43  ;;  %v1745_v34 = vmul.f32 1.442695, %v1707_v42 }
 0x14b   :  { %4734 = vst [vmem:[#allocation18_spill] sm:$0xff] %v3827_v35  ;;  %v976_v16 = vadd.f32 %v2899_v58, %v3719_v48  ;;  %v3837_v26 = vmul.f32 0.5, %v3743_v31  ;;  %v1324_v28 = vadd.f32 1.0, %v1292_v50  ;;  %v3841_v47 = vpop.f32.mrb[42].mxu0  ;;  %3200 = vpow2.f32 %v1743_v10  ;;  %v3849_v31 = vpop.eup %3194 }
 0x14c   :  { %v1863_v36 = vsub.f32 1.0, %v1799_v12  ;;  %v2532_v29 = vadd.f32 -1.0, %v1799_v12  ;;  %v1800_v58 = vmul.f32 %v3193_v17, %v1640_v11  ;;  %v1747_v37 = vmul.f32 1.442695, %v1708_v19  ;;  %v3847_v43 = vpop.f32.mrb[43].mxu0 }
 0x14d   :  { %v2900_v8 = vpop.f32.mrb[44].mxu1  ;;  %4735 = vst [vmem:[#allocation19_spill] sm:$0xff] %v3837_v26  ;;  %v1263_v51 = vand.u32 2147483647, %v3827_v35  ;;  %v1709_v17 = vmul.f32 %v1677_v40, %v1261_v52  ;;  %v1678_v50 = vsub.f32 0.0, %v1262_v1  ;;  %3202 = vrcp.f32 %v1323_v25  ;;  %v3860_v26 = vpop.eup %3196 }
 0x14e   :  { %v1927_v48 = vsel %vm1831_vm0, %v1863_v36, %v2532_v29  ;;  %v2901_v12 = vpop.f32.mrb[45].mxu1  ;;  %v1864_v55 = vsub.f32 1.0, %v1800_v58  ;;  %v2533_v36 = vadd.f32 -1.0, %v1800_v58  ;;  %v3852_v10 = vadd.f32 %v3674_v41, %v973_v18  ;;  %v3865_v18 = vpop.f32.mrb[44].mxu0 }
 0x14f   :  { %v2903_v42 = vpop.f32.mrb[46].mxu1  ;;  %v1959_v11 = vadd.f32 1.0, %v1927_v48  ;;  %v1382_v19 = vmul.f32 1.0614054, %v3807_v57  ;;  %3204 = vpow2.f32 %v1745_v34  ;;  %v3858_v35 = vmul.f32 0.5, %v3768_v14  ;;  %4738 = vst [vmem:[#allocation22_spill] sm:$0xff] %v3865_v18 }
 0x150   :  { %v2904_v29 = vpop.f32.mrb[47].mxu1  ;;  %v1928_v2 = vsel %vm1832_vm1, %v1864_v55, %v2533_v36  ;;  %v1325_v45 = vadd.f32 1.0, %v1293_v7  ;;  %3206 = vrcp.f32 %v1324_v28  ;;  %v1679_v40 = vsub.f32 0.0, %v1263_v51  ;;  %v3867_v34 = vpop.f32.mrb[45].mxu0 }
 0x151   :  { %4736 = vst [vmem:[#allocation20_spill] sm:$0xff] %v3858_v35  ;;  %v1960_v52 = vadd.f32 1.0, %v1928_v2  ;;  %v3863_v25 = vmul.f32 0.70710677, %v3845_v33  ;;  %3208 = vpow2.f32 %v1747_v37  ;;  %v1749_v48 = vmul.f32 1.442695, %v1709_v17  ;;  %v3887_v17 = vpop.eup %3198 }
 0x152   :  { %v1294_v58 = vmul.f32 0.3275911, %v1262_v1  ;;  %v1710_v13 = vmul.f32 %v1678_v50, %v1262_v1  ;;  %4739 = vst [vmem:[#allocation23_spill] sm:$0xff] %v3867_v34  ;;  %v3870_v14 = vmul.f32 %v1959_v11, %v3749_v38  ;;  %v3876_v28 = vmul.f32 0.70710677, %v3852_v10  ;;  %v3878_v35 = vpop.f32.mrb[46].mxu0 }
 0x153   :  { %4737 = vst [vmem:[#allocation21_spill] sm:$0xff] %v3863_v25  ;;  %v3873_v7 = vmul.f32 %v1960_v52, %v3757_v46  ;;  %v2902_v36 = vadd.f32 %v2901_v12, %v2900_v8  ;;  %4741 = vst [vmem:[#allocation25_spill] sm:$0xff] %v3878_v35  ;;  %3210 = vrcp.f32 %v1325_v45  ;;  %v3881_v37 = vmul.f32 0.5, %v3787_v49  ;;  %v3893_v45 = vpop.f32.mrb[47].mxu0 }
 0x154   :  { %4740 = vst [vmem:[#allocation24_spill] sm:$0xff] %v3876_v28  ;;  %v3884_v1 = vadd.f32 %v3674_v41, %v976_v16  ;;  %v1413_v38 = vadd.f32 -1.4531521, %v3822_v9  ;;  %v1711_v50 = vmul.f32 %v1679_v40, %v1263_v51  ;;  %v1264_v8 = vand.u32 2147483647, %v3863_v25  ;;  %4743 = vst [vmem:[#allocation27_spill] sm:$0xff] %v3893_v45 }
 0x155   :  { %v2906_v55 = vpop.f32.mrb[48].mxu1  ;;  %4742 = vst [vmem:[#allocation26_spill] sm:$0xff] %v3881_v37  ;;  %v981_v12 = vadd.f32 %v2902_v36, %v3722_v62  ;;  %v1326_v49 = vadd.f32 1.0, %v1294_v58  ;;  %v1414_v52 = vadd.f32 -1.4531521, %v1382_v19  ;;  %v2793_v9 = vadd.f32 %v3729_v15, %v3724_v63  ;;  %v3898_v35 = vpop.eup %3200 }
 0x156   :  { %v2907_v2 = vpop.f32.mrb[49].mxu1  ;;  %v1445_v16 = vmul.f32 %v3797_v61, %v1413_v38  ;;  %4744 = vst [vmem:[#allocation28_spill] sm:$0xff] %v3898_v35  ;;  %3212 = vpow2.f32 %v1749_v48  ;;  %v1751_v46 = vmul.f32 1.442695, %v1710_v13  ;;  %v1295_v40 = vmul.f32 0.3275911, %v1263_v51 }
 0x157   :  { %v2909_v11 = vpop.f32.mrb[50].mxu1  ;;  %v1265_v25 = vand.u32 2147483647, %v3876_v28  ;;  %v1446_v62 = vmul.f32 %v3807_v57, %v1414_v52  ;;  %v2905_v53 = vadd.f32 %v2904_v29, %v2903_v42  ;;  %v2796_v19 = vadd.f32 %v3770_v20, %v3752_v44  ;;  %v3904_v58 = vpop.eup %3202 }
 0x158   :  { %v2910_v37 = vpop.f32.mrb[51].mxu1  ;;  %v1477_v36 = vadd.f32 1.4214138, %v1445_v16  ;;  %v1753_v38 = vmul.f32 1.442695, %v1711_v50  ;;  %v1680_v45 = vsub.f32 0.0, %v1264_v8  ;;  %v3910_v15 = vadd.f32 %v3674_v41, %v981_v12 }
 0x159   :  { %v3907_v63 = vmul.f32 0.70710677, %v3884_v1  ;;  %v3912_v51 = vpop.eup %3204  ;;  %v1478_v48 = vadd.f32 1.4214138, %v1446_v62  ;;  %v984_v52 = vadd.f32 %v2905_v53, %v2793_v9  ;;  %v2908_v42 = vadd.f32 %v2907_v2, %v2906_v55 }
 0x15a   :  { %4746 = vst [vmem:[#allocation30_spill] sm:$0xff] %v3912_v51  ;;  %v1509_v13 = vmul.f32 %v3797_v61, %v1477_v36  ;;  %v3917_v44 = vpop.eup %3206  ;;  %3214 = vrcp.f32 %v1326_v49  ;;  %v1327_v20 = vadd.f32 1.0, %v1295_v40  ;;  %v1296_v50 = vmul.f32 0.3275911, %v1264_v8 }
 0x15b   :  { %4745 = vst [vmem:[#allocation29_spill] sm:$0xff] %v3907_v63  ;;  %v1297_v16 = vmul.f32 0.3275911, %v1265_v25  ;;  %v3921_v34 = vpop.eup %3208  ;;  %v1681_v12 = vsub.f32 0.0, %v1265_v25  ;;  %v1510_v51 = vmul.f32 %v3807_v57, %v1478_v48  ;;  %v989_v18 = vadd.f32 %v2908_v42, %v2796_v19 }
 0x15c   :  { %4747 = vst [vmem:[#allocation31_spill] sm:$0xff] %v3921_v34  ;;  %v1541_v62 = vadd.f32 -0.28449672, %v1509_v13  ;;  %v3927_v53 = vmul.f32 0.5, %v3814_v59  ;;  %v1266_v55 = vand.u32 2147483647, %v3907_v63  ;;  %v2799_v49 = vadd.f32 %v3781_v54, %v3777_v27 }
 0x15d   :  { %v3915_v29 = vpop.f32.mrb[52].mxu1  ;;  %v3931_v2 = vmul.f32 0.70710677, %v3910_v15  ;;  %v3937_v40 = vpop.eup %3210  ;;  %3216 = vpow2.f32 %v1751_v46  ;;  %v1712_v48 = vmul.f32 %v1680_v45, %v1264_v8  ;;  %v1542_v19 = vadd.f32 -0.28449672, %v1510_v51 }
 0x15e   :  { %v3919_v28 = vpop.f32.mrb[53].mxu1  ;;  %4748 = vst [vmem:[#allocation32_spill] sm:$0xff] %v3927_v53  ;;  %v1573_v13 = vmul.f32 %v3797_v61, %v1541_v62  ;;  %3218 = vrcp.f32 %v1327_v20  ;;  %v1328_v59 = vadd.f32 1.0, %v1296_v50  ;;  %v3942_v42 = vadd.f32 %v3674_v41, %v984_v52 }
 0x15f   :  { %v3924_v36 = vpop.f32.mrb[54].mxu1  ;;  %4749 = vst [vmem:[#allocation33_spill] sm:$0xff] %v3931_v2  ;;  %v2911_v63 = vadd.f32 %v2910_v37, %v2909_v11  ;;  %v1329_v53 = vadd.f32 1.0, %v1297_v16  ;;  %v1713_v34 = vmul.f32 %v1681_v12, %v1265_v25  ;;  %v1574_v27 = vmul.f32 %v3807_v57, %v1542_v19 }
 0x160   :  { %v3935_v9 = vpop.f32.mrb[55].mxu1  ;;  %v1605_v54 = vadd.f32 0.2548296, %v1573_v13  ;;  %v3945_v35 = vpop.eup %3212  ;;  %3220 = vpow2.f32 %v1753_v38  ;;  %v3949_v46 = vmul.f32 0.5, %v3845_v33  ;;  %v1682_v8 = vsub.f32 0.0, %v1266_v55 }
 0x161   :  { %v1267_v45 = vand.u32 2147483647, %v3931_v2  ;;  %v1755_v51 = vmul.f32 1.442695, %v1712_v48  ;;  %v1606_v52 = vadd.f32 0.2548296, %v1574_v27  ;;  %v3954_v25 = vadd.f32 %v3674_v41, %v989_v18 }
 0x162   :  { %4750 = vst [vmem:[#allocation34_spill] sm:$0xff] %v3949_v46  ;;  %v1637_v37 = vmul.f32 %v3797_v61, %v1605_v54  ;;  %3222 = vrcp.f32 %v1328_v59  ;;  %v1298_v20 = vmul.f32 0.3275911, %v1266_v55  ;;  %v3959_v50 = vmul.f32 0.70710677, %v3942_v42 }
 0x163   :  { %v992_v38 = vadd.f32 %v2911_v63, %v2799_v49  ;;  %3224 = vrcp.f32 %v1329_v53  ;;  %v1757_v16 = vmul.f32 1.442695, %v1713_v34  ;;  %v1638_v12 = vmul.f32 %v3807_v57, %v1606_v52 }
 0x164   :  { %4751 = vst [vmem:[#allocation35_spill] sm:$0xff] %v3959_v50  ;;  %v1797_v62 = vmul.f32 %v3803_v32, %v1637_v37  ;;  %v3967_v18 = vpop.eup %3214  ;;  %v1714_v48 = vmul.f32 %v1682_v8, %v1266_v55  ;;  %v1683_v19 = vsub.f32 0.0, %v1267_v45  ;;  %v2802_v63 = vadd.f32 %v3795_v60, %v3789_v30 }
 0x165   :  { %v3956_v11 = vpop.f32.mrb[56].mxu1  ;;  %v3970_v13 = vadd.f32 %v3674_v41, %v992_v38  ;;  %v1798_v34 = vmul.f32 %v3824_v56, %v1638_v12  ;;  %v3978_v32 = vmul.f32 0.70710677, %v3954_v25  ;;  %3226 = vpow2.f32 %v1755_v51 }
 0x166   :  { %v3961_v33 = vpop.f32.mrb[57].mxu1  ;;  %v1861_v53 = vsub.f32 1.0, %v1797_v62  ;;  %v2530_v57 = vadd.f32 -1.0, %v1797_v62  ;;  %v3981_v59 = vmul.f32 0.5, %v3852_v10  ;;  %v1330_v55 = vadd.f32 1.0, %v1298_v20 }
 0x167   :  { %v3965_v61 = vpop.f32.mrb[58].mxu1  ;;  %4752 = vst [vmem:[#allocation36_spill] sm:$0xff] %v3978_v32  ;;  %v1268_v27 = vand.u32 2147483647, %v3959_v50  ;;  %v3984_v54 = vpop.eup %3216  ;;  %v1862_v8 = vsub.f32 1.0, %v1798_v34  ;;  %v2531_v30 = vadd.f32 -1.0, %v1798_v34  ;;  %3228 = vpow2.f32 %v1757_v16 }
 0x168   :  { %v3974_v49 = vpop.f32.mrb[59].mxu1  ;;  %4753 = vst [vmem:[#allocation37_spill] sm:$0xff] %v3981_v59  ;;  %v1925_v60 = vsel %vm1829_vm2, %v1861_v53, %v2530_v57  ;;  %v3989_v56 = vmul.f32 0.70710677, %v3970_v13  ;;  %v3991_v52 = vpop.eup %3218  ;;  %v1759_v51 = vmul.f32 1.442695, %v1714_v48  ;;  %v2914_v10 = vadd.f32 %v3919_v28, %v3915_v29 }
 0x169   :  { %v1957_v37 = vadd.f32 1.0, %v1925_v60  ;;  %v1299_v20 = vmul.f32 0.3275911, %v1267_v45  ;;  %v1715_v38 = vmul.f32 %v1683_v19, %v1267_v45  ;;  %v1926_v12 = vsel %vm1830_vm3, %v1862_v8, %v2531_v30 }
 0x16a   :  { %4754 = vst [vmem:[#allocation38_spill] sm:$0xff] %v3989_v56  ;;  %v1269_v62 = vand.u32 2147483647, %v3978_v32  ;;  %v4000_v34 = vpop.eup %3220  ;;  %v1958_v53 = vadd.f32 1.0, %v1926_v12  ;;  %v1300_v57 = vmul.f32 0.3275911, %v1268_v27  ;;  %v997_v16 = vadd.f32 %v2914_v10, %v2802_v63 }
 0x16b   :  { %v1684_v50 = vsub.f32 0.0, %v1268_v27  ;;  %3230 = vrcp.f32 %v1330_v55  ;;  %v1270_v28 = vand.u32 2147483647, %v3989_v56  ;;  %v1385_v29 = vmul.f32 1.0614054, %v3849_v31 }
 0x16c   :  { %v4010_v19 = vpop.eup %3222  ;;  %v1989_v8 = vmul.f32 %v1957_v37, %v3726_v3  ;;  %v1990_v30 = vmul.f32 %v1958_v53, %v3734_v21  ;;  %v1386_v63 = vmul.f32 1.0614054, %v3887_v17  ;;  %v2917_v55 = vadd.f32 %v3935_v9, %v3924_v36 }
 0x16d   :  { %v3998_v6 = vpop.f32.mrb[60].mxu1  ;;  %v4019_v10 = vpop.eup %3224  ;;  %v1331_v12 = vadd.f32 1.0, %v1299_v20  ;;  %v1685_v56 = vsub.f32 0.0, %v1269_v62  ;;  %v1417_v0 = vadd.f32 -1.4531521, %v1385_v29  ;;  %v2808_v5 = vadd.f32 %v3834_v22, %v3830_v24 }
 0x16e   :  { %v4002_v48 = vpop.f32.mrb[61].mxu1  ;;  %v1761_v32 = vmul.f32 1.442695, %v1715_v38  ;;  %v2021_v2 = vpack.c.bf16 %v1990_v30, %v1989_v8  ;;  %v1716_v3 = vmul.f32 %v1684_v50, %v1268_v27  ;;  %v1418_v37 = vadd.f32 -1.4531521, %v1386_v63 }
 0x16f   :  { %v4008_v45 = vpop.f32.mrb[62].mxu1  ;;  %v1332_v21 = vadd.f32 1.0, %v1300_v57  ;;  %v1301_v53 = vmul.f32 0.3275911, %v1269_v62  ;;  %v1449_v59 = vmul.f32 %v3849_v31, %v1417_v0  ;;  %v1000_v46 = vadd.f32 %v2917_v55, %v2805_v4  ;;  %v4024_v36 = vpop.eup %3226 }
 0x170   :  { %v4017_v60 = vpop.f32.mrb[63].mxu1  ;;  %3232 = vpow2.f32 %v1759_v51  ;;  %2994 = vmatprep.mubr.bf16.mxu0 %v2021_v2  ;;  %v1686_v9 = vsub.f32 0.0, %v1270_v28  ;;  %v1450_v20 = vmul.f32 %v3887_v17, %v1418_v37  ;;  %v2920_v29 = vadd.f32 %v3961_v33, %v3956_v11 }
 0x171   :  { %3234 = vrcp.f32 %v1331_v12  ;;  %v1717_v24 = vmul.f32 %v1685_v56, %v1269_v62  ;;  %v4755_v22 = vpack.c.bf16 %v3873_v7, %v3870_v14  ;;  %v1175_v50 = vadd.f32 %v3674_v41, %v997_v16  ;;  %v4035_v57 = vpop.eup %3228 }
 0x172   :  { %v1481_v27 = vadd.f32 1.4214138, %v1449_v59  ;;  %3236 = vpow2.f32 %v1761_v32  ;;  %v1763_v2 = vmul.f32 1.442695, %v1716_v3  ;;  %v1482_v51 = vadd.f32 1.4214138, %v1450_v20 }
 0x173   :  { %2995 = vmatmul.mubr.bf16.vlgmr.msra.gmra.mrb[48].mxu0 %v4755_v22  ;;  %v4037_v4 = vadd.f32 %v2920_v29, %v2808_v5  ;;  %3238 = vrcp.f32 %v1332_v21  ;;  %v1333_v11 = vadd.f32 1.0, %v1301_v53  ;;  %v1302_v33 = vmul.f32 0.3275911, %v1270_v28 }
 0x174   :  { %v1513_v14 = vmul.f32 %v3849_v31, %v1481_v27  ;;  %v1718_v56 = vmul.f32 %v1686_v9, %v1270_v28  ;;  %v1514_v59 = vmul.f32 %v3887_v17, %v1482_v51  ;;  %v1387_v62 = vmul.f32 1.0614054, %v3904_v58 }
 0x175   :  { %v4033_v38 = vpop.f32.mrb[64].mxu1  ;;  %v1388_v32 = vmul.f32 1.0614054, %v3917_v44  ;;  %v4049_v30 = vpop.eup %3230  ;;  %v1765_v63 = vmul.f32 1.442695, %v1717_v24  ;;  %v2811_v0 = vadd.f32 %v3847_v43, %v3841_v47  ;;  %v4056_v5 = vmul.f32 0.5, %v3884_v1 }
 0x176   :  { %v4039_v8 = vpop.f32.mrb[65].mxu1  ;;  %v4051_v55 = vmul.f32 0.70710677, %v1175_v50  ;;  %v1545_v12 = vadd.f32 -0.28449672, %v1513_v14  ;;  %v4059_v28 = vmul.f32 0.5, %v3910_v15  ;;  %3240 = vpow2.f32 %v1763_v2 }
 0x177   :  { %v4042_v7 = vpop.f32.mrb[66].mxu1  ;;  %v1546_v3 = vadd.f32 -0.28449672, %v1514_v59  ;;  %v4062_v37 = vmul.f32 0.5, %v3942_v42  ;;  %3242 = vrcp.f32 %v1333_v11  ;;  %v1334_v21 = vadd.f32 1.0, %v1302_v33 }
 0x178   :  { %v4047_v16 = vpop.f32.mrb[67].mxu1  ;;  %4756 = vst [vmem:[#allocation39_spill] sm:$0xff] %v4051_v55  ;;  %4757 = vst [vmem:[#allocation40_spill] sm:$0xff] %v4059_v28  ;;  %v1577_v53 = vmul.f32 %v3849_v31, %v1545_v12  ;;  %v1767_v9 = vmul.f32 1.442695, %v1718_v56  ;;  %v4069_v15 = vmul.f32 0.5, %v3954_v25  ;;  %3244 = vpow2.f32 %v1765_v63 }
 0x179   :  { %4758 = vst [vmem:[#allocation41_spill] sm:$0xff] %v4062_v37  ;;  %v1578_v47 = vmul.f32 %v3887_v17, %v1546_v3  ;;  %v1419_v43 = vadd.f32 -1.4531521, %v1387_v62  ;;  %v1420_v1 = vadd.f32 -1.4531521, %v1388_v32  ;;  %v1176_v27 = vadd.f32 %v3674_v41, %v1000_v46 }
 0x17a   :  { %4759 = vst [vmem:[#allocation42_spill] sm:$0xff] %v4069_v15  ;;  %v1271_v42 = vand.u32 2147483647, %v4051_v55  ;;  %v1609_v20 = vadd.f32 0.2548296, %v1577_v53  ;;  %v4074_v24 = vpop.eup %3232  ;;  %v4084_v25 = vmul.f32 0.5, %v3970_v13  ;;  %3246 = vrcp.f32 %v1334_v21 }
 0x17b   :  { %v1610_v22 = vadd.f32 0.2548296, %v1578_v47  ;;  %v1451_v2 = vmul.f32 %v3904_v58, %v1419_v43  ;;  %v1452_v51 = vmul.f32 %v3917_v44, %v1420_v1  ;;  %v4081_v33 = vpop.eup %3234  ;;  %v4086_v14 = vmul.f32 0.5, %v1175_v50  ;;  %v4763_v21 = vld [vmem:[#allocation28_spill] sm:$0xff] }
 0x17c   :  { %4760 = vst [vmem:[#allocation43_spill] sm:$0xff] %v4084_v25  ;;  %v1641_v56 = vmul.f32 %v3849_v31, %v1609_v20  ;;  %v4091_v62 = vpop.eup %3236  ;;  %3248 = vpow2.f32 %v1767_v9  ;;  %v1303_v13 = vmul.f32 0.3275911, %v1271_v42  ;;  %v1687_v53 = vsub.f32 0.0, %v1271_v42 }
 0x17d   :  { %v4072_v29 = vpop.f32.mrb[68].mxu1  ;;  %4761 = vst [vmem:[#allocation44_spill] sm:$0xff] %v4086_v14  ;;  %4762 = vst [vmem:[#allocation45_spill] sm:$0xff] %v4091_v62  ;;  %v1642_v46 = vmul.f32 %v3887_v17, %v1610_v22  ;;  %v1483_v32 = vadd.f32 1.4214138, %v1451_v2  ;;  %v4096_v3 = vpop.eup %3238  ;;  %v2923_v31 = vadd.f32 %v3974_v49, %v3965_v61  ;;  %v1177_v22 = vadd.f32 %v3674_v41, %v4037_v4 }
 0x17e   :  { %v4079_v11 = vpop.f32.mrb[69].mxu1  ;;  %v1484_v63 = vadd.f32 1.4214138, %v1452_v51  ;;  %v1801_v50 = vmul.f32 %v3860_v26, %v1641_v56  ;;  %v4102_v43 = vmul.f32 0.70710677, %v1176_v27  ;;  %v4110_v14 = vmul.f32 0.5, %v1176_v27 }
 0x17f   :  { %v4089_v59 = vpop.f32.mrb[70].mxu1  ;;  %v1802_v47 = vmul.f32 %v4763_v21, %v1642_v46  ;;  %v1515_v9 = vmul.f32 %v3904_v58, %v1483_v32  ;;  %v1008_v2 = vadd.f32 %v2923_v31, %v2811_v0  ;;  %v1335_v46 = vadd.f32 1.0, %v1303_v13  ;;  %v4767_v21 = vld [vmem:[#allocation22_spill] sm:$0xff]  ;;  %v4770_v13 = vld [vmem:[#allocation11_spill] sm:$0xff] }
 0x180   :  { %v4094_v12 = vpop.f32.mrb[71].mxu1  ;;  %4764 = vst [vmem:[#allocation28_spill] sm:$0xff] %v4102_v43  ;;  %v1516_v17 = vmul.f32 %v3917_v44, %v1484_v63  ;;  %v1865_v1 = vsub.f32 1.0, %v1801_v50  ;;  %v2534_v20 = vadd.f32 -1.0, %v1801_v50  ;;  %v4108_v51 = vpop.eup %3240  ;;  %4766 = vst [vmem:[#allocation47_spill] sm:$0xff] %v4110_v14  ;;  %v4768_v50 = vld [vmem:[#allocation23_spill] sm:$0xff]  ;;  %v1719_v4 = vmul.f32 %v1687_v53, %v1271_v42 }
 0x181   :  { %4765 = vst [vmem:[#allocation46_spill] sm:$0xff] %v4108_v51  ;;  %v1866_v26 = vsub.f32 1.0, %v1802_v47  ;;  %v2535_v56 = vadd.f32 -1.0, %v1802_v47  ;;  %v1547_v61 = vadd.f32 -0.28449672, %v1515_v9  ;;  %v4112_v49 = vpop.eup %3242  ;;  %v2814_v25 = vadd.f32 %v4768_v50, %v4767_v21  ;;  %v4773_v50 = vld [vmem:[#allocation13_spill] sm:$0xff] }
 0x182   :  { %v1929_v32 = vsel %vm1833_vm4, %v1865_v1, %v2534_v20  ;;  %v1548_v63 = vadd.f32 -0.28449672, %v1516_v17  ;;  %v4125_v9 = vpop.eup %3244  ;;  %vm1835_vm6 = vcmp.ge.f32.partialorder %v4770_v13, 0.0  ;;  %v1272_v17 = vand.u32 2147483647, %v4102_v43  ;;  %v4776_v51 = vld [vmem:[#allocation30_spill] sm:$0xff] }
 0x183   :  { %v1930_v0 = vsel %vm1834_vm5, %v1866_v26, %v2535_v56  ;;  %v1961_v31 = vadd.f32 1.0, %v1929_v32  ;;  %v1579_v27 = vmul.f32 %v3904_v58, %v1547_v61  ;;  %4769 = vst [vmem:[#allocation22_spill] sm:$0xff] %v4125_v9  ;;  %v4129_v1 = vmul.f32 0.70710677, %v1177_v22 }
 0x184   :  { %v1962_v39 = vadd.f32 1.0, %v1930_v0  ;;  %v1580_v20 = vmul.f32 %v3917_v44, %v1548_v63  ;;  %v4136_v26 = vadd.f32 %v3674_v41, %v1008_v2  ;;  %v2926_v56 = vadd.f32 %v4002_v48, %v3998_v6  ;;  %v4143_v21 = vpop.eup %3246  ;;  %v4774_v0 = vld [vmem:[#allocation14_spill] sm:$0xff] }
 0x185   :  { %v4118_v15 = vpop.f32.mrb[72].mxu1  ;;  %4771 = vst [vmem:[#allocation23_spill] sm:$0xff] %v4129_v1  ;;  %v1611_v53 = vadd.f32 0.2548296, %v1579_v27  ;;  %v1389_v61 = vmul.f32 1.0614054, %v3937_v40  ;;  %3250 = vrcp.f32 %v1335_v46  ;;  %v1993_v63 = vmul.f32 %v1961_v31, %v4773_v50 }
 0x186   :  { %v4123_v47 = vpop.f32.mrb[73].mxu1  ;;  %v1994_v14 = vmul.f32 %v1962_v39, %v4774_v0  ;;  %v1612_v43 = vadd.f32 0.2548296, %v1580_v20  ;;  %v4147_v55 = vpop.eup %3248  ;;  %v1013_v2 = vadd.f32 %v2926_v56, %v2814_v25  ;;  %v1390_v27 = vmul.f32 1.0614054, %v3967_v18 }
 0x187   :  { %v4132_v42 = vpop.f32.mrb[74].mxu1  ;;  %4775 = vst [vmem:[#allocation11_spill] sm:$0xff] %v4147_v55  ;;  %v1643_v41 = vmul.f32 %v3904_v58, %v1611_v53  ;;  %v1421_v6 = vadd.f32 -1.4531521, %v1389_v61  ;;  %v1769_v48 = vmul.f32 1.442695, %v1719_v4  ;;  %v2932_v23 = vadd.f32 %v4039_v8, %v4033_v38 }
 0x188   :  { %v4141_v32 = vpop.f32.mrb[75].mxu1  ;;  %v2023_v9 = vpack.c.bf16 %v1994_v14, %v1993_v63  ;;  %v1273_v37 = vand.u32 2147483647, %v4129_v1  ;;  %v1644_v28 = vmul.f32 %v3917_v44, %v1612_v43  ;;  %v1304_v46 = vmul.f32 0.3275911, %v1272_v17  ;;  %v4779_v58 = vld [vmem:[#allocation31_spill] sm:$0xff] }
 0x189   :  { %v1803_v31 = vmul.f32 %v4776_v51, %v1643_v41  ;;  %v4155_v39 = vmul.f32 0.70710677, %v4136_v26  ;;  %v1422_v20 = vadd.f32 -1.4531521, %v1390_v27  ;;  %v4157_v50 = vmul.f32 0.5, %v1177_v22  ;;  %v4780_v4 = vld [vmem:[#allocation25_spill] sm:$0xff] }
 0x18a   :  { %2998 = vmatprep.mubr.bf16.mxu0 %v2023_v9  ;;  %v1804_v25 = vmul.f32 %v4779_v58, %v1644_v28  ;;  %v1453_v53 = vmul.f32 %v3937_v40, %v1421_v6  ;;  %v4781_v14 = vld [vmem:[#allocation27_spill] sm:$0xff]  ;;  %v1688_v44 = vsub.f32 0.0, %v1272_v17  ;;  %3252 = vpow2.f32 %v1769_v48 }
 0x18b   :  { %4777 = vst [vmem:[#allocation12_spill] sm:$0xff] %v4155_v39  ;;  %4778 = vst [vmem:[#allocation13_spill] sm:$0xff] %v4157_v50  ;;  %v2817_v56 = vadd.f32 %v4781_v14, %v4780_v4  ;;  %v1867_v43 = vsub.f32 1.0, %v1803_v31  ;;  %v2536_v63 = vadd.f32 -1.0, %v1803_v31  ;;  %v4168_v51 = vld [vmem:[%s4673_s2] ss:$0 sm:$0xff]  ;;  %v1454_v4 = vmul.f32 %v3967_v18, %v1422_v20 }
 0x18c   :  { %v4171_v22 = vadd.f32 %v4168_v51, %v1013_v2  ;;  %v1689_v28 = vsub.f32 0.0, %v1273_v37  ;;  %v1868_v0 = vsub.f32 1.0, %v1804_v25  ;;  %v2537_v41 = vadd.f32 -1.0, %v1804_v25 }
 0x18d   :  { %v4163_v61 = vpop.f32.mrb[76].mxu1  ;;  %v1336_v6 = vadd.f32 1.0, %v1304_v46  ;;  %v1931_v31 = vsel %vm1835_vm6, %v1867_v43, %v2536_v63  ;;  %v1274_v58 = vand.u32 2147483647, %v4155_v39  ;;  %v1305_v2 = vmul.f32 0.3275911, %v1273_v37 }
 0x18e   :  { %v4173_v9 = vpop.f32.mrb[77].mxu1  ;;  %v1932_v50 = vsel %vm1836_vm7, %v1868_v0, %v2537_v41  ;;  %v1963_v48 = vadd.f32 1.0, %v1931_v31  ;;  %v1485_v1 = vadd.f32 1.4214138, %v1453_v53  ;;  %v1720_v55 = vmul.f32 %v1688_v44, %v1272_v17  ;;  %v4783_v0 = vld [vmem:[#allocation16_spill] sm:$0xff]  ;;  %v4784_v53 = vld [vmem:[#allocation19_spill] sm:$0xff] }
 0x18f   :  { %v4175_v27 = vpop.f32.mrb[78].mxu1  ;;  %v1964_v25 = vadd.f32 1.0, %v1932_v50  ;;  %v4186_v62 = vmul.f32 0.70710677, %v4171_v22  ;;  %v1486_v46 = vadd.f32 1.4214138, %v1454_v4  ;;  %v4188_v13 = vpop.eup %3250  ;;  %v1721_v43 = vmul.f32 %v1689_v28, %v1273_v37 }
 0x190   :  { %v4181_v14 = vpop.f32.mrb[79].mxu1  ;;  %4782 = vst [vmem:[#allocation14_spill] sm:$0xff] %v4188_v13  ;;  %v1517_v63 = vmul.f32 %v3937_v40, %v1485_v1  ;;  %v2929_v20 = vadd.f32 %v4017_v60, %v4008_v45  ;;  %v1995_v41 = vmul.f32 %v1963_v48, %v4783_v0  ;;  %v1690_v50 = vsub.f32 0.0, %v1274_v58  ;;  %v4785_v39 = vld [vmem:[#allocation3_spill] sm:$0xff] }
 0x191   :  { %v1996_v17 = vmul.f32 %v1964_v25, %v4784_v53  ;;  %v1518_v44 = vmul.f32 %v3967_v18, %v1486_v46  ;;  %v1021_v13 = vadd.f32 %v2932_v23, %v4785_v39  ;;  %v1391_v37 = vmul.f32 1.0614054, %v3991_v52  ;;  %v4786_v25 = vld [vmem:[#allocation15_spill] sm:$0xff] }
 0x192   :  { %v1549_v31 = vadd.f32 -0.28449672, %v1517_v63  ;;  %v1016_v4 = vadd.f32 %v2929_v20, %v2817_v56  ;;  %3254 = vrcp.f32 %v1336_v6  ;;  %v1275_v45 = vand.u32 2147483647, %v4186_v62 }
 0x193   :  { %v2024_v1 = vpack.c.bf16 %v1996_v17, %v1995_v41  ;;  %v1550_v60 = vadd.f32 -0.28449672, %v1518_v44  ;;  %v1771_v28 = vmul.f32 1.442695, %v1720_v55  ;;  %v1306_v38 = vmul.f32 0.3275911, %v1274_v58 }
 0x194   :  { %v1581_v8 = vmul.f32 %v3937_v40, %v1549_v31  ;;  %v1392_v48 = vmul.f32 1.0614054, %v4010_v19  ;;  %vm1837_vm8 = vcmp.ge.f32.partialorder %v4786_v25, 0.0  ;;  %v4206_v39 = vadd.f32 %v4168_v51, %v1016_v4  ;;  %v4210_v63 = vpop.eup %3252  ;;  %v4787_v55 = vld [vmem:[#allocation17_spill] sm:$0xff] }
 0x195   :  { %2999 = vmatmul.mubr.bf16.gmra.mrb[52].mxu0 %v2024_v1  ;;  %v1582_v56 = vmul.f32 %v3967_v18, %v1550_v60  ;;  %v1423_v46 = vadd.f32 -1.4531521, %v1391_v37  ;;  %v2935_v6 = vadd.f32 %v4047_v16, %v4042_v7  ;;  %vm1838_vm9 = vcmp.ge.f32.partialorder %v4787_v55, 0.0  ;;  %v4788_v7 = vld [vmem:[#allocation4_spill] sm:$0xff]  ;;  %v4791_v55 = vld [vmem:[#allocation26_spill] sm:$0xff] }
 0x196   :  { %v1337_v20 = vadd.f32 1.0, %v1305_v2  ;;  %v1773_v23 = vmul.f32 1.442695, %v1721_v43  ;;  %v1722_v0 = vmul.f32 %v1690_v50, %v1274_v58  ;;  %v1613_v41 = vadd.f32 0.2548296, %v1581_v8 }
 0x197   :  { %v1691_v53 = vsub.f32 0.0, %v1275_v45  ;;  %v1614_v17 = vadd.f32 0.2548296, %v1582_v56  ;;  %v1424_v44 = vadd.f32 -1.4531521, %v1392_v48  ;;  %v1455_v31 = vmul.f32 %v3991_v52, %v1423_v46 }
 0x198   :  { %3256 = vpow2.f32 %v1771_v28  ;;  %v1645_v4 = vmul.f32 %v3937_v40, %v1613_v41  ;;  %v4216_v37 = vadd.f32 %v4168_v51, %v1021_v13  ;;  %v1024_v16 = vadd.f32 %v2935_v6, %v4788_v7 }
 0x199   :  { %v1338_v1 = vadd.f32 1.0, %v1306_v38  ;;  %v1646_v60 = vmul.f32 %v3967_v18, %v1614_v17  ;;  %v4221_v2 = vmul.f32 0.70710677, %v4206_v39  ;;  %v1456_v58 = vmul.f32 %v4010_v19, %v1424_v44 }
 0x19a   :  { %3258 = vrcp.f32 %v1337_v20  ;;  %v1775_v43 = vmul.f32 1.442695, %v1722_v0  ;;  %v1805_v50 = vmul.f32 %v3945_v35, %v1645_v4  ;;  %v1487_v28 = vadd.f32 1.4214138, %v1455_v31 }
 0x19b   :  { %3260 = vpow2.f32 %v1773_v23  ;;  %v1307_v40 = vmul.f32 0.3275911, %v1275_v45  ;;  %v1723_v8 = vmul.f32 %v1691_v53, %v1275_v45  ;;  %v1806_v13 = vmul.f32 %v3984_v54, %v1646_v60 }
 0x19c   :  { %v1869_v48 = vsub.f32 1.0, %v1805_v50  ;;  %v2538_v56 = vadd.f32 -1.0, %v1805_v50  ;;  %v4227_v38 = vmul.f32 0.70710677, %v4216_v37  ;;  %v1488_v18 = vadd.f32 1.4214138, %v1456_v58  ;;  %v4229_v46 = vpop.eup %3254 }
 0x19d   :  { %3262 = vrcp.f32 %v1338_v1  ;;  %v1870_v6 = vsub.f32 1.0, %v1806_v13  ;;  %v2539_v20 = vadd.f32 -1.0, %v1806_v13  ;;  %v1276_v0 = vand.u32 2147483647, %v4221_v2  ;;  %v4792_v13 = vld [vmem:[#allocation18_spill] sm:$0xff] }
 0x19e   :  { %4789 = vst [vmem:[#allocation30_spill] sm:$0xff] %v4227_v38  ;;  %v4233_v35 = vmul.f32 0.5, %v4136_v26  ;;  %3264 = vpow2.f32 %v1775_v43  ;;  %v1933_v54 = vsel %vm1837_vm8, %v1869_v48, %v2538_v56  ;;  %v1519_v45 = vmul.f32 %v3991_v52, %v1487_v28  ;;  %v4790_v26 = vld [vmem:[#allocation20_spill] sm:$0xff] }
 0x19f   :  { %v1339_v23 = vadd.f32 1.0, %v1307_v40  ;;  %v1777_v41 = vmul.f32 1.442695, %v1723_v8  ;;  %v1934_v53 = vsel %vm1838_vm9, %v1870_v6, %v2539_v20  ;;  %v1965_v17 = vadd.f32 1.0, %v1933_v54 }
 0x1a0   :  { %v1966_v44 = vadd.f32 1.0, %v1934_v53  ;;  %v1277_v31 = vand.u32 2147483647, %v4227_v38  ;;  %v1520_v4 = vmul.f32 %v4010_v19, %v1488_v18  ;;  %v1551_v7 = vadd.f32 -0.28449672, %v1519_v45 }
 0x1a1   :  { %v1997_v1 = vmul.f32 %v1965_v17, %v4790_v26  ;;  %v1308_v60 = vmul.f32 0.3275911, %v1276_v0  ;;  %v4244_v25 = vadd.f32 %v4168_v51, %v1024_v16  ;;  %v2938_v58 = vadd.f32 %v4079_v11, %v4072_v29  ;;  %v4793_v16 = vld [vmem:[#allocation5_spill] sm:$0xff] }
 0x1a2   :  { %v4248_v43 = vpop.eup %3256  ;;  %v1998_v50 = vmul.f32 %v1966_v44, %v4791_v55  ;;  %v1552_v28 = vadd.f32 -0.28449672, %v1520_v4  ;;  %v1583_v40 = vmul.f32 %v3991_v52, %v1551_v7  ;;  %v1393_v8 = vmul.f32 1.0614054, %v4019_v10  ;;  %v4794_v17 = vld [vmem:[#allocation21_spill] sm:$0xff] }
 0x1a3   :  { %vm1839_vm10 = vcmp.ge.f32.partialorder %v4792_v13, 0.0  ;;  %v1692_v48 = vsub.f32 0.0, %v1276_v0  ;;  %v4255_v56 = vmul.f32 0.70710677, %v4244_v25  ;;  %v1029_v18 = vadd.f32 %v2938_v58, %v4793_v16 }
 0x1a4   :  { %v1394_v6 = vmul.f32 1.0614054, %v4049_v30  ;;  %v4259_v29 = vpop.eup %3258  ;;  %v2025_v11 = vpack.c.bf16 %v1998_v50, %v1997_v1  ;;  %v1584_v20 = vmul.f32 %v4010_v19, %v1552_v28  ;;  %v1615_v54 = vadd.f32 0.2548296, %v1583_v40 }
 0x1a5   :  { %v1425_v45 = vadd.f32 -1.4531521, %v1393_v8  ;;  %v4262_v53 = vpop.eup %3260  ;;  %vm1840_vm11 = vcmp.ge.f32.partialorder %v4794_v17, 0.0  ;;  %v1309_v44 = vmul.f32 0.3275911, %v1277_v31  ;;  %v1693_v4 = vsub.f32 0.0, %v1277_v31 }
 0x1a6   :  { %v4266_v7 = vadd.f32 %v4168_v51, %v1029_v18  ;;  %v1426_v26 = vadd.f32 -1.4531521, %v1394_v6  ;;  %3002 = vmatprep.mubr.bf16.mxu0 %v2025_v11  ;;  %v1616_v58 = vadd.f32 0.2548296, %v1584_v20  ;;  %v1647_v55 = vmul.f32 %v3991_v52, %v1615_v54 }
 0x1a7   :  { %v1457_v1 = vmul.f32 %v4019_v10, %v1425_v45  ;;  %v2941_v50 = vadd.f32 %v4094_v12, %v4089_v59  ;;  %v4272_v28 = vpop.eup %3262  ;;  %3266 = vrcp.f32 %v1339_v23  ;;  %v1340_v40 = vadd.f32 1.0, %v1308_v60 }
 0x1a8   :  { %v1724_v8 = vmul.f32 %v1692_v48, %v1276_v0  ;;  %v1278_v16 = vand.u32 2147483647, %v4255_v56  ;;  %v4275_v38 = vpop.eup %3264  ;;  %v1648_v18 = vmul.f32 %v4010_v19, %v1616_v58  ;;  %v1807_v6 = vmul.f32 %v4000_v34, %v1647_v55 }
 0x1a9   :  { %v1458_v52 = vmul.f32 %v4049_v30, %v1426_v26  ;;  %v1489_v11 = vadd.f32 1.4214138, %v1457_v1  ;;  %3268 = vpow2.f32 %v1777_v41  ;;  %v1341_v20 = vadd.f32 1.0, %v1309_v44 }
 0x1aa   :  { %v1725_v54 = vmul.f32 %v1693_v4, %v1277_v31  ;;  %v4281_v59 = vmul.f32 0.70710677, %v4266_v7  ;;  %v1808_v12 = vmul.f32 %v4024_v36, %v1648_v18  ;;  %v1871_v0 = vsub.f32 1.0, %v1807_v6 }
 0x1ab   :  { %v2540_v23 = vadd.f32 -1.0, %v1807_v6  ;;  %v1490_v60 = vadd.f32 1.4214138, %v1458_v52  ;;  %3270 = vrcp.f32 %v1340_v40  ;;  %v1779_v48 = vmul.f32 1.442695, %v1724_v8  ;;  %v4795_v40 = vld [vmem:[#allocation6_spill] sm:$0xff] }
 0x1ac   :  { %v1310_v45 = vmul.f32 0.3275911, %v1278_v16  ;;  %v1694_v19 = vsub.f32 0.0, %v1278_v16  ;;  %v1872_v58 = vsub.f32 1.0, %v1808_v12  ;;  %v2541_v34 = vadd.f32 -1.0, %v1808_v12  ;;  %v4796_v12 = vld [vmem:[#allocation24_spill] sm:$0xff] }
 0x1ad   :  { %v1935_v26 = vsel %vm1839_vm10, %v1871_v0, %v2540_v23  ;;  %v1521_v41 = vmul.f32 %v4019_v10, %v1489_v11  ;;  %3272 = vrcp.f32 %v1341_v20  ;;  %v1781_v31 = vmul.f32 1.442695, %v1725_v54  ;;  %v4797_v0 = vld [vmem:[#allocation32_spill] sm:$0xff] }
 0x1ae   :  { %v1967_v44 = vadd.f32 1.0, %v1935_v26  ;;  %v1279_v4 = vand.u32 2147483647, %v4281_v59  ;;  %v1936_v36 = vsel %vm1840_vm11, %v1872_v58, %v2541_v34  ;;  %v1522_v55 = vmul.f32 %v4049_v30, %v1490_v60 }
 0x1af   :  { %v1553_v1 = vadd.f32 -0.28449672, %v1521_v41  ;;  %v1032_v8 = vadd.f32 %v2941_v50, %v4795_v40  ;;  %3274 = vpow2.f32 %v1779_v48  ;;  %v1968_v18 = vadd.f32 1.0, %v1936_v36  ;;  %v4798_v50 = vld [vmem:[#allocation34_spill] sm:$0xff]  ;;  %v4800_v41 = vld [vmem:[#allocation7_spill] sm:$0xff] }
 0x1b0   :  { %v1342_v6 = vadd.f32 1.0, %v1310_v45  ;;  %v1726_v13 = vmul.f32 %v1694_v19, %v1278_v16  ;;  %v1554_v52 = vadd.f32 -0.28449672, %v1522_v55  ;;  %v2944_v54 = vadd.f32 %v4123_v47, %v4118_v15  ;;  %v4799_v47 = vld [vmem:[#allocation29_spill] sm:$0xff] }
 0x1b1   :  { %v1585_v11 = vmul.f32 %v4019_v10, %v1553_v1  ;;  %v4294_v20 = vadd.f32 %v4168_v51, %v1032_v8  ;;  %v4298_v17 = vpop.eup %3266  ;;  %vm1841_vm12 = vcmp.ge.f32.partialorder %v4796_v12, 0.0  ;;  %v1999_v23 = vmul.f32 %v1967_v44, %v4797_v0 }
 0x1b2   :  { %v2000_v60 = vmul.f32 %v1968_v18, %v4798_v50  ;;  %v1395_v48 = vmul.f32 1.0614054, %v4081_v33  ;;  %v1396_v16 = vmul.f32 1.0614054, %v4096_v3  ;;  %v1311_v45 = vmul.f32 0.3275911, %v1279_v4 }
 0x1b3   :  { %v1586_v19 = vmul.f32 %v4049_v30, %v1554_v52  ;;  %v1617_v58 = vadd.f32 0.2548296, %v1585_v11  ;;  %v4307_v34 = vmul.f32 0.70710677, %v4294_v20  ;;  %v4309_v15 = vpop.eup %3268  ;;  %vm1842_vm13 = vcmp.ge.f32.partialorder %v4799_v47, 0.0 }
 0x1b4   :  { %v2026_v26 = vpack.c.bf16 %v2000_v60, %v1999_v23  ;;  %v1037_v44 = vadd.f32 %v2944_v54, %v4800_v41  ;;  %v1427_v36 = vadd.f32 -1.4531521, %v1395_v48  ;;  %v1428_v55 = vadd.f32 -1.4531521, %v1396_v16 }
 0x1b5   :  { %v1695_v1 = vsub.f32 0.0, %v1279_v4  ;;  %v1618_v40 = vadd.f32 0.2548296, %v1586_v19  ;;  %v1649_v8 = vmul.f32 %v4019_v10, %v1617_v58  ;;  %v1280_v18 = vand.u32 2147483647, %v4307_v34  ;;  %v4315_v52 = vpop.eup %3270  ;;  %v4803_v58 = vld [vmem:[#allocation8_spill] sm:$0xff] }
 0x1b6   :  { %3003 = vmatmul.mubr.bf16.gmra.mrb[56].mxu0 %v2026_v26  ;;  %v4318_v11 = vadd.f32 %v4168_v51, %v1037_v44  ;;  %v1459_v0 = vmul.f32 %v4081_v33, %v1427_v36  ;;  %v1460_v23 = vmul.f32 %v4096_v3, %v1428_v55  ;;  %v2947_v54 = vadd.f32 %v4141_v32, %v4132_v42 }
 0x1b7   :  { %v4325_v50 = vmul.f32 0.5, %v4171_v22  ;;  %3276 = vpow2.f32 %v1781_v31  ;;  %v1650_v10 = vmul.f32 %v4049_v30, %v1618_v40  ;;  %v1809_v60 = vmul.f32 %v4035_v57, %v1649_v8  ;;  %v4329_v48 = vpop.eup %3272 }
 0x1b8   :  { %4801 = vst [vmem:[#allocation31_spill] sm:$0xff] %v4318_v11  ;;  %3278 = vrcp.f32 %v1342_v6  ;;  %v1783_v16 = vmul.f32 1.442695, %v1726_v13  ;;  %v4332_v19 = vmul.f32 0.70710677, %v4318_v11  ;;  %v1040_v26 = vadd.f32 %v2947_v54, %v4803_v58  ;;  %v4823_v11 = vld [vmem:[#allocation11_spill] sm:$0xff] }
 0x1b9   :  { %v1810_v41 = vmul.f32 %v4074_v24, %v1650_v10  ;;  %v1873_v42 = vsub.f32 1.0, %v1809_v60  ;;  %v2542_v32 = vadd.f32 -1.0, %v1809_v60  ;;  %v1491_v22 = vadd.f32 1.4214138, %v1459_v0  ;;  %v4336_v44 = vpop.eup %3274 }
 0x1ba   :  { %4802 = vst [vmem:[#allocation25_spill] sm:$0xff] %v4332_v19  ;;  %v1343_v31 = vadd.f32 1.0, %v1311_v45  ;;  %v1727_v30 = vmul.f32 %v1695_v1, %v1279_v4  ;;  %v1696_v36 = vsub.f32 0.0, %v1280_v18  ;;  %v1492_v57 = vadd.f32 1.4214138, %v1460_v23 }
 0x1bb   :  { %v1874_v55 = vsub.f32 1.0, %v1810_v41  ;;  %v2543_v40 = vadd.f32 -1.0, %v1810_v41  ;;  %v1937_v6 = vsel %vm1841_vm12, %v1873_v42, %v2542_v32  ;;  %v1281_v13 = vand.u32 2147483647, %v4332_v19  ;;  %v4805_v41 = vld [vmem:[#allocation37_spill] sm:$0xff] }
 0x1bc   :  { %v4342_v8 = vmul.f32 0.5, %v4206_v39  ;;  %3280 = vpow2.f32 %v1783_v16  ;;  %v1969_v24 = vadd.f32 1.0, %v1937_v6  ;;  %v1312_v54 = vmul.f32 0.3275911, %v1280_v18 }
 0x1bd   :  { %v1938_v0 = vsel %vm1842_vm13, %v1874_v55, %v2543_v40  ;;  %v1523_v4 = vmul.f32 %v4081_v33, %v1491_v22  ;;  %v1524_v45 = vmul.f32 %v4096_v3, %v1492_v57  ;;  %v4349_v1 = vadd.f32 %v4168_v51, %v1040_v26  ;;  %v4807_v57 = vld [vmem:[#allocation33_spill] sm:$0xff] }
 0x1be   :  { %v4352_v12 = vmul.f32 0.5, %v4216_v37  ;;  %3282 = vrcp.f32 %v1343_v31  ;;  %v1785_v23 = vmul.f32 1.442695, %v1727_v30  ;;  %v1970_v39 = vadd.f32 1.0, %v1938_v0 }
 0x1bf   :  { %4804 = vst [vmem:[#allocation27_spill] sm:$0xff] %v4349_v1  ;;  %v1728_v10 = vmul.f32 %v1696_v36, %v1280_v18  ;;  %v1697_v60 = vsub.f32 0.0, %v1281_v13  ;;  %v1555_v16 = vadd.f32 -0.28449672, %v1523_v4  ;;  %v1556_v58 = vadd.f32 -0.28449672, %v1524_v45 }
 0x1c0   :  { %v2001_v47 = vmul.f32 %v1969_v24, %v4805_v41  ;;  %v2002_v42 = vmul.f32 %v1970_v39, %v4056_v5  ;;  %v4357_v32 = vmul.f32 0.70710677, %v4349_v1  ;;  %v2950_v26 = vadd.f32 %v4173_v9, %v4163_v61  ;;  %v4808_v5 = vld [vmem:[#allocation35_spill] sm:$0xff]  ;;  %v4809_v61 = vld [vmem:[#allocation9_spill] sm:$0xff] }
 0x1c1   :  { %v4361_v22 = vpop.eup %3276  ;;  %v1344_v37 = vadd.f32 1.0, %v1312_v54  ;;  %v1587_v31 = vmul.f32 %v4081_v33, %v1555_v16  ;;  %v1588_v18 = vmul.f32 %v4096_v3, %v1556_v58  ;;  %v1397_v30 = vmul.f32 1.0614054, %v4112_v49 }
 0x1c2   :  { %4806 = vst [vmem:[#allocation16_spill] sm:$0xff] %v4357_v32  ;;  %v4366_v36 = vpop.eup %3278  ;;  %vm1843_vm14 = vcmp.ge.f32.partialorder %v4807_v57, 0.0  ;;  %vm1844_vm15 = vcmp.ge.f32.partialorder %v4808_v5, 0.0  ;;  %v2027_v55 = vpack.c.bf16 %v2002_v42, %v2001_v47  ;;  %v1313_v40 = vmul.f32 0.3275911, %v1281_v13  ;;  %v4816_v57 = vld [vmem:[#allocation14_spill] sm:$0xff] }
 0x1c3   :  { %v1282_v6 = vand.u32 2147483647, %v4357_v32  ;;  %v1045_v9 = vadd.f32 %v2950_v26, %v4809_v61  ;;  %3284 = vpow2.f32 %v1785_v23  ;;  %v1619_v24 = vadd.f32 0.2548296, %v1587_v31  ;;  %v4817_v5 = vld [vmem:[#allocation40_spill] sm:$0xff] }
 0x1c4   :  { %v1620_v54 = vadd.f32 0.2548296, %v1588_v18  ;;  %v1398_v0 = vmul.f32 1.0614054, %v4143_v21  ;;  %3006 = vmatprep.mubr.bf16.mxu0 %v2027_v55  ;;  %v1787_v4 = vmul.f32 1.442695, %v1728_v10  ;;  %v1729_v45 = vmul.f32 %v1697_v60, %v1281_v13 }
 0x1c5   :  { %v4374_v39 = vadd.f32 %v4168_v51, %v1045_v9  ;;  %v1429_v16 = vadd.f32 -1.4531521, %v1397_v30  ;;  %v1651_v58 = vmul.f32 %v4081_v33, %v1619_v24  ;;  %v2953_v42 = vadd.f32 %v4181_v14, %v4175_v27  ;;  %v4812_v13 = vld [vmem:[#allocation45_spill] sm:$0xff]  ;;  %v4813_v18 = vld [vmem:[#allocation46_spill] sm:$0xff] }
 0x1c6   :  { %v1652_v41 = vmul.f32 %v4096_v3, %v1620_v54  ;;  %v1430_v47 = vadd.f32 -1.4531521, %v1398_v0  ;;  %v4380_v23 = vpop.eup %3280  ;;  %3286 = vrcp.f32 %v1344_v37  ;;  %v1345_v26 = vadd.f32 1.0, %v1313_v40 }
 0x1c7   :  { %4810 = vst [vmem:[#allocation19_spill] sm:$0xff] %v4374_v39  ;;  %v1314_v31 = vmul.f32 0.3275911, %v1282_v6  ;;  %v4383_v10 = vmul.f32 0.70710677, %v4374_v39  ;;  %v1811_v60 = vmul.f32 %v4812_v13, %v1651_v58  ;;  %v1461_v33 = vmul.f32 %v4112_v49, %v1429_v16 }
 0x1c8   :  { %v1812_v30 = vmul.f32 %v4813_v18, %v1652_v41  ;;  %v1462_v3 = vmul.f32 %v4143_v21, %v1430_v47  ;;  %v4389_v55 = vpop.eup %3282  ;;  %3288 = vpow2.f32 %v1787_v4  ;;  %v1789_v27 = vmul.f32 1.442695, %v1729_v45  ;;  %v4814_v4 = vld [vmem:[#allocation10_spill] sm:$0xff] }
 0x1c9   :  { %4811 = vst [vmem:[#allocation3_spill] sm:$0xff] %v4383_v10  ;;  %v1698_v14 = vsub.f32 0.0, %v1282_v6  ;;  %v1283_v37 = vand.u32 2147483647, %v4383_v10  ;;  %v1875_v40 = vsub.f32 1.0, %v1811_v60  ;;  %v2544_v9 = vadd.f32 -1.0, %v1811_v60 }
 0x1ca   :  { %v1876_v61 = vsub.f32 1.0, %v1812_v30  ;;  %v2545_v24 = vadd.f32 -1.0, %v1812_v30  ;;  %3290 = vrcp.f32 %v1345_v26  ;;  %v1346_v54 = vadd.f32 1.0, %v1314_v31 }
 0x1cb   :  { %v1315_v0 = vmul.f32 0.3275911, %v1283_v37  ;;  %v1493_v58 = vadd.f32 1.4214138, %v1461_v33  ;;  %v1939_v16 = vsel %vm1843_vm14, %v1875_v40, %v2544_v9  ;;  %v1494_v47 = vadd.f32 1.4214138, %v1462_v3 }
 0x1cc   :  { %v1940_v41 = vsel %vm1844_vm15, %v1876_v61, %v2545_v24  ;;  %v1048_v45 = vadd.f32 %v2953_v42, %v4814_v4  ;;  %3292 = vpow2.f32 %v1789_v27  ;;  %v1971_v13 = vadd.f32 1.0, %v1939_v16  ;;  %v4818_v3 = vld [vmem:[#allocation41_spill] sm:$0xff]  ;;  %v4820_v4 = vld [vmem:[#allocation36_spill] sm:$0xff] }
 0x1cd   :  { %v1972_v18 = vadd.f32 1.0, %v1940_v41  ;;  %v1730_v39 = vmul.f32 %v1698_v14, %v1282_v6  ;;  %v4397_v10 = vpop.eup %3284  ;;  %v1525_v26 = vmul.f32 %v4112_v49, %v1493_v58  ;;  %v1526_v31 = vmul.f32 %v4143_v21, %v1494_v47 }
 0x1ce   :  { %v4402_v60 = vadd.f32 %v4168_v51, %v1048_v45  ;;  %v1399_v30 = vmul.f32 1.0614054, %v4816_v57  ;;  %v2003_v33 = vmul.f32 %v1971_v13, %v4817_v5  ;;  %v1347_v42 = vadd.f32 1.0, %v1315_v0  ;;  %v4821_v45 = vld [vmem:[#allocation38_spill] sm:$0xff] }
 0x1cf   :  { %v2004_v40 = vmul.f32 %v1972_v18, %v4818_v3  ;;  %v1699_v27 = vsub.f32 0.0, %v1283_v37  ;;  %v4408_v61 = vmul.f32 0.5, %v4244_v25  ;;  %3294 = vrcp.f32 %v1346_v54 }
 0x1d0   :  { %4815 = vst [vmem:[#allocation15_spill] sm:$0xff] %v4402_v60  ;;  %v1557_v6 = vadd.f32 -0.28449672, %v1525_v26  ;;  %v1558_v14 = vadd.f32 -0.28449672, %v1526_v31  ;;  %v4410_v9 = vpop.eup %3286  ;;  %vm1845_vm0 = vcmp.ge.f32.partialorder %v4820_v4, 0.0  ;;  %3296 = vrcp.f32 %v1347_v42 }
 0x1d1   :  { %v2028_v24 = vpack.c.bf16 %v2004_v40, %v2003_v33  ;;  %v4412_v58 = vmul.f32 1.442695, %v1730_v39  ;;  %v4415_v51 = vmul.f32 0.70710677, %v4402_v60  ;;  %v1400_v16 = vmul.f32 1.0614054, %v4229_v46 }
 0x1d2   :  { %v1589_v41 = vmul.f32 %v4112_v49, %v1557_v6  ;;  %v1590_v0 = vmul.f32 %v4143_v21, %v1558_v14  ;;  %v1431_v47 = vadd.f32 -1.4531521, %v1399_v30  ;;  %v1401_v25 = vmul.f32 1.0614054, %v4259_v29  ;;  %v4421_v54 = vpop.eup %3288 }
 0x1d3   :  { %4819 = vst [vmem:[#allocation17_spill] sm:$0xff] %v4415_v51  ;;  %vm1846_vm1 = vcmp.ge.f32.partialorder %v4821_v45, 0.0  ;;  %3007 = vmatmul.mubr.bf16.gmra.mrb[60].mxu0 %v2028_v24  ;;  %v1731_v39 = vmul.f32 %v1699_v27, %v1283_v37  ;;  %v1284_v13 = vand.u32 2147483647, %v4415_v51  ;;  %v1432_v18 = vadd.f32 -1.4531521, %v1400_v16 }
 0x1d4   :  { %v1621_v26 = vadd.f32 0.2548296, %v1589_v41  ;;  %v1622_v31 = vadd.f32 0.2548296, %v1590_v0  ;;  %v1463_v5 = vmul.f32 %v4816_v57, %v1431_v47  ;;  %v1402_v30 = vmul.f32 1.0614054, %v4272_v28  ;;  %v4428_v33 = vpop.eup %3290 }
 0x1d5   :  { %v1316_v3 = vmul.f32 0.3275911, %v1284_v13  ;;  %v1700_v40 = vsub.f32 0.0, %v1284_v13  ;;  %v1464_v6 = vmul.f32 %v4229_v46, %v1432_v18  ;;  %v1433_v14 = vadd.f32 -1.4531521, %v1401_v25  ;;  %v4822_v51 = vld [vmem:[#allocation22_spill] sm:$0xff] }
 0x1d6   :  { %v1653_v24 = vmul.f32 %v4112_v49, %v1621_v26  ;;  %v1654_v37 = vmul.f32 %v4143_v21, %v1622_v31  ;;  %v1495_v42 = vadd.f32 1.4214138, %v1463_v5  ;;  %v1434_v27 = vadd.f32 -1.4531521, %v1402_v30  ;;  %v4433_v16 = vpop.eup %3292 }
 0x1d7   :  { %v1348_v41 = vadd.f32 1.0, %v1316_v3  ;;  %v1732_v0 = vmul.f32 %v1700_v40, %v1284_v13  ;;  %v1496_v47 = vadd.f32 1.4214138, %v1464_v6  ;;  %v1465_v60 = vmul.f32 %v4259_v29, %v1433_v14 }
 0x1d8   :  { %v1813_v1 = vmul.f32 %v4822_v51, %v1653_v24  ;;  %v1814_v32 = vmul.f32 %v4823_v11, %v1654_v37  ;;  %v1527_v18 = vmul.f32 %v4816_v57, %v1495_v42  ;;  %v1466_v25 = vmul.f32 %v4272_v28, %v1434_v27 }
 0x1d9   :  { %v4440_v49 = vmul.f32 1.442695, %v1731_v39  ;;  %v4442_v21 = vmul.f32 1.442695, %v1732_v0  ;;  %v1528_v26 = vmul.f32 %v4229_v46, %v1496_v47  ;;  %v1497_v31 = vadd.f32 1.4214138, %v1465_v60  ;;  %v4445_v5 = vpop.eup %3294 }
 0x1da   :  { %v1877_v13 = vsub.f32 1.0, %v1813_v1  ;;  %v1878_v30 = vsub.f32 1.0, %v1814_v32  ;;  %v2546_v3 = vadd.f32 -1.0, %v1813_v1  ;;  %v2547_v40 = vadd.f32 -1.0, %v1814_v32  ;;  %v4453_v37 = vpop.eup %3296  ;;  %v4825_v0 = vld [vmem:[#allocation28_spill] sm:$0xff] }
 0x1db   :  { %3298 = vrcp.f32 %v1348_v41  ;;  %v1559_v51 = vadd.f32 -0.28449672, %v1527_v18  ;;  %v1560_v11 = vadd.f32 -0.28449672, %v1528_v26  ;;  %v1498_v6 = vadd.f32 1.4214138, %v1466_v25 }
 0x1dc   :  { %v1941_v14 = vsel %vm1845_vm0, %v1877_v13, %v2546_v3  ;;  %v1942_v39 = vsel %vm1846_vm1, %v1878_v30, %v2547_v40  ;;  %v1529_v24 = vmul.f32 %v4259_v29, %v1497_v31  ;;  %v1403_v60 = vmul.f32 1.0614054, %v4298_v17  ;;  %v4824_v41 = vld [vmem:[#allocation39_spill] sm:$0xff]  ;;  %v4826_v25 = vld [vmem:[#allocation42_spill] sm:$0xff] }
 0x1dd   :  { %v1973_v42 = vadd.f32 1.0, %v1941_v14  ;;  %v1974_v27 = vadd.f32 1.0, %v1942_v39  ;;  %v1591_v1 = vmul.f32 %v4816_v57, %v1559_v51  ;;  %v1592_v32 = vmul.f32 %v4229_v46, %v1560_v11  ;;  %v4827_v31 = vld [vmem:[#allocation43_spill] sm:$0xff] }
 0x1de   :  { %vm1847_vm2 = vcmp.ge.f32.partialorder %v4824_v41, 0.0  ;;  %vm1848_vm3 = vcmp.ge.f32.partialorder %v4825_v0, 0.0  ;;  %v1530_v4 = vmul.f32 %v4272_v28, %v1498_v6  ;;  %v1561_v45 = vadd.f32 -0.28449672, %v1529_v24  ;;  %v4830_v41 = vld [vmem:[#allocation44_spill] sm:$0xff]  ;;  %v4831_v0 = vld [vmem:[#allocation47_spill] sm:$0xff] }
 0x1df   :  { %v1404_v47 = vmul.f32 1.0614054, %v4315_v52  ;;  %v1435_v18 = vadd.f32 -1.4531521, %v1403_v60  ;;  %v2005_v26 = vmul.f32 %v1973_v42, %v4826_v25  ;;  %v2006_v13 = vmul.f32 %v1974_v27, %v4827_v31  ;;  %v4828_v60 = vld [vmem:[#allocation23_spill] sm:$0xff] }
 0x1e0   :  { %v1623_v30 = vadd.f32 0.2548296, %v1591_v1  ;;  %v1624_v3 = vadd.f32 0.2548296, %v1592_v32  ;;  %v1562_v40 = vadd.f32 -0.28449672, %v1530_v4  ;;  %v1593_v51 = vmul.f32 %v4259_v29, %v1561_v45 }
 0x1e1   :  { %v1436_v11 = vadd.f32 -1.4531521, %v1404_v47  ;;  %v1467_v14 = vmul.f32 %v4298_v17, %v1435_v18  ;;  %v2029_v39 = vpack.c.bf16 %v2006_v13, %v2005_v26  ;;  %v1405_v24 = vmul.f32 1.0614054, %v4329_v48  ;;  %v4829_v4 = vld [vmem:[#allocation12_spill] sm:$0xff] }
 0x1e2   :  { %v1655_v19 = vmul.f32 %v4816_v57, %v1623_v30  ;;  %v1656_v6 = vmul.f32 %v4229_v46, %v1624_v3  ;;  %vm1849_vm4 = vcmp.ge.f32.partialorder %v4828_v60, 0.0  ;;  %v1594_v42 = vmul.f32 %v4272_v28, %v1562_v40  ;;  %v4832_v60 = vld [vmem:[#allocation13_spill] sm:$0xff] }
 0x1e3   :  { %v1625_v27 = vadd.f32 0.2548296, %v1593_v51  ;;  %v1468_v1 = vmul.f32 %v4315_v52, %v1436_v11  ;;  %v1499_v32 = vadd.f32 1.4214138, %v1467_v14  ;;  %vm1850_vm5 = vcmp.ge.f32.partialorder %v4829_v4, 0.0  ;;  %3010 = vmatprep.mubr.bf16.mxu0 %v2029_v39 }
 0x1e4   :  { %v1815_v45 = vmul.f32 %v4210_v63, %v1655_v19  ;;  %v1816_v47 = vmul.f32 %v4248_v43, %v1656_v6  ;;  %v1406_v57 = vmul.f32 1.0614054, %v4366_v36  ;;  %v1437_v46 = vadd.f32 -1.4531521, %v1405_v24 }
 0x1e5   :  { %v1626_v18 = vadd.f32 0.2548296, %v1594_v42  ;;  %v1657_v25 = vmul.f32 %v4259_v29, %v1625_v27  ;;  %v1500_v26 = vadd.f32 1.4214138, %v1468_v1  ;;  %v1531_v31 = vmul.f32 %v4298_v17, %v1499_v32  ;;  %v4477_v13 = vpop.eup %3298 }
 0x1e6   :  { %v1879_v30 = vsub.f32 1.0, %v1815_v45  ;;  %v1880_v3 = vsub.f32 1.0, %v1816_v47  ;;  %v2548_v40 = vadd.f32 -1.0, %v1815_v45  ;;  %v2549_v51 = vadd.f32 -1.0, %v1816_v47 }
 0x1e7   :  { %v1658_v11 = vmul.f32 %v4272_v28, %v1626_v18  ;;  %v1817_v63 = vmul.f32 %v4262_v53, %v1657_v25  ;;  %v1532_v43 = vmul.f32 %v4315_v52, %v1500_v26  ;;  %v1563_v19 = vadd.f32 -0.28449672, %v1531_v31 }
 0x1e8   :  { %v1943_v14 = vsel %vm1847_vm2, %v1879_v30, %v2548_v40  ;;  %v1944_v29 = vsel %vm1848_vm3, %v1880_v3, %v2549_v51  ;;  %v1438_v39 = vadd.f32 -1.4531521, %v1406_v57  ;;  %v1469_v6 = vmul.f32 %v4329_v48, %v1437_v46 }
 0x1e9   :  { %v1975_v24 = vadd.f32 1.0, %v1943_v14  ;;  %v1976_v42 = vadd.f32 1.0, %v1944_v29  ;;  %v1818_v27 = vmul.f32 %v4275_v38, %v1658_v11  ;;  %v1881_v1 = vsub.f32 1.0, %v1817_v63 }
 0x1ea   :  { %v2550_v28 = vadd.f32 -1.0, %v1817_v63  ;;  %v1564_v32 = vadd.f32 -0.28449672, %v1532_v43  ;;  %v1595_v53 = vmul.f32 %v4298_v17, %v1563_v19  ;;  %v1470_v45 = vmul.f32 %v4366_v36, %v1438_v39 }
 0x1eb   :  { %vm1851_vm6 = vcmp.ge.f32.partialorder %v4186_v62, 0.0  ;;  %v2007_v47 = vmul.f32 %v1975_v24, %v4830_v41  ;;  %v2008_v18 = vmul.f32 %v1976_v42, %v4831_v0  ;;  %v1882_v57 = vsub.f32 1.0, %v1818_v27 }
 0x1ec   :  { %v2551_v25 = vadd.f32 -1.0, %v1818_v27  ;;  %v1945_v46 = vsel %vm1849_vm4, %v1881_v1, %v2550_v28  ;;  %v1596_v38 = vmul.f32 %v4315_v52, %v1564_v32  ;;  %v1627_v26 = vadd.f32 0.2548296, %v1595_v53 }
 0x1ed   :  { %v1501_v31 = vadd.f32 1.4214138, %v1469_v6  ;;  %vm1852_vm7 = vcmp.ge.f32.partialorder %v4221_v2, 0.0  ;;  %v2030_v30 = vpack.c.bf16 %v2008_v18, %v2007_v47  ;;  %v1977_v40 = vadd.f32 1.0, %v1945_v46 }
 0x1ee   :  { %v1946_v3 = vsel %vm1850_vm5, %v1882_v57, %v2551_v25  ;;  %v1502_v51 = vadd.f32 1.4214138, %v1470_v45  ;;  %v1628_v63 = vadd.f32 0.2548296, %v1596_v38  ;;  %v1659_v43 = vmul.f32 %v4298_v17, %v1627_v26 }
 0x1ef   :  { %v1978_v11 = vadd.f32 1.0, %v1946_v3  ;;  %v1533_v19 = vmul.f32 %v4329_v48, %v1501_v31  ;;  %3011 = vmatmul.mubr.bf16.gmra.mrb[64].mxu0 %v2030_v30  ;;  %v2009_v14 = vmul.f32 %v1977_v40, %v4832_v60  ;;  %v1407_v39 = vmul.f32 1.0614054, %v4389_v55 }
 0x1f0   :  { %v1534_v29 = vmul.f32 %v4366_v36, %v1502_v51  ;;  %v1408_v6 = vmul.f32 1.0614054, %v4410_v9  ;;  %v1660_v24 = vmul.f32 %v4315_v52, %v1628_v63  ;;  %v1819_v42 = vmul.f32 %v4309_v15, %v1659_v43  ;;  %v4833_v15 = vld [vmem:[#allocation30_spill] sm:$0xff] }
 0x1f1   :  { %v2010_v4 = vmul.f32 %v1978_v11, %v4233_v35  ;;  %v1565_v27 = vadd.f32 -0.28449672, %v1533_v19  ;;  %3300 = vpow2.f32 %v4412_v58  ;;  %v1439_v1 = vadd.f32 -1.4531521, %v1407_v39 }
 0x1f2   :  { %v1566_v17 = vadd.f32 -0.28449672, %v1534_v29  ;;  %v1440_v28 = vadd.f32 -1.4531521, %v1408_v6  ;;  %v1820_v53 = vmul.f32 %v4336_v44, %v1660_v24  ;;  %v1883_v45 = vsub.f32 1.0, %v1819_v42 }
 0x1f3   :  { %v2031_v32 = vpack.c.bf16 %v2010_v4, %v2009_v14  ;;  %v2552_v41 = vadd.f32 -1.0, %v1819_v42  ;;  %v1597_v47 = vmul.f32 %v4329_v48, %v1565_v27  ;;  %v1471_v35 = vmul.f32 %v4389_v55, %v1439_v1 }
 0x1f4   :  { %v1598_v0 = vmul.f32 %v4366_v36, %v1566_v17  ;;  %v1472_v52 = vmul.f32 %v4410_v9, %v1440_v28  ;;  %vm1853_vm8 = vcmp.ge.f32.partialorder %v4833_v15, 0.0  ;;  %v1884_v58 = vsub.f32 1.0, %v1820_v53 }
 0x1f5   :  { %3014 = vmatprep.mubr.bf16.mxu0 %v2031_v32  ;;  %v2553_v18 = vadd.f32 -1.0, %v1820_v53  ;;  %v1947_v57 = vsel %vm1851_vm6, %v1883_v45, %v2552_v41  ;;  %v1409_v44 = vmul.f32 1.0614054, %v4428_v33  ;;  %vm1854_vm9 = vcmp.ge.f32.partialorder %v4255_v56, 0.0 }
 0x1f6   :  { %3302 = vpow2.f32 %v4440_v49  ;;  %v1979_v25 = vadd.f32 1.0, %v1947_v57  ;;  %v1629_v46 = vadd.f32 0.2548296, %v1597_v47  ;;  %v1630_v38 = vadd.f32 0.2548296, %v1598_v0 }
 0x1f7   :  { %v1948_v26 = vsel %vm1852_vm7, %v1884_v58, %v2553_v18  ;;  %v1503_v31 = vadd.f32 1.4214138, %v1471_v35  ;;  %v1504_v30 = vadd.f32 1.4214138, %v1472_v52  ;;  %v1410_v3 = vmul.f32 1.0614054, %v4445_v5 }
 0x1f8   :  { %v1980_v40 = vadd.f32 1.0, %v1948_v26  ;;  %v2011_v62 = vmul.f32 %v1979_v25, %v4325_v50  ;;  %v1661_v51 = vmul.f32 %v4329_v48, %v1629_v46  ;;  %v1662_v11 = vmul.f32 %v4366_v36, %v1630_v38 }
 0x1f9   :  { %v1535_v63 = vmul.f32 %v4389_v55, %v1503_v31  ;;  %v1536_v49 = vmul.f32 %v4410_v9, %v1504_v30  ;;  %v1441_v43 = vadd.f32 -1.4531521, %v1409_v44  ;;  %v1442_v19 = vadd.f32 -1.4531521, %v1410_v3 }
 0x1fa   :  { %v2012_v2 = vmul.f32 %v1980_v40, %v4342_v8  ;;  %v1821_v60 = vmul.f32 %v4361_v22, %v1661_v51  ;;  %v1822_v14 = vmul.f32 %v4380_v23, %v1662_v11  ;;  %v1411_v29 = vmul.f32 1.0614054, %v4453_v37 }
 0x1fb   :  { %v1567_v39 = vadd.f32 -0.28449672, %v1535_v63  ;;  %v1568_v50 = vadd.f32 -0.28449672, %v1536_v49  ;;  %v1473_v48 = vmul.f32 %v4428_v33, %v1441_v43  ;;  %v1474_v36 = vmul.f32 %v4445_v5, %v1442_v19  ;;  %v4534_v6 = vpop.eup %3300 }
 0x1fc   :  { %v2032_v4 = vpack.c.bf16 %v2012_v2, %v2011_v62  ;;  %v1885_v24 = vsub.f32 1.0, %v1821_v60  ;;  %v1886_v42 = vsub.f32 1.0, %v1822_v14  ;;  %v2554_v27 = vadd.f32 -1.0, %v1821_v60 }
 0x1fd   :  { %v2555_v17 = vadd.f32 -1.0, %v1822_v14  ;;  %v1599_v8 = vmul.f32 %v4389_v55, %v1567_v39  ;;  %v1600_v22 = vmul.f32 %v4410_v9, %v1568_v50  ;;  %v1505_v23 = vadd.f32 1.4214138, %v1473_v48 }
 0x1fe   :  { %vm1855_vm10 = vcmp.ge.f32.partialorder %v4281_v59, 0.0  ;;  %vm1856_vm11 = vcmp.ge.f32.partialorder %v4307_v34, 0.0  ;;  %3015 = vmatmul.mubr.bf16.gmra.mrb[68].mxu0 %v2032_v4  ;;  %v1949_v1 = vsel %vm1853_vm8, %v1885_v24, %v2554_v27  ;;  %v1506_v28 = vadd.f32 1.4214138, %v1474_v36 }
 0x1ff   :  { %v1412_v32 = vmul.f32 1.0614054, %v4477_v13  ;;  %v1443_v53 = vadd.f32 -1.4531521, %v1411_v29  ;;  %v1950_v45 = vsel %vm1854_vm9, %v1886_v42, %v2555_v17  ;;  %v1981_v41 = vadd.f32 1.0, %v1949_v1 }
 0x200   :  { %v1631_v47 = vadd.f32 0.2548296, %v1599_v8  ;;  %v1632_v0 = vadd.f32 0.2548296, %v1600_v22  ;;  %v4545_v35 = vpop.eup %3302  ;;  %v1982_v52 = vadd.f32 1.0, %v1950_v45  ;;  %v1537_v58 = vmul.f32 %v4428_v33, %v1505_v23 }
 0x201   :  { %v1538_v18 = vmul.f32 %v4445_v5, %v1506_v28  ;;  %v1444_v57 = vadd.f32 -1.4531521, %v1412_v32  ;;  %v2013_v15 = vmul.f32 %v1981_v41, %v4352_v12  ;;  %v1475_v56 = vmul.f32 %v4453_v37, %v1443_v53  ;;  %v4835_v28 = vld [vmem:[#allocation16_spill] sm:$0xff]  ;;  %v4836_v41 = vld [vmem:[#allocation31_spill] sm:$0xff] }
 0x202   :  { %v1663_v44 = vmul.f32 %v4389_v55, %v1631_v47  ;;  %v1664_v25 = vmul.f32 %v4410_v9, %v1632_v0  ;;  %v2014_v46 = vmul.f32 %v1982_v52, %v4408_v61  ;;  %v1569_v38 = vadd.f32 -0.28449672, %v1537_v58  ;;  %v4837_v0 = vld [vmem:[#allocation27_spill] sm:$0xff] }
 0x203   :  { %v1570_v26 = vadd.f32 -0.28449672, %v1538_v18  ;;  %v1476_v31 = vmul.f32 %v4477_v13, %v1444_v57  ;;  %3304 = vpow2.f32 %v4442_v21  ;;  %v1507_v40 = vadd.f32 1.4214138, %v1475_v56 }
 0x204   :  { %v1823_v30 = vmul.f32 %v4397_v10, %v1663_v44  ;;  %v1824_v3 = vmul.f32 %v4421_v54, %v1664_v25  ;;  %v2033_v12 = vpack.c.bf16 %v2014_v46, %v2013_v15  ;;  %v1601_v55 = vmul.f32 %v4428_v33, %v1569_v38 }
 0x205   :  { %v1602_v9 = vmul.f32 %v4445_v5, %v1570_v26  ;;  %v1508_v62 = vadd.f32 1.4214138, %v1476_v31  ;;  %v1539_v21 = vmul.f32 %v4453_v37, %v1507_v40  ;;  %v1215_v54 = vmul.f32 0.5, %v4266_v7  ;;  %v4838_v26 = vld [vmem:[#allocation3_spill] sm:$0xff]  ;;  %v4839_v31 = vld [vmem:[#allocation17_spill] sm:$0xff] }
 0x206   :  { %v1887_v51 = vsub.f32 1.0, %v1823_v30  ;;  %v1888_v11 = vsub.f32 1.0, %v1824_v3  ;;  %v2556_v61 = vadd.f32 -1.0, %v1823_v30  ;;  %v2557_v63 = vadd.f32 -1.0, %v1824_v3  ;;  %3018 = vmatprep.mubr.bf16.mxu0 %v2033_v12  ;;  %v4840_v3 = vld [vmem:[#allocation19_spill] sm:$0xff] }
 0x207   :  { %v1633_v49 = vadd.f32 0.2548296, %v1601_v55  ;;  %v1634_v43 = vadd.f32 0.2548296, %v1602_v9  ;;  %v1540_v10 = vmul.f32 %v4477_v13, %v1508_v62  ;;  %v1216_v19 = vmul.f32 0.5, %v4294_v20  ;;  %v4841_v12 = vld [vmem:[#allocation15_spill] sm:$0xff] }
 0x208   :  { %v1951_v2 = vsel %vm1855_vm10, %v1887_v51, %v2556_v61  ;;  %v1952_v60 = vsel %vm1856_vm11, %v1888_v11, %v2557_v63  ;;  %v1571_v48 = vadd.f32 -0.28449672, %v1539_v21  ;;  %vm1858_vm13 = vcmp.ge.f32.partialorder %v4835_v28, 0.0  ;;  %v4588_v63 = vld [vmem:[%s4674_s4] ss:$0 sm:$0xff] }
 0x209   :  { %v1983_v14 = vadd.f32 1.0, %v1951_v2  ;;  %v1984_v29 = vadd.f32 1.0, %v1952_v60  ;;  %v1665_v39 = vmul.f32 %v4428_v33, %v1633_v49  ;;  %v1666_v50 = vmul.f32 %v4445_v5, %v1634_v43  ;;  %v4834_v33 = vld [vmem:[#allocation25_spill] sm:$0xff] }
 0x20a   :  { %v1572_v36 = vadd.f32 -0.28449672, %v1540_v10  ;;  %v1603_v59 = vmul.f32 %v4453_v37, %v1571_v48  ;;  %vm1857_vm12 = vcmp.ge.f32.partialorder %v4834_v33, 0.0  ;;  %v1217_v47 = vmul.f32 0.5, %v4836_v41 }
 0x20b   :  { %v2015_v4 = vmul.f32 %v1983_v14, %v1215_v54  ;;  %v2016_v24 = vmul.f32 %v1984_v29, %v1216_v19  ;;  %v1825_v7 = vmul.f32 %v4433_v16, %v1665_v39  ;;  %v1826_v20 = vmul.f32 %v4534_v6, %v1666_v50 }
 0x20c   :  { %v1604_v42 = vmul.f32 %v4477_v13, %v1572_v36  ;;  %v1635_v23 = vadd.f32 0.2548296, %v1603_v59  ;;  %v1218_v52 = vmul.f32 0.5, %v4837_v0  ;;  %vm1859_vm14 = vcmp.ge.f32.partialorder %v4838_v26, 0.0 }
 0x20d   :  { %v2034_v34 = vpack.c.bf16 %v2016_v24, %v2015_v4  ;;  %v1889_v27 = vsub.f32 1.0, %v1825_v7  ;;  %v1890_v17 = vsub.f32 1.0, %v1826_v20  ;;  %v2558_v8 = vadd.f32 -1.0, %v1825_v7  ;;  %v3305_v22 = vpop.eup %3304 }
 0x20e   :  { %v2559_v5 = vadd.f32 -1.0, %v1826_v20  ;;  %v1636_v1 = vadd.f32 0.2548296, %v1604_v42  ;;  %v1667_v53 = vmul.f32 %v4453_v37, %v1635_v23  ;;  %vm1860_vm15 = vcmp.ge.f32.partialorder %v4839_v31, 0.0 }
 0x20f   :  { %3019 = vmatmul.mubr.bf16.gmra.mrb[72].mxu0 %v2034_v34  ;;  %v1953_v16 = vsel %vm1857_vm12, %v1889_v27, %v2558_v8  ;;  %v1219_v40 = vmul.f32 0.5, %v4840_v3  ;;  %v1220_v55 = vmul.f32 0.5, %v4841_v12 }
 0x210   :  { %v1954_v32 = vsel %vm1858_vm13, %v1890_v17, %v2559_v5  ;;  %v1985_v6 = vadd.f32 1.0, %v1953_v16  ;;  %v1668_v45 = vmul.f32 %v4477_v13, %v1636_v1  ;;  %v1827_v18 = vmul.f32 %v4545_v35, %v1667_v53 }
 0x211   :  { %v1986_v58 = vadd.f32 1.0, %v1954_v32 }
 0x212   :  { %v1828_v57 = vmul.f32 %v3305_v22, %v1668_v45  ;;  %v2017_v15 = vmul.f32 %v1985_v6, %v1217_v47  ;;  %v1891_v25 = vsub.f32 1.0, %v1827_v18  ;;  %v2560_v46 = vadd.f32 -1.0, %v1827_v18 }
 0x213   :  { %v2018_v44 = vmul.f32 %v1986_v58, %v1218_v52 }
 0x214   :  { %v1892_v56 = vsub.f32 1.0, %v1828_v57  ;;  %v2561_v38 = vadd.f32 -1.0, %v1828_v57  ;;  %v1955_v13 = vsel %vm1859_vm14, %v1891_v25, %v2560_v46 }
 0x215   :  { %v2035_v37 = vpack.c.bf16 %v2018_v44, %v2017_v15  ;;  %v1987_v35 = vadd.f32 1.0, %v1955_v13 }
 0x216   :  { %v1956_v30 = vsel %vm1860_vm15, %v1892_v56, %v2561_v38 }
 0x217   :  { %3022 = vmatprep.mubr.bf16.mxu0 %v2035_v37  ;;  %v1988_v9 = vadd.f32 1.0, %v1956_v30  ;;  %v2019_v62 = vmul.f32 %v1987_v35, %v1219_v40 }
 0x219   :  { %v2020_v51 = vmul.f32 %v1988_v9, %v1220_v55 }
 0x21b   :  { %v2036_v11 = vpack.c.bf16 %v2020_v51, %v2019_v62 }
 0x21d   :  { %3023 = vmatmul.mubr.bf16.gmra.mrb[76].mxu0 %v2036_v11 }
 0x246   :  { %v2996_v61 = vpop.f32.mrb[48].mxu0 }
 0x247   :  { %v2142_v49 = vpop.f32.mrb[49].mxu0  ;;  %v2151_v21 = vadd.f32 %v2996_v61, %v4588_v63 }
 0x248   :  { %v2997_v43 = vpop.f32.mrb[50].mxu0  ;;  %v2143_v19 = vadd.f32 %v4588_v63, %v2142_v49 }
 0x249   :  { %v2154_v10 = vadd.f32 %v2997_v43, %v4588_v63  ;;  %v2145_v54 = vpop.f32.mrb[51].mxu0 }
 0x24a   :  { %v2146_v2 = vadd.f32 %v4588_v63, %v2145_v54 }
 0x24b   :  { %v2643_v60 = vpack.c.bf16 %v2154_v10, %v2151_v21 }
 0x24c   :  { %v2638_v14 = vpack.c.bf16 %v2146_v2, %v2143_v19 }
 0x24d   :  { %2715 = vst [vmem:[%s4675_s5 + $0x8] sm:$0xff] %v2643_v60  }
 0x24e   :  { %2639 = vst [vmem:[%s4675_s5] sm:$0xff] %v2638_v14  }
 0x268   :  { %v3000_v29 = vpop.f32.mrb[52].mxu0 }
 0x269   :  { %v2158_v39 = vpop.f32.mrb[53].mxu0  ;;  %v2167_v48 = vadd.f32 %v3000_v29, %v4588_v63 }
 0x26a   :  { %v3001_v50 = vpop.f32.mrb[54].mxu0  ;;  %v2159_v24 = vadd.f32 %v4588_v63, %v2158_v39 }
 0x26b   :  { %v2170_v36 = vadd.f32 %v3001_v50, %v4588_v63  ;;  %v2161_v4 = vpop.f32.mrb[55].mxu0 }
 0x26c   :  { %v2162_v7 = vadd.f32 %v4588_v63, %v2161_v4 }
 0x26d   :  { %v2653_v20 = vpack.c.bf16 %v2170_v36, %v2167_v48 }
 0x26e   :  { %v2648_v59 = vpack.c.bf16 %v2162_v7, %v2159_v24 }
 0x26f   :  { %2717 = vst [vmem:[%s4675_s5 + $0x18] sm:$0xff] %v2653_v20  }
 0x270   :  { %2716 = vst [vmem:[%s4675_s5 + $0x10] sm:$0xff] %v2648_v59  }
 0x289   :  { %v3004_v42 = vpop.f32.mrb[56].mxu0 }
 0x28a   :  { %v2174_v34 = vpop.f32.mrb[57].mxu0  ;;  %v2183_v17 = vadd.f32 %v3004_v42, %v4588_v63 }
 0x28b   :  { %v3005_v27 = vpop.f32.mrb[58].mxu0  ;;  %v2175_v33 = vadd.f32 %v4588_v63, %v2174_v34 }
 0x28c   :  { %v2186_v8 = vadd.f32 %v3005_v27, %v4588_v63  ;;  %v2177_v22 = vpop.f32.mrb[59].mxu0 }
 0x28d   :  { %v2178_v5 = vadd.f32 %v4588_v63, %v2177_v22 }
 0x28e   :  { %v2663_v23 = vpack.c.bf16 %v2186_v8, %v2183_v17 }
 0x28f   :  { %v2658_v1 = vpack.c.bf16 %v2178_v5, %v2175_v33 }
 0x290   :  { %2719 = vst [vmem:[%s4675_s5 + $0x28] sm:$0xff] %v2663_v23  }
 0x291   :  { %2718 = vst [vmem:[%s4675_s5 + $0x20] sm:$0xff] %v2658_v1  }
 0x2a6   :  { %v3008_v28 = vpop.f32.mrb[60].mxu0 }
 0x2a7   :  { %v2190_v16 = vpop.f32.mrb[61].mxu0  ;;  %v2199_v6 = vadd.f32 %v3008_v28, %v4588_v63 }
 0x2a8   :  { %v3009_v32 = vpop.f32.mrb[62].mxu0  ;;  %v2191_v41 = vadd.f32 %v4588_v63, %v2190_v16 }
 0x2a9   :  { %v2202_v53 = vadd.f32 %v3009_v32, %v4588_v63  ;;  %v2193_v45 = vpop.f32.mrb[63].mxu0 }
 0x2aa   :  { %v2194_v47 = vadd.f32 %v4588_v63, %v2193_v45 }
 0x2ab   :  { %v2673_v0 = vpack.c.bf16 %v2202_v53, %v2199_v6 }
 0x2ac   :  { %v2668_v52 = vpack.c.bf16 %v2194_v47, %v2191_v41 }
 0x2ad   :  { %2721 = vst [vmem:[%s4675_s5 + $0x38] sm:$0xff] %v2673_v0  }
 0x2ae   :  { %2720 = vst [vmem:[%s4675_s5 + $0x30] sm:$0xff] %v2668_v52  }
 0x2c2   :  { %v3012_v58 = vpop.f32.mrb[64].mxu0 }
 0x2c3   :  { %v2206_v18 = vpop.f32.mrb[65].mxu0  ;;  %v2215_v15 = vadd.f32 %v3012_v58, %v4588_v63 }
 0x2c4   :  { %v3013_v57 = vpop.f32.mrb[66].mxu0  ;;  %v2207_v56 = vadd.f32 %v4588_v63, %v2206_v18 }
 0x2c5   :  { %v2218_v44 = vadd.f32 %v3013_v57, %v4588_v63  ;;  %v2209_v25 = vpop.f32.mrb[67].mxu0 }
 0x2c6   :  { %v2210_v46 = vadd.f32 %v4588_v63, %v2209_v25 }
 0x2c7   :  { %v2683_v38 = vpack.c.bf16 %v2218_v44, %v2215_v15 }
 0x2c8   :  { %v2678_v26 = vpack.c.bf16 %v2210_v46, %v2207_v56 }
 0x2c9   :  { %2723 = vst [vmem:[%s4675_s5 + $0x48] sm:$0xff] %v2683_v38  }
 0x2ca   :  { %2722 = vst [vmem:[%s4675_s5 + $0x40] sm:$0xff] %v2678_v26  }
 0x2d1   :  { %v3016_v31 = vpop.f32.mrb[68].mxu0 }
 0x2d2   :  { %v2222_v37 = vpop.f32.mrb[69].mxu0  ;;  %v2231_v30 = vadd.f32 %v3016_v31, %v4588_v63 }
 0x2d3   :  { %v3017_v13 = vpop.f32.mrb[70].mxu0  ;;  %v2223_v12 = vadd.f32 %v4588_v63, %v2222_v37 }
 0x2d4   :  { %v2234_v3 = vadd.f32 %v3017_v13, %v4588_v63  ;;  %v2225_v40 = vpop.f32.mrb[71].mxu0 }
 0x2d5   :  { %v2226_v55 = vadd.f32 %v4588_v63, %v2225_v40 }
 0x2d6   :  { %v2693_v35 = vpack.c.bf16 %v2234_v3, %v2231_v30 }
 0x2d7   :  { %v2688_v9 = vpack.c.bf16 %v2226_v55, %v2223_v12 }
 0x2d8   :  { %2725 = vst [vmem:[%s4675_s5 + $0x58] sm:$0xff] %v2693_v35  }
 0x2d9   :  { %2724 = vst [vmem:[%s4675_s5 + $0x50] sm:$0xff] %v2688_v9  }
 0x2e2   :  { %v3020_v62 = vpop.f32.mrb[72].mxu0 }
 0x2e3   :  { %v2238_v51 = vpop.f32.mrb[73].mxu0  ;;  %v2247_v61 = vadd.f32 %v3020_v62, %v4588_v63 }
 0x2e4   :  { %v3021_v11 = vpop.f32.mrb[74].mxu0  ;;  %v2239_v21 = vadd.f32 %v4588_v63, %v2238_v51 }
 0x2e5   :  { %v2250_v49 = vadd.f32 %v3021_v11, %v4588_v63  ;;  %v2241_v43 = vpop.f32.mrb[75].mxu0 }
 0x2e6   :  { %v2242_v10 = vadd.f32 %v4588_v63, %v2241_v43 }
 0x2e7   :  { %v2703_v54 = vpack.c.bf16 %v2250_v49, %v2247_v61 }
 0x2e8   :  { %v2698_v19 = vpack.c.bf16 %v2242_v10, %v2239_v21 }
 0x2e9   :  { %2727 = vst [vmem:[%s4675_s5 + $0x68] sm:$0xff] %v2703_v54  }
 0x2ea   :  { %2726 = vst [vmem:[%s4675_s5 + $0x60] sm:$0xff] %v2698_v19  }
 0x2f0   :  { %v3024_v2 = vpop.f32.mrb[76].mxu0 }
 0x2f1   :  { %v2254_v60 = vpop.f32.mrb[77].mxu0  ;;  %v2263_v29 = vadd.f32 %v3024_v2, %v4588_v63 }
 0x2f2   :  { %v3025_v14 = vpop.f32.mrb[78].mxu0  ;;  %v2255_v48 = vadd.f32 %v4588_v63, %v2254_v60 }
 0x2f3   :  { %v2266_v39 = vadd.f32 %v3025_v14, %v4588_v63  ;;  %v2257_v50 = vpop.f32.mrb[79].mxu0 }
 0x2f4   :  { %v2258_v36 = vadd.f32 %v4588_v63, %v2257_v50 }
 0x2f5   :  { %v2713_v4 = vpack.c.bf16 %v2266_v39, %v2263_v29 }
 0x2f6   :  { %v2708_v24 = vpack.c.bf16 %v2258_v36, %v2255_v48 }
 0x2f7   :  { %2729 = vst [vmem:[%s4675_s5 + $0x78] sm:$0xff] %v2713_v4  }
 0x2f8   :  { %2728 = vst [vmem:[%s4675_s5 + $0x70] sm:$0xff] %v2708_v24  }

</bundles_post_ra>
